<compile_context>
chip_gen: v5e
topology: v5e:2x2
jax: 0.10.0
libtpu: 0.0.40
codegen_flags: <defaults>
</compile_context>

<pallas_src>
import jax
import jax.numpy as jnp
from jax.experimental import pallas as pl
from jax.experimental.pallas import tpu as pltpu

# ---- constants derived from the PyTorch module ------------------------------
KEY_POSSIBLES = 7
MOUSE_BUTTON_POSSIBLES = 3
MOUSE_X_POSSIBLES = 23
MOUSE_Y_POSSIBLES = 15
N_ACTIONS = (KEY_POSSIBLES + MOUSE_BUTTON_POSSIBLES
             + MOUSE_X_POSSIBLES + MOUSE_Y_POSSIBLES)        # 48
N_SNAPSHOT_EMBEDDING = N_ACTIONS                             # 48
N_SS_FIELDS = 8756


# ---- Pallas kernel body ------------------------------------------------------
def _linear_kernel(x_ref, w_ref, b_ref, o_ref):
    # x_ref: (TB, K)  activation tile (f32 or bf16), pipelined over the batch
    # w_ref: (K, N)   pre-transposed weight W^T, grid-resident
    # b_ref: (1, N)   bias
    # o_ref: (TB, N)  output tile (f32)
    x = x_ref[...]
    w = w_ref[...]
    if x.dtype != w.dtype:
        # Tile is already in VMEM; casting here (e.g. f32 -> bf16 when the
        # weight is stored in bf16) keeps the MXU matmul homogeneous.
        x = x.astype(w.dtype)
    # Canonical MXU layout: contract x's minor (lane) dim with w's major
    # (sublane) dim -- no transpose of the resident weight per grid step.
    acc = jnp.dot(x, w, preferred_element_type=jnp.float32)
    o_ref[...] = (acc + b_ref[...].astype(jnp.float32)).astype(o_ref.dtype)


# ---- tuning helpers ----------------------------------------------------------
def _default_tuning():
    """(block_b, vmem_limit_bytes): v7x-safe defaults (64 MiB VMEM per TC),
    auto-widened on 128-MiB-VMEM chips (v5e / v6e)."""
    block_b, vmem_limit = 512, 52 * 1024 * 1024
    try:
        info = pltpu.get_tpu_info()
        if getattr(info, "vmem_capacity_bytes", 0) >= 100 * 1024 * 1024:
            block_b, vmem_limit = 1024, 96 * 1024 * 1024
    except Exception:
        pass
    return block_b, vmem_limit


def _pick_batch_tile(B, block_b):
    """Batch tile: multiple of 8 (or == B), capped at block_b, and split into
    >= 2 tiles whenever B >= 16 so the 'parallel' axis shards across both v7x
    TensorCores and the x-tile DMAs pipeline against compute."""
    if B < 16:
        return B                                   # single full-array block
    half = 8 * pl.cdiv(pl.cdiv(B, 2), 8)           # ~B/2 rounded up to 8
    return max(8, min(block_b, half))


# ---- wrapper -----------------------------------------------------------------
def snapshot_model_forward(x, weight_kn, bias, *, block_b=None,
                           vmem_limit_bytes=None):
    """y = x @ W^T + b  (nn.Linear semantics) with W^T pre-transposed at load.

    x:         (B, N_SS_FIELDS)                     f32 or bf16
    weight_kn: (N_SS_FIELDS, N_SNAPSHOT_EMBEDDING)  = nn.Linear weight .T  (f32/bf16)
    bias:      (N_SNAPSHOT_EMBEDDING,)              f32
    returns:   (B, N_SNAPSHOT_EMBEDDING)            f32
    """
    B, K = x.shape
    K_w, N = weight_kn.shape
    assert K == K_w == N_SS_FIELDS and N == N_SNAPSHOT_EMBEDDING
    assert bias.shape == (N,)

    d_block_b, d_vmem = _default_tuning()
    if block_b is None:
        block_b = d_block_b
    if vmem_limit_bytes is None:
        vmem_limit_bytes = d_vmem

    tb = _pick_batch_tile(B, block_b)
    grid_b = pl.cdiv(B, tb)

    bias2d = bias.reshape(1, N)

    cost = pl.CostEstimate(
        flops=2 * B * K * N,
        transcendentals=0,
        bytes_accessed=(x.size * x.dtype.itemsize
                        + weight_kn.size * weight_kn.dtype.itemsize
                        + bias.size * bias.dtype.itemsize
                        + B * N * 4),
    )

    def build_and_run(single_buffer_consts):
        const_kwargs = {}
        if single_buffer_consts:
            # Grid-constant operands are never re-fetched: one VMEM buffer is
            # enough, saving up to ~4.5 MiB of headroom on v7x's 64 MiB/TC.
            const_kwargs = dict(pipeline_mode=pl.Buffered(1))
        in_specs = [
            pl.BlockSpec((tb, K), lambda i: (i, 0)),                  # x tile
            pl.BlockSpec((K, N), lambda i: (0, 0), **const_kwargs),   # resident W^T
            pl.BlockSpec((1, N), lambda i: (0, 0), **const_kwargs),   # resident bias
        ]
        return pl.pallas_call(
            _linear_kernel,
            out_shape=jax.ShapeDtypeStruct((B, N), jnp.float32),
            grid=(grid_b,),
            in_specs=in_specs,
            out_specs=pl.BlockSpec((tb, N), lambda i: (i, 0)),
            compiler_params=pltpu.CompilerParams(
                dimension_semantics=("parallel",),   # independent batch tiles
                vmem_limit_bytes=vmem_limit_bytes,
            ),
            cost_estimate=cost,
        )(x, weight_kn, bias2d)

    try:
        return build_and_run(True)
    except Exception:
        # JAX versions without BlockSpec(pipeline_mode=...): default double
        # buffering of the (small) grid-constant operands is still correct.
        return build_and_run(False)


# ---- parameter init / one-time load-time prep --------------------------------
def init_params(key):
    """nn.Linear default init U(-1/sqrt(K), 1/sqrt(K)), native (N, K) layout."""
    k_w, k_b = jax.random.split(key)
    bound = 1.0 / jnp.sqrt(jnp.float32(N_SS_FIELDS))
    weight = jax.random.uniform(
        k_w, (N_SNAPSHOT_EMBEDDING, N_SS_FIELDS), jnp.float32, -bound, bound)
    bias = jax.random.uniform(
        k_b, (N_SNAPSHOT_EMBEDDING,), jnp.float32, -bound, bound)
    return weight, bias


def prepare_params(weight_nk, bias, dtype=jnp.bfloat16):
    """One-time, model-load-time prep (NOT per call): transpose the native
    PyTorch (N, K) weight to (K, N) so the kernel runs a canonical MXU matmul,
    and optionally store it in bf16 to halve its HBM read."""
    return jnp.asarray(weight_nk).T.astype(dtype), jnp.asarray(bias)


# ---- demo --------------------------------------------------------------------
if __name__ == "__main__":
    key = jax.random.PRNGKey(0)
    k_x1, k_x2, k_p = jax.random.split(key, 3)

    weight_f32, bias = init_params(k_p)              # native nn.Linear (N, K)

    # One-time conversions at "model load" time.
    weight_kn_bf16, _ = prepare_params(weight_f32, bias, dtype=jnp.bfloat16)
    weight_kn_f32, _ = prepare_params(weight_f32, bias, dtype=jnp.float32)

    # --- path 1: tiny batch, bf16 weight (deployment path, single block) ----
    B1 = 2
    x1 = jax.random.normal(k_x1, (B1, N_SS_FIELDS), jnp.float32)
    y1 = jax.block_until_ready(snapshot_model_forward(x1, weight_kn_bf16, bias))
    assert y1.shape == (B1, N_SNAPSHOT_EMBEDDING) and y1.dtype == jnp.float32

    # Reference with identical operand rounding (bf16 operands, f32 accum).
    y1_ref_bf16 = (jnp.dot(x1.astype(jnp.bfloat16), weight_kn_bf16,
                           preferred_element_type=jnp.float32) + bias)
    assert jnp.allclose(y1, y1_ref_bf16, atol=2e-3, rtol=2e-3)

    # Sanity check vs the full-f32 nn.Linear reference (only bf16 rounding).
    y1_ref_f32 = x1 @ weight_f32.T + bias
    assert jnp.allclose(y1, y1_ref_f32, atol=3e-2, rtol=3e-2)

    # --- path 2: f32 weight, batch split into >= 2 tiles (megacore path) ----
    B2 = 16
    x2 = jax.random.normal(k_x2, (B2, N_SS_FIELDS), jnp.float32)
    y2 = jax.block_until_ready(snapshot_model_forward(x2, weight_kn_f32, bias))
    y2_ref = x2 @ weight_f32.T + bias
    assert y2.shape == (B2, N_SNAPSHOT_EMBEDDING)
    assert jnp.allclose(y2, y2_ref, atol=2e-3, rtol=2e-3)

    print("KERNEL_OK")
</pallas_src>

<mosaic_0001>
module attributes {stable_mosaic.version = 11 : i64} {
  func.func @_linear_kernel(%arg0: i32, %arg1: memref<2x8756xf32, #tpu.memory_space<vmem>>, %arg2: memref<8756x48xbf16, #tpu.memory_space<vmem>>, %arg3: memref<1x48xf32, #tpu.memory_space<vmem>>, %arg4: memref<2x48xf32, #tpu.memory_space<vmem>>) attributes {dimension_semantics = [#tpu.dimension_semantics<parallel>], iteration_bounds = array<i64: 1>, scalar_prefetch = 0 : i64, scratch_operands = 0 : i64, tpu.core_type = #tpu.core_type<tc>, window_params = [{transform_indices = @transform_0, window_bounds = array<i64: 2, 8756>}, {pipeline_mode = #tpu.pipeline_mode<synchronous>, transform_indices = @transform_1, window_bounds = array<i64: 8756, 48>}, {pipeline_mode = #tpu.pipeline_mode<synchronous>, transform_indices = @transform_2, window_bounds = array<i64: 1, 48>}, {transform_indices = @transform_3, window_bounds = array<i64: 2, 48>}]} {
    %c0 = arith.constant 0 : index
    %c0_0 = arith.constant 0 : index
    %0 = vector.load %arg1[%c0, %c0_0] : memref<2x8756xf32, #tpu.memory_space<vmem>>, vector<2x8756xf32>
    %c0_1 = arith.constant 0 : index
    %c0_2 = arith.constant 0 : index
    %1 = vector.load %arg2[%c0_1, %c0_2] : memref<8756x48xbf16, #tpu.memory_space<vmem>>, vector<8756x48xbf16>
    %2 = arith.truncf %0 : vector<2x8756xf32> to vector<2x8756xbf16>
    %cst = arith.constant dense<0.000000e+00> : vector<2x48xf32>
    %3 = tpu.matmul %2, %1, %cst {dimension_numbers = #tpu.dot_dimension_numbers<[1], [0], [0], [1], [0, 0, 1, 1], [], []>} : vector<2x8756xbf16>, vector<8756x48xbf16>, vector<2x48xf32> -> vector<2x48xf32>
    %c0_3 = arith.constant 0 : index
    %c0_4 = arith.constant 0 : index
    %4 = vector.load %arg3[%c0_3, %c0_4] : memref<1x48xf32, #tpu.memory_space<vmem>>, vector<1x48xf32>
    %5 = vector.broadcast %4 : vector<1x48xf32> to vector<2x48xf32>
    %6 = arith.addf %3, %5 : vector<2x48xf32>
    %c0_5 = arith.constant 0 : index
    %c0_6 = arith.constant 0 : index
    %7 = vector.load %arg4[%c0_5, %c0_6] : memref<2x48xf32, #tpu.memory_space<vmem>>, vector<2x48xf32>
    tpu.vector_store %arg4[%c0_5, %c0_6], %6 {strides = array<i32>} : memref<2x48xf32, #tpu.memory_space<vmem>>, vector<2x48xf32>,
    return
  }
  func.func @transform_0(%arg0: i32) -> (i32, i32) {
    %c0_i32 = arith.constant 0 : i32
    %c0_i32_0 = arith.constant 0 : i32
    return %arg0, %c0_i32 : i32, i32
  }
  func.func @transform_1(%arg0: i32) -> (i32, i32) {
    %c0_i32 = arith.constant 0 : i32
    %c0_i32_0 = arith.constant 0 : i32
    %c0_i32_1 = arith.constant 0 : i32
    return %c0_i32, %c0_i32_0 : i32, i32
  }
  func.func @transform_2(%arg0: i32) -> (i32, i32) {
    %c0_i32 = arith.constant 0 : i32
    %c0_i32_0 = arith.constant 0 : i32
    %c0_i32_1 = arith.constant 0 : i32
    return %c0_i32, %c0_i32_0 : i32, i32
  }
  func.func @transform_3(%arg0: i32) -> (i32, i32) {
    %c0_i32 = arith.constant 0 : i32
    %c0_i32_0 = arith.constant 0 : i32
    return %arg0, %c0_i32 : i32, i32
  }
}

module attributes {stable_mosaic.version = 11 : i64} {
  func.func @_linear_kernel(%arg0: i32, %arg1: memref<2x8756xf32, #tpu.memory_space<vmem>>, %arg2: memref<8756x48xbf16, #tpu.memory_space<vmem>>, %arg3: memref<1x48xf32, #tpu.memory_space<vmem>>, %arg4: memref<2x48xf32, #tpu.memory_space<vmem>>) attributes {dimension_semantics = [#tpu.dimension_semantics<parallel>], iteration_bounds = array<i64: 1>, scalar_prefetch = 0 : i64, scratch_operands = 0 : i64, tpu.core_type = #tpu.core_type<tc>, window_params = [{transform_indices = @transform_0, window_bounds = array<i64: 2, 8756>}, {pipeline_mode = #tpu.pipeline_mode<synchronous>, transform_indices = @transform_1, window_bounds = array<i64: 8756, 48>}, {pipeline_mode = #tpu.pipeline_mode<synchronous>, transform_indices = @transform_2, window_bounds = array<i64: 1, 48>}, {transform_indices = @transform_3, window_bounds = array<i64: 2, 48>}]} {
    %c0 = arith.constant 0 : index
    %c0_0 = arith.constant 0 : index
    %0 = vector.load %arg1[%c0, %c0_0] : memref<2x8756xf32, #tpu.memory_space<vmem>>, vector<2x8756xf32>
    %c0_1 = arith.constant 0 : index
    %c0_2 = arith.constant 0 : index
    %1 = vector.load %arg2[%c0_1, %c0_2] : memref<8756x48xbf16, #tpu.memory_space<vmem>>, vector<8756x48xbf16>
    %2 = arith.truncf %0 : vector<2x8756xf32> to vector<2x8756xbf16>
    %cst = arith.constant dense<0.000000e+00> : vector<2x48xf32>
    %3 = tpu.matmul %2, %1, %cst {dimension_numbers = #tpu.dot_dimension_numbers<[1], [0], [0], [1], [0, 0, 1, 1], [], []>} : vector<2x8756xbf16>, vector<8756x48xbf16>, vector<2x48xf32> -> vector<2x48xf32>
    %c0_3 = arith.constant 0 : index
    %c0_4 = arith.constant 0 : index
    %4 = vector.load %arg3[%c0_3, %c0_4] : memref<1x48xf32, #tpu.memory_space<vmem>>, vector<1x48xf32>
    %5 = vector.broadcast %4 : vector<1x48xf32> to vector<2x48xf32>
    %6 = arith.addf %3, %5 : vector<2x48xf32>
    %c0_5 = arith.constant 0 : index
    %c0_6 = arith.constant 0 : index
    %7 = vector.load %arg4[%c0_5, %c0_6] : memref<2x48xf32, #tpu.memory_space<vmem>>, vector<2x48xf32>
    tpu.vector_store %arg4[%c0_5, %c0_6], %6 {strides = array<i32>} : memref<2x48xf32, #tpu.memory_space<vmem>>, vector<2x48xf32>,
    return
  }
  func.func @transform_0(%arg0: i32) -> (i32, i32) {
    %c0_i32 = arith.constant 0 : i32
    %c0_i32_0 = arith.constant 0 : i32
    return %arg0, %c0_i32 : i32, i32
  }
  func.func @transform_1(%arg0: i32) -> (i32, i32) {
    %c0_i32 = arith.constant 0 : i32
    %c0_i32_0 = arith.constant 0 : i32
    %c0_i32_1 = arith.constant 0 : i32
    return %c0_i32, %c0_i32_0 : i32, i32
  }
  func.func @transform_2(%arg0: i32) -> (i32, i32) {
    %c0_i32 = arith.constant 0 : i32
    %c0_i32_0 = arith.constant 0 : i32
    %c0_i32_1 = arith.constant 0 : i32
    return %c0_i32, %c0_i32_0 : i32, i32
  }
  func.func @transform_3(%arg0: i32) -> (i32, i32) {
    %c0_i32 = arith.constant 0 : i32
    %c0_i32_0 = arith.constant 0 : i32
    return %arg0, %c0_i32 : i32, i32
  }
}

</mosaic_0001>

<bundles_post_ra>
// kernel: tpu_custom_call.1
= control target key start
LH: loop header
LB: loop body
LE: loop exit
PB: predicated region body
PF: predicated region fallthrough
CT: control target
= control target key end

     0   :  { %s10155_s0 = inlined_call_operand.vmem [shape: f32[2,8756], index: 0, kind: input, shape index: {}]   ;;  %s10156_s1 = inlined_call_operand.vmem [shape: bf16[8756,48], index: 1, kind: input, shape index: {}]   ;;  %s10157_s2 = inlined_call_operand.vmem [shape: f32[1,48], index: 2, kind: input, shape index: {}]   ;;  %s10158_s3 = inlined_call_operand.hbm [shape: f32[2,48], index: 3, kind: output, shape index: {}]  }
   0x1   :  { %v7781_v0 = vld [vmem:[%s10156_s1 + $0x38] sm:$0xff]  ;;  %v7780_v4 = vld [vmem:[%s10156_s1 + $0x30] sm:$0xff]  ;;  %v7779_v8 = vld [vmem:[%s10156_s1 + $0x28] sm:$0xff] }
   0x2   :  { %v7797_v1 = vld [vmem:[%s10156_s1 + $0xb8] sm:$0xff]  ;;  %4670 = vmatpush.bf16.msra.mxu0 %v7781_v0  ;;  %v7796_v5 = vld [vmem:[%s10156_s1 + $0xb0] sm:$0xff]  ;;  %v7795_v9 = vld [vmem:[%s10156_s1 + $0xa8] sm:$0xff] }
   0x3   :  { %v7789_v2 = vld [vmem:[%s10156_s1 + $0x78] sm:$0xff]  ;;  %4696 = vmatpush.bf16.msra.mxu2 %v7797_v1  ;;  %v7788_v6 = vld [vmem:[%s10156_s1 + $0x70] sm:$0xff]  ;;  %v7787_v10 = vld [vmem:[%s10156_s1 + $0x68] sm:$0xff] }
   0x4   :  { %v7805_v3 = vld [vmem:[%s10156_s1 + $0xf8] sm:$0xff]  ;;  %4683 = vmatpush.bf16.msra.mxu1 %v7789_v2  ;;  %v7804_v7 = vld [vmem:[%s10156_s1 + $0xf0] sm:$0xff]  ;;  %v7803_v11 = vld [vmem:[%s10156_s1 + $0xe8] sm:$0xff] }
   0x5   :  { %4709 = vmatpush.bf16.msra.mxu3 %v7805_v3  ;;  %v7778_v12 = vld [vmem:[%s10156_s1 + $0x20] sm:$0xff]  ;;  %v7777_v16 = vld [vmem:[%s10156_s1 + $0x18] sm:$0xff]  ;;  %v7776_v21 = vld [vmem:[%s10156_s1 + $0x10] sm:$0xff] }
   0x6   :  { %4671 = vmatpush.bf16.msra.mxu0 %v7780_v4  ;;  %v7794_v13 = vld [vmem:[%s10156_s1 + $0xa0] sm:$0xff]  ;;  %v7793_v17 = vld [vmem:[%s10156_s1 + $0x98] sm:$0xff]  ;;  %v7792_v22 = vld [vmem:[%s10156_s1 + $0x90] sm:$0xff] }
   0x7   :  { %4697 = vmatpush.bf16.msra.mxu2 %v7796_v5  ;;  %v7786_v14 = vld [vmem:[%s10156_s1 + $0x60] sm:$0xff]  ;;  %v7785_v18 = vld [vmem:[%s10156_s1 + $0x58] sm:$0xff]  ;;  %v7784_v23 = vld [vmem:[%s10156_s1 + $0x50] sm:$0xff] }
   0x8   :  { %4684 = vmatpush.bf16.msra.mxu1 %v7788_v6  ;;  %v7802_v15 = vld [vmem:[%s10156_s1 + $0xe0] sm:$0xff]  ;;  %v7801_v19 = vld [vmem:[%s10156_s1 + $0xd8] sm:$0xff]  ;;  %v7800_v24 = vld [vmem:[%s10156_s1 + $0xd0] sm:$0xff] }
   0x9   :  { %4710 = vmatpush.bf16.msra.mxu3 %v7804_v7  ;;  %v16_v20 = vld [vmem:[%s10155_s0] sm:$0xff] }
   0xa   :  { %4672 = vmatpush.bf16.msra.mxu0 %v7779_v8  ;;  %1147 = vst [vmem:[#allocation1] ss:$4 sm:$0xff] %v16_v20 }
   0xb   :  { %4698 = vmatpush.bf16.msra.mxu2 %v7795_v9 }
   0xc   :  { %4685 = vmatpush.bf16.msra.mxu1 %v7787_v10 }
   0xd   :  { %4711 = vmatpush.bf16.msra.mxu3 %v7803_v11 }
   0xe   :  { %4673 = vmatpush.bf16.msra.mxu0 %v7778_v12 }
   0xf   :  { %4699 = vmatpush.bf16.msra.mxu2 %v7794_v13 }
  0x10   :  { %4686 = vmatpush.bf16.msra.mxu1 %v7786_v14 }
  0x11   :  { %4712 = vmatpush.bf16.msra.mxu3 %v7802_v15 }
  0x12   :  { %4674 = vmatpush.bf16.msra.mxu0 %v7777_v16 }
  0x13   :  { %4700 = vmatpush.bf16.msra.mxu2 %v7793_v17 }
  0x14   :  { %4687 = vmatpush.bf16.msra.mxu1 %v7785_v18 }
  0x15   :  { %4713 = vmatpush.bf16.msra.mxu3 %v7801_v19 }
  0x16   :  { %8 = vsyncpa [#allocation3], 0  ;;  %4675 = vmatpush.bf16.msra.mxu0 %v7776_v21  ;;  %v7775_v25 = vld [vmem:[%s10156_s1 + $0x8] sm:$0xff]  ;;  %v7774_v30 = vld [vmem:[%s10156_s1] sm:$0xff]  ;;  %vm4666_vm0 = vcmask 1041408   ;;  %vm4662_vm1 = vcmask 424960  }
  0x17   :  { %4701 = vmatpush.bf16.msra.mxu2 %v7792_v22  ;;  %v7791_v26 = vld [vmem:[%s10156_s1 + $0x88] sm:$0xff]  ;;  %v7790_v31 = vld [vmem:[%s10156_s1 + $0x80] sm:$0xff]  ;;  %v18_v32 = vld [vmem:[%s10155_s0 + $0x10] sm:$0xff]  ;;  %s5576_s12 = sshll.u32 %s10158_s3, 4  ;;  %vm5567_vm2 = vcmask 386048   ;;  %s5577_s12 = int_to_ptr.hbm [resolvable:$true] %s5576_s12 }
  0x18   :  { %4688 = vmatpush.bf16.msra.mxu1 %v7784_v23  ;;  %v7783_v27 = vld [vmem:[%s10156_s1 + $0x48] sm:$0xff]  ;;  %v1152_v33 = vld.sshfl [vmem:[#allocation1 + $0x10] sm:$0xff pattern:$0x73625140]  ;;  %v7813_v37 = vld [vmem:[%s10156_s1 + $0x138] sm:$0xff] }
  0x19   :  { %4714 = vmatpush.bf16.msra.mxu3 %v7800_v24  ;;  %v7799_v28 = vld [vmem:[%s10156_s1 + $0xc8] sm:$0xff]  ;;  %v1150_v34 = vld.sshfl [vmem:[#allocation1] sm:$0xff pattern:$0x73625140]  ;;  %v7829_v38 = vld [vmem:[%s10156_s1 + $0x1b8] sm:$0xff]  ;;  %v1306_v43 = vpack.c.bf16 %v1152_v33, %v1152_v33 }
  0x1a   :  { %v17_v29 = vld [vmem:[%s10155_s0 + $0x8] sm:$0xff]  ;;  %4676 = vmatpush.bf16.msra.mxu0 %v7775_v25  ;;  %v1153_v35 = vld.sshfl [vmem:[#allocation1 + $0x18] sm:$0xff pattern:$0x73625140]  ;;  %v7782_v39 = vld [vmem:[%s10156_s1 + $0x40] sm:$0xff]  ;;  %v1304_v44 = vpack.c.bf16 %v1150_v34, %v1150_v34 }
  0x1b   :  { %1149 = vst [vmem:[#allocation1 + $0x20] ss:$4 sm:$0xff] %v17_v29  ;;  %4702 = vmatpush.bf16.msra.mxu2 %v7791_v26  ;;  %v1151_v36 = vld.sshfl [vmem:[#allocation1 + $0x8] sm:$0xff pattern:$0x73625140]  ;;  %v7798_v40 = vld [vmem:[%s10156_s1 + $0xc0] sm:$0xff]  ;;  %v1307_v47 = vpack.c.bf16 %v1153_v35, %v1153_v35 }
  0x1c   :  { %4689 = vmatpush.bf16.msra.mxu1 %v7783_v27  ;;  %1158 = vst [vmem:[#allocation1] ss:$4 sm:$0xff] %v18_v32  ;;  %v7821_v41 = vld [vmem:[%s10156_s1 + $0x178] sm:$0xff]  ;;  %v7812_v45 = vld [vmem:[%s10156_s1 + $0x130] sm:$0xff]  ;;  %v1305_v48 = vpack.c.bf16 %v1151_v36, %v1151_v36  ;;  %v7811_v51 = vld [vmem:[%s10156_s1 + $0x128] sm:$0xff] }
  0x1d   :  { %4715 = vmatpush.bf16.msra.mxu3 %v7799_v28  ;;  %v7837_v42 = vld [vmem:[%s10156_s1 + $0x1f8] sm:$0xff]  ;;  %v7828_v46 = vld [vmem:[%s10156_s1 + $0x1b0] sm:$0xff]  ;;  %v7827_v52 = vld [vmem:[%s10156_s1 + $0x1a8] sm:$0xff] }
  0x1e   :  { %4677 = vmatpush.bf16.msra.mxu0 %v7774_v30  ;;  %v7820_v49 = vld [vmem:[%s10156_s1 + $0x170] sm:$0xff]  ;;  %v19_v56 = vld [vmem:[%s10155_s0 + $0x18] sm:$0xff]  ;;  %v7819_v58 = vld [vmem:[%s10156_s1 + $0x168] sm:$0xff] }
  0x1f   :  { %4703 = vmatpush.bf16.msra.mxu2 %v7790_v31  ;;  %v7836_v50 = vld [vmem:[%s10156_s1 + $0x1f0] sm:$0xff]  ;;  %v7835_v59 = vld [vmem:[%s10156_s1 + $0x1e8] sm:$0xff]  ;;  %v7810_v60 = vld [vmem:[%s10156_s1 + $0x120] sm:$0xff] }
  0x20   :  { %4690 = vmatpush.bf16.msra.mxu1 %v7782_v39  ;;  %v7826_v61 = vld [vmem:[%s10156_s1 + $0x1a0] sm:$0xff]  ;;  %v7809_v0 = vld [vmem:[%s10156_s1 + $0x118] sm:$0xff]  ;;  %v7808_v4 = vld [vmem:[%s10156_s1 + $0x110] sm:$0xff] }
  0x21   :  { %4716 = vmatpush.bf16.msra.mxu3 %v7798_v40  ;;  %4678 = vmatmul.bf16.vlgmr.msra.gmra.mxu0 %v1304_v44  ;;  %v7818_v62 = vld [vmem:[%s10156_s1 + $0x160] sm:$0xff]  ;;  %v7825_v1 = vld [vmem:[%s10156_s1 + $0x198] sm:$0xff]  ;;  %v7824_v5 = vld [vmem:[%s10156_s1 + $0x190] sm:$0xff] }
  0x22   :  { %4722 = vmatpush.bf16.msrb.mxu0 %v7813_v37  ;;  %4704 = vmatmul.bf16.vlgmr.msra.gmra.mxu2 %v1306_v43  ;;  %v8505_v53 = vld.sshfl [vmem:[#allocation1 + $0x30] sm:$0xff pattern:$0x73625140]  ;;  %v8507_v54 = vld.sshfl [vmem:[#allocation1 + $0x20] sm:$0xff pattern:$0x73625140] }
  0x23   :  { %4748 = vmatpush.bf16.msrb.mxu2 %v7829_v38  ;;  %v8509_v55 = vld.sshfl [vmem:[#allocation1 + $0x38] sm:$0xff pattern:$0x73625140]  ;;  %4691 = vmatmul.bf16.vlgmr.msra.gmra.mxu1 %v1305_v48  ;;  %v8514_v57 = vld.sshfl [vmem:[#allocation1 + $0x28] sm:$0xff pattern:$0x73625140]  ;;  %v1310_v22 = vpack.c.bf16 %v8505_v53, %v8505_v53  ;;  %v1308_v23 = vpack.c.bf16 %v8507_v54, %v8507_v54 }
  0x24   :  { %4735 = vmatpush.bf16.msrb.mxu1 %v7821_v41  ;;  %4717 = vmatmul.bf16.vlgmr.msra.gmra.mxu3 %v1307_v47  ;;  %1159 = vst [vmem:[#allocation1 + $0x20] ss:$4 sm:$0xff] %v19_v56  ;;  %v7834_v63 = vld [vmem:[%s10156_s1 + $0x1e0] sm:$0xff]  ;;  %v7817_v2 = vld [vmem:[%s10156_s1 + $0x158] sm:$0xff]  ;;  %v7816_v6 = vld [vmem:[%s10156_s1 + $0x150] sm:$0xff]  ;;  %v1311_v27 = vpack.c.bf16 %v8509_v55, %v8509_v55  ;;  %v1309_v28 = vpack.c.bf16 %v8514_v57, %v8514_v57 }
  0x25   :  { %4761 = vmatpush.bf16.msrb.mxu3 %v7837_v42  ;;  %v7833_v3 = vld [vmem:[%s10156_s1 + $0x1d8] sm:$0xff]  ;;  %v7832_v7 = vld [vmem:[%s10156_s1 + $0x1d0] sm:$0xff]  ;;  %v7807_v8 = vld [vmem:[%s10156_s1 + $0x108] sm:$0xff] }
  0x26   :  { %4723 = vmatpush.bf16.msrb.mxu0 %v7812_v45  ;;  %v7823_v9 = vld [vmem:[%s10156_s1 + $0x188] sm:$0xff]  ;;  %v7806_v12 = vld [vmem:[%s10156_s1 + $0x100] sm:$0xff]  ;;  %v7845_v14 = vld [vmem:[%s10156_s1 + $0x238] sm:$0xff] }
  0x27   :  { %4749 = vmatpush.bf16.msrb.mxu2 %v7828_v46  ;;  %v7815_v10 = vld [vmem:[%s10156_s1 + $0x148] sm:$0xff]  ;;  %v7822_v13 = vld [vmem:[%s10156_s1 + $0x180] sm:$0xff]  ;;  %v7861_v15 = vld [vmem:[%s10156_s1 + $0x2b8] sm:$0xff] }
  0x28   :  { %4736 = vmatpush.bf16.msrb.mxu1 %v7820_v49  ;;  %v7831_v11 = vld [vmem:[%s10156_s1 + $0x1c8] sm:$0xff]  ;;  %v7814_v16 = vld [vmem:[%s10156_s1 + $0x140] sm:$0xff]  ;;  %v7853_v18 = vld [vmem:[%s10156_s1 + $0x278] sm:$0xff] }
  0x29   :  { %4762 = vmatpush.bf16.msrb.mxu3 %v7836_v50  ;;  %v7830_v17 = vld [vmem:[%s10156_s1 + $0x1c0] sm:$0xff]  ;;  %v7869_v19 = vld [vmem:[%s10156_s1 + $0x2f8] sm:$0xff]  ;;  %v7844_v20 = vld [vmem:[%s10156_s1 + $0x230] sm:$0xff] }
  0x2a   :  { %4724 = vmatpush.bf16.msrb.mxu0 %v7811_v51  ;;  %v7860_v21 = vld [vmem:[%s10156_s1 + $0x2b0] sm:$0xff]  ;;  %v8604_v24 = vld.sshfl [vmem:[#allocation1] sm:$0xff pattern:$0x73625140]  ;;  %v7843_v33 = vld [vmem:[%s10156_s1 + $0x228] sm:$0xff] }
  0x2b   :  { %4750 = vmatpush.bf16.msrb.mxu2 %v7827_v52  ;;  %v8606_v25 = vld.sshfl [vmem:[#allocation1 + $0x10] sm:$0xff pattern:$0x73625140]  ;;  %v8608_v26 = vld.sshfl [vmem:[#allocation1 + $0x8] sm:$0xff pattern:$0x73625140] }
  0x2c   :  { %4737 = vmatpush.bf16.msrb.mxu1 %v7819_v58  ;;  %v20_v29 = vld [vmem:[%s10155_s0 + $0x20] sm:$0xff]  ;;  %v8617_v30 = vld.sshfl [vmem:[#allocation1 + $0x18] sm:$0xff pattern:$0x73625140]  ;;  %v7852_v31 = vld [vmem:[%s10156_s1 + $0x270] sm:$0xff] }
  0x2d   :  { %4763 = vmatpush.bf16.msrb.mxu3 %v7835_v59  ;;  %v7868_v32 = vld [vmem:[%s10156_s1 + $0x2f0] sm:$0xff]  ;;  %1168 = vst [vmem:[#allocation1] ss:$4 sm:$0xff] %v20_v29  ;;  %v7859_v34 = vld [vmem:[%s10156_s1 + $0x2a8] sm:$0xff]  ;;  %v7842_v37 = vld [vmem:[%s10156_s1 + $0x220] sm:$0xff]  ;;  %v1312_v59 = vpack.c.bf16 %v8604_v24, %v8604_v24 }
  0x2e   :  { %4725 = vmatpush.bf16.msrb.mxu0 %v7810_v60  ;;  %v7851_v35 = vld [vmem:[%s10156_s1 + $0x268] sm:$0xff]  ;;  %v7858_v38 = vld [vmem:[%s10156_s1 + $0x2a0] sm:$0xff]  ;;  %v7841_v41 = vld [vmem:[%s10156_s1 + $0x218] sm:$0xff]  ;;  %v1314_v60 = vpack.c.bf16 %v8606_v25, %v8606_v25 }
  0x2f   :  { %4751 = vmatpush.bf16.msrb.mxu2 %v7826_v61  ;;  %v7867_v36 = vld [vmem:[%s10156_s1 + $0x2e8] sm:$0xff]  ;;  %v7850_v39 = vld [vmem:[%s10156_s1 + $0x260] sm:$0xff]  ;;  %v7857_v42 = vld [vmem:[%s10156_s1 + $0x298] sm:$0xff] }
  0x30   :  { %4738 = vmatpush.bf16.msrb.mxu1 %v7818_v62  ;;  %v7866_v40 = vld [vmem:[%s10156_s1 + $0x2e0] sm:$0xff]  ;;  %v7849_v43 = vld [vmem:[%s10156_s1 + $0x258] sm:$0xff]  ;;  %v7840_v45 = vld [vmem:[%s10156_s1 + $0x210] sm:$0xff] }
  0x31   :  { %4764 = vmatpush.bf16.msrb.mxu3 %v7834_v63  ;;  %v7865_v44 = vld [vmem:[%s10156_s1 + $0x2d8] sm:$0xff]  ;;  %v7856_v46 = vld [vmem:[%s10156_s1 + $0x290] sm:$0xff]  ;;  %v7839_v49 = vld [vmem:[%s10156_s1 + $0x208] sm:$0xff]  ;;  %v1313_v63 = vpack.c.bf16 %v8608_v26, %v8608_v26 }
  0x32   :  { %4726 = vmatpush.bf16.msrb.mxu0 %v7809_v0  ;;  %v7848_v47 = vld [vmem:[%s10156_s1 + $0x250] sm:$0xff]  ;;  %v7855_v50 = vld [vmem:[%s10156_s1 + $0x288] sm:$0xff]  ;;  %v7838_v53 = vld [vmem:[%s10156_s1 + $0x200] sm:$0xff]  ;;  %v1315_v0 = vpack.c.bf16 %v8617_v30, %v8617_v30 }
  0x33   :  { %4752 = vmatpush.bf16.msrb.mxu2 %v7825_v1  ;;  %v7864_v48 = vld [vmem:[%s10156_s1 + $0x2d0] sm:$0xff]  ;;  %v7847_v51 = vld [vmem:[%s10156_s1 + $0x248] sm:$0xff]  ;;  %v7854_v54 = vld [vmem:[%s10156_s1 + $0x280] sm:$0xff] }
  0x34   :  { %4739 = vmatpush.bf16.msrb.mxu1 %v7817_v2  ;;  %v7863_v52 = vld [vmem:[%s10156_s1 + $0x2c8] sm:$0xff]  ;;  %v7877_v55 = vld [vmem:[%s10156_s1 + $0x338] sm:$0xff]  ;;  %v7846_v57 = vld [vmem:[%s10156_s1 + $0x240] sm:$0xff] }
  0x35   :  { %4765 = vmatpush.bf16.msrb.mxu3 %v7833_v3  ;;  %v7893_v56 = vld [vmem:[%s10156_s1 + $0x3b8] sm:$0xff]  ;;  %v7862_v58 = vld [vmem:[%s10156_s1 + $0x2c0] sm:$0xff]  ;;  %v7876_v1 = vld [vmem:[%s10156_s1 + $0x330] sm:$0xff] }
  0x36   :  { %4727 = vmatpush.bf16.msrb.mxu0 %v7808_v4  ;;  %v7885_v61 = vld [vmem:[%s10156_s1 + $0x378] sm:$0xff]  ;;  %v7892_v2 = vld [vmem:[%s10156_s1 + $0x3b0] sm:$0xff]  ;;  %v8723_v3 = vld.sshfl [vmem:[#allocation1 + $0x20] sm:$0xff pattern:$0x73625140] }
  0x37   :  { %4753 = vmatpush.bf16.msrb.mxu2 %v7824_v5  ;;  %v7901_v62 = vld [vmem:[%s10156_s1 + $0x3f8] sm:$0xff]  ;;  %v8725_v4 = vld.sshfl [vmem:[#allocation1 + $0x30] sm:$0xff pattern:$0x73625140]  ;;  %v7871_v26 = vld [vmem:[%s10156_s1 + $0x308] sm:$0xff] }
  0x38   :  { %4740 = vmatpush.bf16.msrb.mxu1 %v7816_v6  ;;  %v8727_v5 = vld.sshfl [vmem:[#allocation1 + $0x28] sm:$0xff pattern:$0x73625140]  ;;  %v7880_v24 = vld [vmem:[%s10156_s1 + $0x350] sm:$0xff]  ;;  %v7870_v30 = vld [vmem:[%s10156_s1 + $0x300] sm:$0xff] }
  0x39   :  { %4766 = vmatpush.bf16.msrb.mxu3 %v7832_v7  ;;  %v21_v6 = vld [vmem:[%s10155_s0 + $0x28] sm:$0xff]  ;;  %v8732_v7 = vld.sshfl [vmem:[#allocation1 + $0x38] sm:$0xff pattern:$0x73625140]  ;;  %v7896_v25 = vld [vmem:[%s10156_s1 + $0x3d0] sm:$0xff] }
  0x3a   :  { %4728 = vmatpush.bf16.msrb.mxu0 %v7807_v8  ;;  %v7884_v8 = vld [vmem:[%s10156_s1 + $0x370] sm:$0xff]  ;;  %1169 = vst [vmem:[#allocation1 + $0x20] ss:$4 sm:$0xff] %v21_v6  ;;  %v7895_v29 = vld [vmem:[%s10156_s1 + $0x3c8] sm:$0xff] }
  0x3b   :  { %4754 = vmatpush.bf16.msrb.mxu2 %v7823_v9  ;;  %v7900_v9 = vld [vmem:[%s10156_s1 + $0x3f0] sm:$0xff] }
  0x3c   :  { %4741 = vmatpush.bf16.msrb.mxu1 %v7815_v10  ;;  %v7875_v10 = vld [vmem:[%s10156_s1 + $0x328] sm:$0xff]  ;;  %v1172_v6 = vld.sshfl [vmem:[#allocation1 + $0x10] sm:$0xff pattern:$0x73625140] }
  0x3d   :  { %4767 = vmatpush.bf16.msrb.mxu3 %v7831_v11  ;;  %v7891_v11 = vld [vmem:[%s10156_s1 + $0x3a8] sm:$0xff] }
  0x3e   :  { %4729 = vmatpush.bf16.msrb.mxu0 %v7806_v12  ;;  %v7883_v12 = vld [vmem:[%s10156_s1 + $0x368] sm:$0xff] }
  0x3f   :  { %4755 = vmatpush.bf16.msrb.mxu2 %v7822_v13  ;;  %v7899_v13 = vld [vmem:[%s10156_s1 + $0x3e8] sm:$0xff] }
  0x40   :  { %4742 = vmatpush.bf16.msrb.mxu1 %v7814_v16  ;;  %v7882_v16 = vld [vmem:[%s10156_s1 + $0x360] sm:$0xff] }
  0x41   :  { %4768 = vmatpush.bf16.msrb.mxu3 %v7830_v17  ;;  %4730 = vmatmul.bf16.vlgmr.msrb.gmra.mxu0 %v1308_v23  ;;  %v7898_v17 = vld [vmem:[%s10156_s1 + $0x3e0] sm:$0xff]  ;;  %v7888_v23 = vld [vmem:[%s10156_s1 + $0x390] sm:$0xff] }
  0x42   :  { %4774 = vmatpush.bf16.msra.mxu0 %v7845_v14  ;;  %4756 = vmatmul.bf16.vlgmr.msrb.gmra.mxu2 %v1310_v22  ;;  %v7874_v14 = vld [vmem:[%s10156_s1 + $0x320] sm:$0xff]  ;;  %v7872_v22 = vld [vmem:[%s10156_s1 + $0x310] sm:$0xff] }
  0x43   :  { %4800 = vmatpush.bf16.msra.mxu2 %v7861_v15  ;;  %4743 = vmatmul.bf16.vlgmr.msrb.gmra.mxu1 %v1309_v28  ;;  %v7890_v15 = vld [vmem:[%s10156_s1 + $0x3a0] sm:$0xff]  ;;  %v7879_v28 = vld [vmem:[%s10156_s1 + $0x348] sm:$0xff] }
  0x44   :  { %4787 = vmatpush.bf16.msra.mxu1 %v7853_v18  ;;  %4769 = vmatmul.bf16.vlgmr.msrb.gmra.mxu3 %v1311_v27  ;;  %v7873_v18 = vld [vmem:[%s10156_s1 + $0x318] sm:$0xff]  ;;  %v7887_v27 = vld [vmem:[%s10156_s1 + $0x388] sm:$0xff] }
  0x45   :  { %4813 = vmatpush.bf16.msra.mxu3 %v7869_v19  ;;  %v7889_v19 = vld [vmem:[%s10156_s1 + $0x398] sm:$0xff] }
  0x46   :  { %4775 = vmatpush.bf16.msra.mxu0 %v7844_v20  ;;  %v7881_v20 = vld [vmem:[%s10156_s1 + $0x358] sm:$0xff] }
  0x47   :  { %4801 = vmatpush.bf16.msra.mxu2 %v7860_v21  ;;  %v7897_v21 = vld [vmem:[%s10156_s1 + $0x3d8] sm:$0xff] }
  0x48   :  { %4788 = vmatpush.bf16.msra.mxu1 %v7852_v31  ;;  %v7886_v31 = vld [vmem:[%s10156_s1 + $0x380] sm:$0xff] }
  0x49   :  { %4814 = vmatpush.bf16.msra.mxu3 %v7868_v32  ;;  %v7909_v32 = vld [vmem:[%s10156_s1 + $0x438] sm:$0xff] }
  0x4a   :  { %4776 = vmatpush.bf16.msra.mxu0 %v7843_v33  ;;  %v7925_v33 = vld [vmem:[%s10156_s1 + $0x4b8] sm:$0xff] }
  0x4b   :  { %4802 = vmatpush.bf16.msra.mxu2 %v7859_v34  ;;  %v7878_v34 = vld [vmem:[%s10156_s1 + $0x340] sm:$0xff] }
  0x4c   :  { %4789 = vmatpush.bf16.msra.mxu1 %v7851_v35  ;;  %v7894_v35 = vld [vmem:[%s10156_s1 + $0x3c0] sm:$0xff] }
  0x4d   :  { %4815 = vmatpush.bf16.msra.mxu3 %v7867_v36  ;;  %v1316_v36 = vpack.c.bf16 %v8723_v3, %v8723_v3  ;;  %v7918_v3 = vld [vmem:[%s10156_s1 + $0x480] sm:$0xff] }
  0x4e   :  { %4777 = vmatpush.bf16.msra.mxu0 %v7842_v37  ;;  %v1318_v37 = vpack.c.bf16 %v8725_v4, %v8725_v4  ;;  %v7941_v4 = vld [vmem:[%s10156_s1 + $0x538] sm:$0xff] }
  0x4f   :  { %4803 = vmatpush.bf16.msra.mxu2 %v7858_v38  ;;  %v7917_v38 = vld [vmem:[%s10156_s1 + $0x478] sm:$0xff] }
  0x50   :  { %4790 = vmatpush.bf16.msra.mxu1 %v7850_v39  ;;  %v7933_v39 = vld [vmem:[%s10156_s1 + $0x4f8] sm:$0xff] }
  0x51   :  { %4816 = vmatpush.bf16.msra.mxu3 %v7866_v40  ;;  %v1317_v40 = vpack.c.bf16 %v8727_v5, %v8727_v5  ;;  %v1170_v5 = vld.sshfl [vmem:[#allocation1] sm:$0xff pattern:$0x73625140] }
  0x52   :  { %4778 = vmatpush.bf16.msra.mxu0 %v7841_v41  ;;  %v1319_v41 = vpack.c.bf16 %v8732_v7, %v8732_v7  ;;  %v7957_v7 = vld [vmem:[%s10156_s1 + $0x5b8] sm:$0xff] }
  0x53   :  { %4804 = vmatpush.bf16.msra.mxu2 %v7857_v42  ;;  %v7908_v42 = vld [vmem:[%s10156_s1 + $0x430] sm:$0xff] }
  0x54   :  { %4791 = vmatpush.bf16.msra.mxu1 %v7849_v43  ;;  %v7924_v43 = vld [vmem:[%s10156_s1 + $0x4b0] sm:$0xff] }
  0x55   :  { %4817 = vmatpush.bf16.msra.mxu3 %v7865_v44  ;;  %v7916_v44 = vld [vmem:[%s10156_s1 + $0x470] sm:$0xff] }
  0x56   :  { %4779 = vmatpush.bf16.msra.mxu0 %v7840_v45  ;;  %v7932_v45 = vld [vmem:[%s10156_s1 + $0x4f0] sm:$0xff] }
  0x57   :  { %4805 = vmatpush.bf16.msra.mxu2 %v7856_v46  ;;  %v7907_v46 = vld [vmem:[%s10156_s1 + $0x428] sm:$0xff] }
  0x58   :  { %4792 = vmatpush.bf16.msra.mxu1 %v7848_v47  ;;  %v7923_v47 = vld [vmem:[%s10156_s1 + $0x4a8] sm:$0xff] }
  0x59   :  { %4818 = vmatpush.bf16.msra.mxu3 %v7864_v48  ;;  %v7915_v48 = vld [vmem:[%s10156_s1 + $0x468] sm:$0xff] }
  0x5a   :  { %4780 = vmatpush.bf16.msra.mxu0 %v7839_v49  ;;  %v7931_v49 = vld [vmem:[%s10156_s1 + $0x4e8] sm:$0xff] }
  0x5b   :  { %4806 = vmatpush.bf16.msra.mxu2 %v7855_v50  ;;  %v7906_v50 = vld [vmem:[%s10156_s1 + $0x420] sm:$0xff] }
  0x5c   :  { %4793 = vmatpush.bf16.msra.mxu1 %v7847_v51  ;;  %v7922_v51 = vld [vmem:[%s10156_s1 + $0x4a0] sm:$0xff] }
  0x5d   :  { %4819 = vmatpush.bf16.msra.mxu3 %v7863_v52  ;;  %v7914_v52 = vld [vmem:[%s10156_s1 + $0x460] sm:$0xff] }
  0x5e   :  { %4781 = vmatpush.bf16.msra.mxu0 %v7838_v53  ;;  %v7930_v53 = vld [vmem:[%s10156_s1 + $0x4e0] sm:$0xff] }
  0x5f   :  { %4807 = vmatpush.bf16.msra.mxu2 %v7854_v54  ;;  %v7905_v54 = vld [vmem:[%s10156_s1 + $0x418] sm:$0xff] }
  0x60   :  { %4794 = vmatpush.bf16.msra.mxu1 %v7846_v57  ;;  %v7929_v57 = vld [vmem:[%s10156_s1 + $0x4d8] sm:$0xff] }
  0x61   :  { %4820 = vmatpush.bf16.msra.mxu3 %v7862_v58  ;;  %4782 = vmatmul.bf16.vlgmr.msra.gmra.mxu0 %v1312_v59  ;;  %v7904_v58 = vld [vmem:[%s10156_s1 + $0x410] sm:$0xff] }
  0x62   :  { %4826 = vmatpush.bf16.msrb.mxu0 %v7877_v55  ;;  %4808 = vmatmul.bf16.vlgmr.msra.gmra.mxu2 %v1314_v60  ;;  %v7921_v55 = vld [vmem:[%s10156_s1 + $0x498] sm:$0xff]  ;;  %v7920_v59 = vld [vmem:[%s10156_s1 + $0x490] sm:$0xff] }
  0x63   :  { %4852 = vmatpush.bf16.msrb.mxu2 %v7893_v56  ;;  %4795 = vmatmul.bf16.vlgmr.msra.gmra.mxu1 %v1313_v63  ;;  %v7913_v56 = vld [vmem:[%s10156_s1 + $0x458] sm:$0xff]  ;;  %v7912_v60 = vld [vmem:[%s10156_s1 + $0x450] sm:$0xff]  ;;  %v7919_v63 = vld [vmem:[%s10156_s1 + $0x488] sm:$0xff] }
  0x64   :  { %4839 = vmatpush.bf16.msrb.mxu1 %v7885_v61  ;;  %4821 = vmatmul.bf16.vlgmr.msra.gmra.mxu3 %v1315_v0  ;;  %v7928_v61 = vld [vmem:[%s10156_s1 + $0x4d0] sm:$0xff]  ;;  %v7911_v0 = vld [vmem:[%s10156_s1 + $0x448] sm:$0xff] }
  0x65   :  { %4865 = vmatpush.bf16.msrb.mxu3 %v7901_v62  ;;  %v7903_v62 = vld [vmem:[%s10156_s1 + $0x408] sm:$0xff] }
  0x66   :  { %4827 = vmatpush.bf16.msrb.mxu0 %v7876_v1  ;;  %v7927_v1 = vld [vmem:[%s10156_s1 + $0x4c8] sm:$0xff] }
  0x67   :  { %4853 = vmatpush.bf16.msrb.mxu2 %v7892_v2  ;;  %v7902_v2 = vld [vmem:[%s10156_s1 + $0x400] sm:$0xff] }
  0x68   :  { %4840 = vmatpush.bf16.msrb.mxu1 %v7884_v8  ;;  %v7910_v8 = vld [vmem:[%s10156_s1 + $0x440] sm:$0xff] }
  0x69   :  { %4866 = vmatpush.bf16.msrb.mxu3 %v7900_v9  ;;  %v7926_v9 = vld [vmem:[%s10156_s1 + $0x4c0] sm:$0xff] }
  0x6a   :  { %4828 = vmatpush.bf16.msrb.mxu0 %v7875_v10  ;;  %v1171_v10 = vld.sshfl [vmem:[#allocation1 + $0x8] sm:$0xff pattern:$0x73625140] }
  0x6b   :  { %4854 = vmatpush.bf16.msrb.mxu2 %v7891_v11  ;;  %v1173_v11 = vld.sshfl [vmem:[#allocation1 + $0x18] sm:$0xff pattern:$0x73625140] }
  0x6c   :  { %4841 = vmatpush.bf16.msrb.mxu1 %v7883_v12  ;;  %v1320_v12 = vpack.c.bf16 %v1170_v5, %v1170_v5  ;;  %v7997_v5 = vld [vmem:[%s10156_s1 + $0x6f8] sm:$0xff] }
  0x6d   :  { %4867 = vmatpush.bf16.msrb.mxu3 %v7899_v13  ;;  %v1322_v13 = vpack.c.bf16 %v1172_v6, %v1172_v6 }
  0x6e   :  { %4829 = vmatpush.bf16.msrb.mxu0 %v7874_v14  ;;  %v7949_v14 = vld [vmem:[%s10156_s1 + $0x578] sm:$0xff] }
  0x6f   :  { %4855 = vmatpush.bf16.msrb.mxu2 %v7890_v15  ;;  %v7965_v15 = vld [vmem:[%s10156_s1 + $0x5f8] sm:$0xff] }
  0x70   :  { %4842 = vmatpush.bf16.msrb.mxu1 %v7882_v16  ;;  %v1321_v16 = vpack.c.bf16 %v1171_v10, %v1171_v10  ;;  %v7980_v10 = vld [vmem:[%s10156_s1 + $0x670] sm:$0xff] }
  0x71   :  { %4868 = vmatpush.bf16.msrb.mxu3 %v7898_v17  ;;  %v1323_v17 = vpack.c.bf16 %v1173_v11, %v1173_v11  ;;  %v7996_v11 = vld [vmem:[%s10156_s1 + $0x6f0] sm:$0xff] }
  0x72   :  { %4830 = vmatpush.bf16.msrb.mxu0 %v7873_v18  ;;  %v7940_v18 = vld [vmem:[%s10156_s1 + $0x530] sm:$0xff] }
  0x73   :  { %4856 = vmatpush.bf16.msrb.mxu2 %v7889_v19  ;;  %v7956_v19 = vld [vmem:[%s10156_s1 + $0x5b0] sm:$0xff] }
  0x74   :  { %4843 = vmatpush.bf16.msrb.mxu1 %v7881_v20  ;;  %v7948_v20 = vld [vmem:[%s10156_s1 + $0x570] sm:$0xff] }
  0x75   :  { %4869 = vmatpush.bf16.msrb.mxu3 %v7897_v21  ;;  %v7964_v21 = vld [vmem:[%s10156_s1 + $0x5f0] sm:$0xff] }
  0x76   :  { %4831 = vmatpush.bf16.msrb.mxu0 %v7872_v22  ;;  %v7939_v22 = vld [vmem:[%s10156_s1 + $0x528] sm:$0xff] }
  0x77   :  { %4857 = vmatpush.bf16.msrb.mxu2 %v7888_v23  ;;  %v7955_v23 = vld [vmem:[%s10156_s1 + $0x5a8] sm:$0xff] }
  0x78   :  { %4844 = vmatpush.bf16.msrb.mxu1 %v7880_v24  ;;  %v7947_v24 = vld [vmem:[%s10156_s1 + $0x568] sm:$0xff] }
  0x79   :  { %4870 = vmatpush.bf16.msrb.mxu3 %v7896_v25  ;;  %v7963_v25 = vld [vmem:[%s10156_s1 + $0x5e8] sm:$0xff] }
  0x7a   :  { %4832 = vmatpush.bf16.msrb.mxu0 %v7871_v26  ;;  %v8322_v26 = vld [vmem:[%s10157_s2] ss:$0 sm:$0xff] }
  0x7b   :  { %4858 = vmatpush.bf16.msrb.mxu2 %v7887_v27  ;;  %v7938_v27 = vld [vmem:[%s10156_s1 + $0x520] sm:$0xff] }
  0x7c   :  { %4845 = vmatpush.bf16.msrb.mxu1 %v7879_v28  ;;  %v7954_v28 = vld [vmem:[%s10156_s1 + $0x5a0] sm:$0xff] }
  0x7d   :  { %4871 = vmatpush.bf16.msrb.mxu3 %v7895_v29 }
  0x7e   :  { %4833 = vmatpush.bf16.msrb.mxu0 %v7870_v30  ;;  %v7946_v30 = vld [vmem:[%s10156_s1 + $0x560] sm:$0xff] }
  0x7f   :  { %4859 = vmatpush.bf16.msrb.mxu2 %v7886_v31  ;;  %v7962_v31 = vld [vmem:[%s10156_s1 + $0x5e0] sm:$0xff] }
  0x80   :  { %4846 = vmatpush.bf16.msrb.mxu1 %v7878_v34  ;;  %v7937_v34 = vld [vmem:[%s10156_s1 + $0x518] sm:$0xff] }
  0x81   :  { %4872 = vmatpush.bf16.msrb.mxu3 %v7894_v35  ;;  %4834 = vmatmul.bf16.vlgmr.msrb.gmra.mxu0 %v1316_v36  ;;  %v7953_v35 = vld [vmem:[%s10156_s1 + $0x598] sm:$0xff] }
  0x82   :  { %4878 = vmatpush.bf16.msra.mxu0 %v7909_v32  ;;  %4860 = vmatmul.bf16.vlgmr.msrb.gmra.mxu2 %v1318_v37  ;;  %v7945_v37 = vld [vmem:[%s10156_s1 + $0x558] sm:$0xff] }
  0x83   :  { %4904 = vmatpush.bf16.msra.mxu2 %v7925_v33  ;;  %4847 = vmatmul.bf16.vlgmr.msrb.gmra.mxu1 %v1317_v40  ;;  %v7936_v40 = vld [vmem:[%s10156_s1 + $0x510] sm:$0xff] }
  0x84   :  { %4891 = vmatpush.bf16.msra.mxu1 %v7917_v38  ;;  %4873 = vmatmul.bf16.vlgmr.msrb.gmra.mxu3 %v1319_v41  ;;  %v7961_v38 = vld [vmem:[%s10156_s1 + $0x5d8] sm:$0xff]  ;;  %v7952_v41 = vld [vmem:[%s10156_s1 + $0x590] sm:$0xff] }
  0x85   :  { %4917 = vmatpush.bf16.msra.mxu3 %v7933_v39 }
  0x86   :  { %4879 = vmatpush.bf16.msra.mxu0 %v7908_v42 }
  0x87   :  { %4905 = vmatpush.bf16.msra.mxu2 %v7924_v43 }
  0x88   :  { %4892 = vmatpush.bf16.msra.mxu1 %v7916_v44 }
  0x89   :  { %4918 = vmatpush.bf16.msra.mxu3 %v7932_v45  ;;  %v7944_v45 = vld [vmem:[%s10156_s1 + $0x550] sm:$0xff] }
  0x8a   :  { %4880 = vmatpush.bf16.msra.mxu0 %v7907_v46  ;;  %v7960_v46 = vld [vmem:[%s10156_s1 + $0x5d0] sm:$0xff] }
  0x8b   :  { %4906 = vmatpush.bf16.msra.mxu2 %v7923_v47 }
  0x8c   :  { %4893 = vmatpush.bf16.msra.mxu1 %v7915_v48  ;;  %v22_v48 = vld [vmem:[%s10155_s0 + $0x30] sm:$0xff] }
  0x8d   :  { %4919 = vmatpush.bf16.msra.mxu3 %v7931_v49  ;;  %1178 = vst [vmem:[#allocation1] ss:$4 sm:$0xff] %v22_v48 }
  0x8e   :  { %4881 = vmatpush.bf16.msra.mxu0 %v7906_v50  ;;  %v7935_v50 = vld [vmem:[%s10156_s1 + $0x508] sm:$0xff] }
  0x8f   :  { %4907 = vmatpush.bf16.msra.mxu2 %v7922_v51  ;;  %v7951_v51 = vld [vmem:[%s10156_s1 + $0x588] sm:$0xff] }
  0x90   :  { %4894 = vmatpush.bf16.msra.mxu1 %v7914_v52  ;;  %v7943_v52 = vld [vmem:[%s10156_s1 + $0x548] sm:$0xff] }
  0x91   :  { %4920 = vmatpush.bf16.msra.mxu3 %v7930_v53  ;;  %v7959_v53 = vld [vmem:[%s10156_s1 + $0x5c8] sm:$0xff] }
  0x92   :  { %4882 = vmatpush.bf16.msra.mxu0 %v7905_v54  ;;  %v7934_v54 = vld [vmem:[%s10156_s1 + $0x500] sm:$0xff] }
  0x93   :  { %4908 = vmatpush.bf16.msra.mxu2 %v7921_v55  ;;  %v7950_v55 = vld [vmem:[%s10156_s1 + $0x580] sm:$0xff] }
  0x94   :  { %4895 = vmatpush.bf16.msra.mxu1 %v7913_v56  ;;  %v7973_v56 = vld [vmem:[%s10156_s1 + $0x638] sm:$0xff]  ;;  %v1182_v48 = vld.sshfl [vmem:[#allocation1 + $0x10] sm:$0xff pattern:$0x73625140] }
  0x95   :  { %4921 = vmatpush.bf16.msra.mxu3 %v7929_v57 }
  0x96   :  { %4883 = vmatpush.bf16.msra.mxu0 %v7904_v58  ;;  %v1174_v58 = vld.sshfl [vmem:[#allocation1 + $0x20] sm:$0xff pattern:$0x73625140] }
  0x97   :  { %4909 = vmatpush.bf16.msra.mxu2 %v7920_v59  ;;  %v1176_v59 = vld.sshfl [vmem:[#allocation1 + $0x30] sm:$0xff pattern:$0x73625140] }
  0x98   :  { %4896 = vmatpush.bf16.msra.mxu1 %v7912_v60  ;;  %v7989_v60 = vld [vmem:[%s10156_s1 + $0x6b8] sm:$0xff] }
  0x99   :  { %4922 = vmatpush.bf16.msra.mxu3 %v7928_v61  ;;  %v7942_v61 = vld [vmem:[%s10156_s1 + $0x540] sm:$0xff] }
  0x9a   :  { %4884 = vmatpush.bf16.msra.mxu0 %v7903_v62  ;;  %v7958_v62 = vld [vmem:[%s10156_s1 + $0x5c0] sm:$0xff] }
  0x9b   :  { %4910 = vmatpush.bf16.msra.mxu2 %v7919_v63 }
  0x9c   :  { %4897 = vmatpush.bf16.msra.mxu1 %v7911_v0  ;;  %v1175_v0 = vld.sshfl [vmem:[#allocation1 + $0x28] sm:$0xff pattern:$0x73625140] }
  0x9d   :  { %4923 = vmatpush.bf16.msra.mxu3 %v7927_v1  ;;  %v1177_v1 = vld.sshfl [vmem:[#allocation1 + $0x38] sm:$0xff pattern:$0x73625140]  ;;  %v1325_v6 = vpack.c.bf16 %v1175_v0, %v1175_v0  ;;  %v8028_v0 = vld [vmem:[%s10156_s1 + $0x7f0] sm:$0xff] }
  0x9e   :  { %4885 = vmatpush.bf16.msra.mxu0 %v7902_v2  ;;  %v4679_v29 = vpop.f32.mrf.mxu0  ;;  %v1324_v2 = vpack.c.bf16 %v1174_v58, %v1174_v58  ;;  %v8029_v58 = vld [vmem:[%s10156_s1 + $0x7f8] sm:$0xff] }
  0x9f   :  { %4911 = vmatpush.bf16.msra.mxu2 %v7918_v3  ;;  %v4680_v32 = vadd.f32 %v8322_v26, %v4679_v29  ;;  %v1326_v3 = vpack.c.bf16 %v1176_v59, %v1176_v59  ;;  %v7977_v26 = vld [vmem:[%s10156_s1 + $0x658] sm:$0xff] }
  0xa0   :  { %4898 = vmatpush.bf16.msra.mxu1 %v7910_v8  ;;  %v4692_v33 = vpop.f32.mrf.mxu1  ;;  %v7972_v8 = vld [vmem:[%s10156_s1 + $0x630] sm:$0xff] }
  0xa1   :  { %4924 = vmatpush.bf16.msra.mxu3 %v7926_v9  ;;  %4886 = vmatmul.bf16.vlgmr.msra.gmra.mxu0 %v1320_v12  ;;  %v4693_v36 = vadd.f32 %v4692_v33, %v4680_v32  ;;  %v7988_v9 = vld [vmem:[%s10156_s1 + $0x6b0] sm:$0xff]  ;;  %v7971_v12 = vld [vmem:[%s10156_s1 + $0x628] sm:$0xff] }
  0xa2   :  { %4930 = vmatpush.bf16.msrb.mxu0 %v7941_v4  ;;  %4912 = vmatmul.bf16.vlgmr.msra.gmra.mxu2 %v1322_v13  ;;  %v7981_v4 = vld [vmem:[%s10156_s1 + $0x678] sm:$0xff]  ;;  %v7987_v13 = vld [vmem:[%s10156_s1 + $0x6a8] sm:$0xff] }
  0xa3   :  { %4956 = vmatpush.bf16.msrb.mxu2 %v7957_v7  ;;  %4899 = vmatmul.bf16.vlgmr.msra.gmra.mxu1 %v1321_v16  ;;  %v1327_v7 = vpack.c.bf16 %v1177_v1, %v1177_v1  ;;  %v7970_v16 = vld [vmem:[%s10156_s1 + $0x620] sm:$0xff]  ;;  %v8003_v1 = vld [vmem:[%s10156_s1 + $0x728] sm:$0xff] }
  0xa4   :  { %4943 = vmatpush.bf16.msrb.mxu1 %v7949_v14  ;;  %4925 = vmatmul.bf16.vlgmr.msra.gmra.mxu3 %v1323_v17  ;;  %v7979_v14 = vld [vmem:[%s10156_s1 + $0x668] sm:$0xff]  ;;  %v7986_v17 = vld [vmem:[%s10156_s1 + $0x6a0] sm:$0xff] }
  0xa5   :  { %4969 = vmatpush.bf16.msrb.mxu3 %v7965_v15  ;;  %v4705_v39 = vpop.f32.mrf.mxu2  ;;  %v7995_v15 = vld [vmem:[%s10156_s1 + $0x6e8] sm:$0xff] }
  0xa6   :  { %4931 = vmatpush.bf16.msrb.mxu0 %v7940_v18  ;;  %v4706_v42 = vadd.f32 %v4705_v39, %v4693_v36  ;;  %v4681_v44 = vpop.f32.mrf.mxu0  ;;  %v7992_v36 = vld [vmem:[%s10156_s1 + $0x6d0] sm:$0xff]  ;;  %v7967_v39 = vld [vmem:[%s10156_s1 + $0x608] sm:$0xff] }
  0xa7   :  { %4957 = vmatpush.bf16.msrb.mxu2 %v7956_v19  ;;  %v4718_v43 = vpop.f32.mrf.mxu3  ;;  %v7966_v44 = vld [vmem:[%s10156_s1 + $0x600] sm:$0xff] }
  0xa8   :  { %4944 = vmatpush.bf16.msrb.mxu1 %v7948_v20  ;;  %v8991_v47 = vadd.f32 %v4718_v43, %v4706_v42  ;;  %v4694_v49 = vpop.f32.mrf.mxu1  ;;  %v7978_v20 = vld [vmem:[%s10156_s1 + $0x660] sm:$0xff]  ;;  %v7991_v42 = vld [vmem:[%s10156_s1 + $0x6c8] sm:$0xff] }
  0xa9   :  { %4970 = vmatpush.bf16.msrb.mxu3 %v7964_v21  ;;  %v7994_v21 = vld [vmem:[%s10156_s1 + $0x6e0] sm:$0xff] }
  0xaa   :  { %4932 = vmatpush.bf16.msrb.mxu0 %v7939_v22 }
  0xab   :  { %4958 = vmatpush.bf16.msrb.mxu2 %v7955_v23 }
  0xac   :  { %4945 = vmatpush.bf16.msrb.mxu1 %v7947_v24  ;;  %v7969_v24 = vld [vmem:[%s10156_s1 + $0x618] sm:$0xff] }
  0xad   :  { %4971 = vmatpush.bf16.msrb.mxu3 %v7963_v25  ;;  %v4707_v57 = vpop.f32.mrf.mxu2  ;;  %v7985_v25 = vld [vmem:[%s10156_s1 + $0x698] sm:$0xff] }
  0xae   :  { %4933 = vmatpush.bf16.msrb.mxu0 %v7938_v27  ;;  %v7993_v27 = vld [vmem:[%s10156_s1 + $0x6d8] sm:$0xff] }
  0xaf   :  { %4959 = vmatpush.bf16.msrb.mxu2 %v7954_v28  ;;  %v4720_v63 = vpop.f32.mrf.mxu3  ;;  %v8013_v57 = vld [vmem:[%s10156_s1 + $0x778] sm:$0xff] }
  0xb0   :  { %4946 = vmatpush.bf16.msrb.mxu1 %v7946_v30  ;;  %v7968_v30 = vld [vmem:[%s10156_s1 + $0x610] sm:$0xff] }
  0xb1   :  { %4972 = vmatpush.bf16.msrb.mxu3 %v7962_v31  ;;  %v7984_v31 = vld [vmem:[%s10156_s1 + $0x690] sm:$0xff] }
  0xb2   :  { %4934 = vmatpush.bf16.msrb.mxu0 %v7937_v34  ;;  %v8012_v63 = vld [vmem:[%s10156_s1 + $0x770] sm:$0xff] }
  0xb3   :  { %4960 = vmatpush.bf16.msrb.mxu2 %v7953_v35  ;;  %v7976_v35 = vld [vmem:[%s10156_s1 + $0x650] sm:$0xff] }
  0xb4   :  { %4947 = vmatpush.bf16.msrb.mxu1 %v7945_v37 }
  0xb5   :  { %4973 = vmatpush.bf16.msrb.mxu3 %v7961_v38  ;;  %v23_v38 = vld [vmem:[%s10155_s0 + $0x38] sm:$0xff] }
  0xb6   :  { %4935 = vmatpush.bf16.msrb.mxu0 %v7936_v40  ;;  %1179 = vst [vmem:[#allocation1 + $0x20] ss:$4 sm:$0xff] %v23_v38  ;;  %v7983_v40 = vld [vmem:[%s10156_s1 + $0x688] sm:$0xff] }
  0xb7   :  { %4961 = vmatpush.bf16.msrb.mxu2 %v7952_v41  ;;  %v7975_v41 = vld [vmem:[%s10156_s1 + $0x648] sm:$0xff] }
  0xb8   :  { %4948 = vmatpush.bf16.msrb.mxu1 %v7944_v45  ;;  %v7982_v45 = vld [vmem:[%s10156_s1 + $0x680] sm:$0xff] }
  0xb9   :  { %4974 = vmatpush.bf16.msrb.mxu3 %v7960_v46  ;;  %v8005_v46 = vld [vmem:[%s10156_s1 + $0x738] sm:$0xff] }
  0xba   :  { %4936 = vmatpush.bf16.msrb.mxu0 %v7935_v50  ;;  %v8021_v50 = vld [vmem:[%s10156_s1 + $0x7b8] sm:$0xff] }
  0xbb   :  { %4962 = vmatpush.bf16.msrb.mxu2 %v7951_v51  ;;  %v7974_v51 = vld [vmem:[%s10156_s1 + $0x640] sm:$0xff] }
  0xbc   :  { %4949 = vmatpush.bf16.msrb.mxu1 %v7943_v52  ;;  %v7990_v52 = vld [vmem:[%s10156_s1 + $0x6c0] sm:$0xff] }
  0xbd   :  { %4975 = vmatpush.bf16.msrb.mxu3 %v7959_v53  ;;  %v1181_v53 = vld.sshfl [vmem:[#allocation1 + $0x8] sm:$0xff pattern:$0x73625140]  ;;  %v1186_v38 = vld.sshfl [vmem:[#allocation1 + $0x30] sm:$0xff pattern:$0x73625140] }
  0xbe   :  { %4937 = vmatpush.bf16.msrb.mxu0 %v7934_v54  ;;  %v4731_v18 = vpop.f32.mrf.mxu0  ;;  %v1183_v54 = vld.sshfl [vmem:[#allocation1 + $0x18] sm:$0xff pattern:$0x73625140]  ;;  %v1329_v59 = vpack.c.bf16 %v1181_v53, %v1181_v53  ;;  %v8060_v53 = vld [vmem:[%s10156_s1 + $0x8f0] sm:$0xff] }
  0xbf   :  { %4963 = vmatpush.bf16.msrb.mxu2 %v7950_v55  ;;  %v4732_v19 = vadd.f32 %v4731_v18, %v8991_v47  ;;  %v1180_v47 = vld.sshfl [vmem:[#allocation1] sm:$0xff pattern:$0x73625140]  ;;  %v8025_v18 = vld [vmem:[%s10156_s1 + $0x7d8] sm:$0xff] }
  0xc0   :  { %4950 = vmatpush.bf16.msrb.mxu1 %v7942_v61  ;;  %v4744_v22 = vpop.f32.mrf.mxu1  ;;  %v1328_v55 = vpack.c.bf16 %v1180_v47, %v1180_v47  ;;  %v8004_v61 = vld [vmem:[%s10156_s1 + $0x730] sm:$0xff]  ;;  %v8061_v47 = vld [vmem:[%s10156_s1 + $0x8f8] sm:$0xff] }
  0xc1   :  { %4976 = vmatpush.bf16.msrb.mxu3 %v7958_v62  ;;  %4938 = vmatmul.bf16.vlgmr.msrb.gmra.mxu0 %v1324_v2  ;;  %v4745_v23 = vadd.f32 %v4744_v22, %v4732_v19  ;;  %v8020_v62 = vld [vmem:[%s10156_s1 + $0x7b0] sm:$0xff]  ;;  %v8019_v2 = vld [vmem:[%s10156_s1 + $0x7a8] sm:$0xff] }
  0xc2   :  { %4982 = vmatpush.bf16.msra.mxu0 %v7973_v56  ;;  %4964 = vmatmul.bf16.vlgmr.msrb.gmra.mxu2 %v1326_v3  ;;  %v1330_v56 = vpack.c.bf16 %v1182_v48, %v1182_v48  ;;  %v8011_v3 = vld [vmem:[%s10156_s1 + $0x768] sm:$0xff]  ;;  %v8000_v22 = vld [vmem:[%s10156_s1 + $0x710] sm:$0xff] }
  0xc3   :  { %5008 = vmatpush.bf16.msra.mxu2 %v7989_v60  ;;  %4951 = vmatmul.bf16.vlgmr.msrb.gmra.mxu1 %v1325_v6  ;;  %v1331_v60 = vpack.c.bf16 %v1183_v54, %v1183_v54  ;;  %v8035_v54 = vld [vmem:[%s10156_s1 + $0x828] sm:$0xff] }
  0xc4   :  { %4995 = vmatpush.bf16.msra.mxu1 %v7981_v4  ;;  %4977 = vmatmul.bf16.vlgmr.msrb.gmra.mxu3 %v1327_v7  ;;  %v8027_v4 = vld [vmem:[%s10156_s1 + $0x7e8] sm:$0xff]  ;;  %v8002_v7 = vld [vmem:[%s10156_s1 + $0x720] sm:$0xff] }
  0xc5   :  { %5021 = vmatpush.bf16.msra.mxu3 %v7997_v5  ;;  %v4757_v28 = vpop.f32.mrf.mxu2 }
  0xc6   :  { %4983 = vmatpush.bf16.msra.mxu0 %v7972_v8  ;;  %v4758_v29 = vadd.f32 %v4757_v28, %v4745_v23  ;;  %v4733_v33 = vpop.f32.mrf.mxu0  ;;  %v8018_v8 = vld [vmem:[%s10156_s1 + $0x7a0] sm:$0xff]  ;;  %v8016_v23 = vld [vmem:[%s10156_s1 + $0x790] sm:$0xff]  ;;  %v7999_v28 = vld [vmem:[%s10156_s1 + $0x708] sm:$0xff] }
  0xc7   :  { %5009 = vmatpush.bf16.msra.mxu2 %v7988_v9  ;;  %v4770_v32 = vpop.f32.mrf.mxu3 }
  0xc8   :  { %4996 = vmatpush.bf16.msra.mxu1 %v7980_v10  ;;  %v9087_v34 = vadd.f32 %v4770_v32, %v4758_v29  ;;  %v4746_v37 = vpop.f32.mrf.mxu1  ;;  %v8015_v29 = vld [vmem:[%s10156_s1 + $0x788] sm:$0xff] }
  0xc9   :  { %5022 = vmatpush.bf16.msra.mxu3 %v7996_v11  ;;  %v8010_v11 = vld [vmem:[%s10156_s1 + $0x760] sm:$0xff]  ;;  %v8023_v32 = vld [vmem:[%s10156_s1 + $0x7c8] sm:$0xff] }
  0xca   :  { %4984 = vmatpush.bf16.msra.mxu0 %v7971_v12  ;;  %v8026_v12 = vld [vmem:[%s10156_s1 + $0x7e0] sm:$0xff] }
  0xcb   :  { %5010 = vmatpush.bf16.msra.mxu2 %v7987_v13  ;;  %v8001_v13 = vld [vmem:[%s10156_s1 + $0x718] sm:$0xff]  ;;  %v1184_v37 = vld.sshfl [vmem:[#allocation1 + $0x20] sm:$0xff pattern:$0x73625140] }
  0xcc   :  { %4997 = vmatpush.bf16.msra.mxu1 %v7979_v14  ;;  %v8017_v14 = vld [vmem:[%s10156_s1 + $0x798] sm:$0xff] }
  0xcd   :  { %5023 = vmatpush.bf16.msra.mxu3 %v7995_v15  ;;  %v4759_v43 = vpop.f32.mrf.mxu2 }
  0xce   :  { %4985 = vmatpush.bf16.msra.mxu0 %v7970_v16  ;;  %v1187_v43 = vld.sshfl [vmem:[#allocation1 + $0x38] sm:$0xff pattern:$0x73625140] }
  0xcf   :  { %5011 = vmatpush.bf16.msra.mxu2 %v7986_v17  ;;  %v4772_v49 = vpop.f32.mrf.mxu3  ;;  %v8009_v17 = vld [vmem:[%s10156_s1 + $0x758] sm:$0xff] }
  0xd0   :  { %4998 = vmatpush.bf16.msra.mxu1 %v7978_v20  ;;  %v1335_v49 = vpack.c.bf16 %v1187_v43, %v1187_v43  ;;  %v8067_v43 = vld [vmem:[%s10156_s1 + $0x928] sm:$0xff] }
  0xd1   :  { %5024 = vmatpush.bf16.msra.mxu3 %v7994_v21 }
  0xd2   :  { %4986 = vmatpush.bf16.msra.mxu0 %v7969_v24 }
  0xd3   :  { %5012 = vmatpush.bf16.msra.mxu2 %v7985_v25  ;;  %v8008_v25 = vld [vmem:[%s10156_s1 + $0x750] sm:$0xff] }
  0xd4   :  { %4999 = vmatpush.bf16.msra.mxu1 %v7977_v26  ;;  %v8024_v26 = vld [vmem:[%s10156_s1 + $0x7d0] sm:$0xff] }
  0xd5   :  { %5025 = vmatpush.bf16.msra.mxu3 %v7993_v27  ;;  %v24_v27 = vld [vmem:[%s10155_s0 + $0x40] sm:$0xff] }
  0xd6   :  { %4987 = vmatpush.bf16.msra.mxu0 %v7968_v30  ;;  %1188 = vst [vmem:[#allocation1] ss:$4 sm:$0xff] %v24_v27 }
  0xd7   :  { %5013 = vmatpush.bf16.msra.mxu2 %v7984_v31  ;;  %v8007_v31 = vld [vmem:[%s10156_s1 + $0x748] sm:$0xff] }
  0xd8   :  { %5000 = vmatpush.bf16.msra.mxu1 %v7976_v35  ;;  %v8014_v35 = vld [vmem:[%s10156_s1 + $0x780] sm:$0xff] }
  0xd9   :  { %5026 = vmatpush.bf16.msra.mxu3 %v7992_v36  ;;  %v8037_v36 = vld [vmem:[%s10156_s1 + $0x838] sm:$0xff] }
  0xda   :  { %4988 = vmatpush.bf16.msra.mxu0 %v7967_v39  ;;  %v8053_v39 = vld [vmem:[%s10156_s1 + $0x8b8] sm:$0xff] }
  0xdb   :  { %5014 = vmatpush.bf16.msra.mxu2 %v7983_v40  ;;  %v8006_v40 = vld [vmem:[%s10156_s1 + $0x740] sm:$0xff] }
  0xdc   :  { %5001 = vmatpush.bf16.msra.mxu1 %v7975_v41  ;;  %v8022_v41 = vld [vmem:[%s10156_s1 + $0x7c0] sm:$0xff] }
  0xdd   :  { %5027 = vmatpush.bf16.msra.mxu3 %v7991_v42  ;;  %v1185_v42 = vld.sshfl [vmem:[#allocation1 + $0x28] sm:$0xff pattern:$0x73625140]  ;;  %v1192_v27 = vld.sshfl [vmem:[#allocation1 + $0x10] sm:$0xff pattern:$0x73625140] }
  0xde   :  { %4989 = vmatpush.bf16.msra.mxu0 %v7966_v44  ;;  %v4783_v5 = vpop.f32.mrf.mxu0  ;;  %v1332_v44 = vpack.c.bf16 %v1184_v37, %v1184_v37  ;;  %v1333_v48 = vpack.c.bf16 %v1185_v42, %v1185_v42  ;;  %v8092_v42 = vld [vmem:[%s10156_s1 + $0x9f0] sm:$0xff] }
  0xdf   :  { %5015 = vmatpush.bf16.msra.mxu2 %v7982_v45  ;;  %v4784_v6 = vadd.f32 %v4783_v5, %v9087_v34  ;;  %v7998_v34 = vld [vmem:[%s10156_s1 + $0x700] sm:$0xff]  ;;  %v1334_v45 = vpack.c.bf16 %v1186_v38, %v1186_v38 }
  0xe0   :  { %5002 = vmatpush.bf16.msra.mxu1 %v7974_v51  ;;  %v4796_v9 = vpop.f32.mrf.mxu1  ;;  %v8052_v51 = vld [vmem:[%s10156_s1 + $0x8b0] sm:$0xff] }
  0xe1   :  { %5028 = vmatpush.bf16.msra.mxu3 %v7990_v52  ;;  %4990 = vmatmul.bf16.vlgmr.msra.gmra.mxu0 %v1328_v55  ;;  %v4797_v10 = vadd.f32 %v4796_v9, %v4784_v6  ;;  %v8044_v52 = vld [vmem:[%s10156_s1 + $0x870] sm:$0xff]  ;;  %v8051_v55 = vld [vmem:[%s10156_s1 + $0x8a8] sm:$0xff]  ;;  %v8041_v6 = vld [vmem:[%s10156_s1 + $0x858] sm:$0xff] }
  0xe2   :  { %5034 = vmatpush.bf16.msrb.mxu0 %v8005_v46  ;;  %5016 = vmatmul.bf16.vlgmr.msra.gmra.mxu2 %v1330_v56  ;;  %v8045_v46 = vld [vmem:[%s10156_s1 + $0x878] sm:$0xff]  ;;  %v8043_v56 = vld [vmem:[%s10156_s1 + $0x868] sm:$0xff] }
  0xe3   :  { %5060 = vmatpush.bf16.msrb.mxu2 %v8021_v50  ;;  %5003 = vmatmul.bf16.vlgmr.msra.gmra.mxu1 %v1329_v59  ;;  %v8036_v50 = vld [vmem:[%s10156_s1 + $0x830] sm:$0xff] }
  0xe4   :  { %5047 = vmatpush.bf16.msrb.mxu1 %v8013_v57  ;;  %5029 = vmatmul.bf16.vlgmr.msra.gmra.mxu3 %v1331_v60  ;;  %v8059_v57 = vld [vmem:[%s10156_s1 + $0x8e8] sm:$0xff]  ;;  %v8034_v60 = vld [vmem:[%s10156_s1 + $0x820] sm:$0xff] }
  0xe5   :  { %5073 = vmatpush.bf16.msrb.mxu3 %v8029_v58  ;;  %v4809_v15 = vpop.f32.mrf.mxu2 }
  0xe6   :  { %5035 = vmatpush.bf16.msrb.mxu0 %v8004_v61  ;;  %v4810_v16 = vadd.f32 %v4809_v15, %v4797_v10  ;;  %v4785_v20 = vpop.f32.mrf.mxu0  ;;  %v8050_v61 = vld [vmem:[%s10156_s1 + $0x8a0] sm:$0xff]  ;;  %v8056_v15 = vld [vmem:[%s10156_s1 + $0x8d0] sm:$0xff] }
  0xe7   :  { %5061 = vmatpush.bf16.msrb.mxu2 %v8020_v62  ;;  %v4822_v19 = vpop.f32.mrf.mxu3  ;;  %v8039_v20 = vld [vmem:[%s10156_s1 + $0x848] sm:$0xff] }
  0xe8   :  { %5048 = vmatpush.bf16.msrb.mxu1 %v8012_v63  ;;  %v9183_v21 = vadd.f32 %v4822_v19, %v4810_v16  ;;  %v4798_v24 = vpop.f32.mrf.mxu1  ;;  %v25_v16 = vld [vmem:[%s10155_s0 + $0x48] sm:$0xff] }
  0xe9   :  { %5074 = vmatpush.bf16.msrb.mxu3 %v8028_v0  ;;  %v8042_v0 = vld [vmem:[%s10156_s1 + $0x860] sm:$0xff]  ;;  %1189 = vst [vmem:[#allocation1 + $0x20] ss:$4 sm:$0xff] %v25_v16 }
  0xea   :  { %5036 = vmatpush.bf16.msrb.mxu0 %v8003_v1  ;;  %v8058_v1 = vld [vmem:[%s10156_s1 + $0x8e0] sm:$0xff] }
  0xeb   :  { %5062 = vmatpush.bf16.msrb.mxu2 %v8019_v2  ;;  %v8033_v2 = vld [vmem:[%s10156_s1 + $0x818] sm:$0xff]  ;;  %v8046_v24 = vld [vmem:[%s10156_s1 + $0x880] sm:$0xff] }
  0xec   :  { %5049 = vmatpush.bf16.msrb.mxu1 %v8011_v3  ;;  %v8049_v3 = vld [vmem:[%s10156_s1 + $0x898] sm:$0xff] }
  0xed   :  { %5075 = vmatpush.bf16.msrb.mxu3 %v8027_v4  ;;  %v4811_v30 = vpop.f32.mrf.mxu2 }
  0xee   :  { %5037 = vmatpush.bf16.msrb.mxu0 %v8002_v7  ;;  %v8057_v7 = vld [vmem:[%s10156_s1 + $0x8d8] sm:$0xff]  ;;  %v8054_v30 = vld [vmem:[%s10156_s1 + $0x8c0] sm:$0xff] }
  0xef   :  { %5063 = vmatpush.bf16.msrb.mxu2 %v8018_v8  ;;  %v4824_v33 = vpop.f32.mrf.mxu3 }
  0xf0   :  { %5050 = vmatpush.bf16.msrb.mxu1 %v8010_v11  ;;  %v8032_v11 = vld [vmem:[%s10156_s1 + $0x810] sm:$0xff] }
  0xf1   :  { %5076 = vmatpush.bf16.msrb.mxu3 %v8026_v12  ;;  %v8048_v12 = vld [vmem:[%s10156_s1 + $0x890] sm:$0xff] }
  0xf2   :  { %5038 = vmatpush.bf16.msrb.mxu0 %v8001_v13  ;;  %v1196_v16 = vld.sshfl [vmem:[#allocation1 + $0x30] sm:$0xff pattern:$0x73625140] }
  0xf3   :  { %5064 = vmatpush.bf16.msrb.mxu2 %v8017_v14  ;;  %v8040_v14 = vld [vmem:[%s10156_s1 + $0x850] sm:$0xff] }
  0xf4   :  { %5051 = vmatpush.bf16.msrb.mxu1 %v8009_v17  ;;  %v8031_v17 = vld [vmem:[%s10156_s1 + $0x808] sm:$0xff] }
  0xf5   :  { %5077 = vmatpush.bf16.msrb.mxu3 %v8025_v18  ;;  %v8047_v18 = vld [vmem:[%s10156_s1 + $0x888] sm:$0xff] }
  0xf6   :  { %5039 = vmatpush.bf16.msrb.mxu0 %v8000_v22 }
  0xf7   :  { %5065 = vmatpush.bf16.msrb.mxu2 %v8016_v23  ;;  %v8030_v23 = vld [vmem:[%s10156_s1 + $0x800] sm:$0xff] }
  0xf8   :  { %5052 = vmatpush.bf16.msrb.mxu1 %v8008_v25  ;;  %v8069_v25 = vld [vmem:[%s10156_s1 + $0x938] sm:$0xff] }
  0xf9   :  { %5078 = vmatpush.bf16.msrb.mxu3 %v8024_v26  ;;  %v1190_v26 = vld.sshfl [vmem:[#allocation1] sm:$0xff pattern:$0x73625140] }
  0xfa   :  { %5040 = vmatpush.bf16.msrb.mxu0 %v7999_v28  ;;  %v8085_v28 = vld [vmem:[%s10156_s1 + $0x9b8] sm:$0xff]  ;;  %v1336_v33 = vpack.c.bf16 %v1190_v26, %v1190_v26 }
  0xfb   :  { %5066 = vmatpush.bf16.msrb.mxu2 %v8015_v29  ;;  %v8038_v29 = vld [vmem:[%s10156_s1 + $0x840] sm:$0xff] }
  0xfc   :  { %5053 = vmatpush.bf16.msrb.mxu1 %v8007_v31  ;;  %v1191_v31 = vld.sshfl [vmem:[#allocation1 + $0x8] sm:$0xff pattern:$0x73625140] }
  0xfd   :  { %5079 = vmatpush.bf16.msrb.mxu3 %v8023_v32  ;;  %v1193_v32 = vld.sshfl [vmem:[#allocation1 + $0x18] sm:$0xff pattern:$0x73625140]  ;;  %v1337_v37 = vpack.c.bf16 %v1191_v31, %v1191_v31  ;;  %v8124_v31 = vld [vmem:[%s10156_s1 + $0xaf0] sm:$0xff] }
  0xfe   :  { %5041 = vmatpush.bf16.msrb.mxu0 %v7998_v34  ;;  %v4835_v58 = vpop.f32.mrf.mxu0  ;;  %v1338_v34 = vpack.c.bf16 %v1192_v27, %v1192_v27  ;;  %v1339_v38 = vpack.c.bf16 %v1193_v32, %v1193_v32  ;;  %v8099_v32 = vld [vmem:[%s10156_s1 + $0xa28] sm:$0xff] }
  0xff   :  { %5067 = vmatpush.bf16.msrb.mxu2 %v8014_v35  ;;  %v4836_v59 = vadd.f32 %v4835_v58, %v9183_v21  ;;  %v8055_v21 = vld [vmem:[%s10156_s1 + $0x8c8] sm:$0xff]  ;;  %v8077_v35 = vld [vmem:[%s10156_s1 + $0x978] sm:$0xff] }
 0x100   :  { %5054 = vmatpush.bf16.msrb.mxu1 %v8006_v40  ;;  %v4848_v62 = vpop.f32.mrf.mxu1  ;;  %v8084_v40 = vld [vmem:[%s10156_s1 + $0x9b0] sm:$0xff] }
 0x101   :  { %5080 = vmatpush.bf16.msrb.mxu3 %v8022_v41  ;;  %5042 = vmatmul.bf16.vlgmr.msrb.gmra.mxu0 %v1332_v44  ;;  %v4849_v63 = vadd.f32 %v4848_v62, %v4836_v59  ;;  %v8076_v41 = vld [vmem:[%s10156_s1 + $0x970] sm:$0xff]  ;;  %v8083_v44 = vld [vmem:[%s10156_s1 + $0x9a8] sm:$0xff]  ;;  %v8073_v59 = vld [vmem:[%s10156_s1 + $0x958] sm:$0xff] }
 0x102   :  { %5086 = vmatpush.bf16.msra.mxu0 %v8037_v36  ;;  %5068 = vmatmul.bf16.vlgmr.msrb.gmra.mxu2 %v1334_v45  ;;  %v8093_v36 = vld [vmem:[%s10156_s1 + $0x9f8] sm:$0xff]  ;;  %v8075_v45 = vld [vmem:[%s10156_s1 + $0x968] sm:$0xff] }
 0x103   :  { %5112 = vmatpush.bf16.msra.mxu2 %v8053_v39  ;;  %5055 = vmatmul.bf16.vlgmr.msrb.gmra.mxu1 %v1333_v48  ;;  %v8068_v39 = vld [vmem:[%s10156_s1 + $0x930] sm:$0xff] }
 0x104   :  { %5099 = vmatpush.bf16.msra.mxu1 %v8045_v46  ;;  %5081 = vmatmul.bf16.vlgmr.msrb.gmra.mxu3 %v1335_v49  ;;  %v8091_v46 = vld [vmem:[%s10156_s1 + $0x9e8] sm:$0xff]  ;;  %v8066_v49 = vld [vmem:[%s10156_s1 + $0x920] sm:$0xff] }
 0x105   :  { %5125 = vmatpush.bf16.msra.mxu3 %v8061_v47  ;;  %v4861_v4 = vpop.f32.mrf.mxu2 }
 0x106   :  { %5087 = vmatpush.bf16.msra.mxu0 %v8036_v50  ;;  %v4862_v5 = vadd.f32 %v4861_v4, %v4849_v63  ;;  %v4837_v9 = vpop.f32.mrf.mxu0  ;;  %v8082_v50 = vld [vmem:[%s10156_s1 + $0x9a0] sm:$0xff]  ;;  %v8088_v4 = vld [vmem:[%s10156_s1 + $0x9d0] sm:$0xff] }
 0x107   :  { %5113 = vmatpush.bf16.msra.mxu2 %v8052_v51  ;;  %v4874_v8 = vpop.f32.mrf.mxu3  ;;  %v8071_v9 = vld [vmem:[%s10156_s1 + $0x948] sm:$0xff] }
 0x108   :  { %5100 = vmatpush.bf16.msra.mxu1 %v8044_v52  ;;  %v9285_v10 = vadd.f32 %v4874_v8, %v4862_v5  ;;  %v4850_v13 = vpop.f32.mrf.mxu1  ;;  %v26_v5 = vld [vmem:[%s10155_s0 + $0x50] sm:$0xff] }
 0x109   :  { %5126 = vmatpush.bf16.msra.mxu3 %v8060_v53  ;;  %v8074_v53 = vld [vmem:[%s10156_s1 + $0x960] sm:$0xff]  ;;  %1198 = vst [vmem:[#allocation1] ss:$4 sm:$0xff] %v26_v5 }
 0x10a   :  { %5088 = vmatpush.bf16.msra.mxu0 %v8035_v54  ;;  %v8090_v54 = vld [vmem:[%s10156_s1 + $0x9e0] sm:$0xff] }
 0x10b   :  { %5114 = vmatpush.bf16.msra.mxu2 %v8051_v55  ;;  %v8065_v55 = vld [vmem:[%s10156_s1 + $0x918] sm:$0xff]  ;;  %v8078_v13 = vld [vmem:[%s10156_s1 + $0x980] sm:$0xff] }
 0x10c   :  { %5101 = vmatpush.bf16.msra.mxu1 %v8043_v56  ;;  %v8081_v56 = vld [vmem:[%s10156_s1 + $0x998] sm:$0xff] }
 0x10d   :  { %5127 = vmatpush.bf16.msra.mxu3 %v8059_v57  ;;  %v4863_v19 = vpop.f32.mrf.mxu2 }
 0x10e   :  { %5089 = vmatpush.bf16.msra.mxu0 %v8034_v60  ;;  %v8089_v60 = vld [vmem:[%s10156_s1 + $0x9d8] sm:$0xff]  ;;  %v8086_v19 = vld [vmem:[%s10156_s1 + $0x9c0] sm:$0xff] }
 0x10f   :  { %5115 = vmatpush.bf16.msra.mxu2 %v8050_v61  ;;  %v4876_v22 = vpop.f32.mrf.mxu3 }
 0x110   :  { %5102 = vmatpush.bf16.msra.mxu1 %v8042_v0  ;;  %v8064_v0 = vld [vmem:[%s10156_s1 + $0x910] sm:$0xff] }
 0x111   :  { %5128 = vmatpush.bf16.msra.mxu3 %v8058_v1  ;;  %v8080_v1 = vld [vmem:[%s10156_s1 + $0x990] sm:$0xff] }
 0x112   :  { %5090 = vmatpush.bf16.msra.mxu0 %v8033_v2  ;;  %v1202_v5 = vld.sshfl [vmem:[#allocation1 + $0x10] sm:$0xff pattern:$0x73625140] }
 0x113   :  { %5116 = vmatpush.bf16.msra.mxu2 %v8049_v3  ;;  %v8072_v3 = vld [vmem:[%s10156_s1 + $0x950] sm:$0xff] }
 0x114   :  { %5103 = vmatpush.bf16.msra.mxu1 %v8041_v6  ;;  %v8063_v6 = vld [vmem:[%s10156_s1 + $0x908] sm:$0xff] }
 0x115   :  { %5129 = vmatpush.bf16.msra.mxu3 %v8057_v7  ;;  %v8079_v7 = vld [vmem:[%s10156_s1 + $0x988] sm:$0xff] }
 0x116   :  { %5091 = vmatpush.bf16.msra.mxu0 %v8032_v11 }
 0x117   :  { %5117 = vmatpush.bf16.msra.mxu2 %v8048_v12  ;;  %v8062_v12 = vld [vmem:[%s10156_s1 + $0x900] sm:$0xff] }
 0x118   :  { %5104 = vmatpush.bf16.msra.mxu1 %v8040_v14  ;;  %v8101_v14 = vld [vmem:[%s10156_s1 + $0xa38] sm:$0xff] }
 0x119   :  { %5130 = vmatpush.bf16.msra.mxu3 %v8056_v15  ;;  %v1194_v15 = vld.sshfl [vmem:[#allocation1 + $0x20] sm:$0xff pattern:$0x73625140] }
 0x11a   :  { %5092 = vmatpush.bf16.msra.mxu0 %v8031_v17  ;;  %v8117_v17 = vld [vmem:[%s10156_s1 + $0xab8] sm:$0xff]  ;;  %v1340_v22 = vpack.c.bf16 %v1194_v15, %v1194_v15 }
 0x11b   :  { %5118 = vmatpush.bf16.msra.mxu2 %v8047_v18  ;;  %v8070_v18 = vld [vmem:[%s10156_s1 + $0x940] sm:$0xff] }
 0x11c   :  { %5105 = vmatpush.bf16.msra.mxu1 %v8039_v20  ;;  %v1195_v20 = vld.sshfl [vmem:[#allocation1 + $0x28] sm:$0xff pattern:$0x73625140] }
 0x11d   :  { %5131 = vmatpush.bf16.msra.mxu3 %v8055_v21  ;;  %v1197_v21 = vld.sshfl [vmem:[#allocation1 + $0x38] sm:$0xff pattern:$0x73625140]  ;;  %v1341_v26 = vpack.c.bf16 %v1195_v20, %v1195_v20  ;;  %v8156_v20 = vld [vmem:[%s10156_s1 + $0xbf0] sm:$0xff] }
 0x11e   :  { %5093 = vmatpush.bf16.msra.mxu0 %v8030_v23  ;;  %v4887_v47 = vpop.f32.mrf.mxu0  ;;  %v1342_v23 = vpack.c.bf16 %v1196_v16, %v1196_v16  ;;  %v1343_v27 = vpack.c.bf16 %v1197_v21, %v1197_v21  ;;  %v8131_v21 = vld [vmem:[%s10156_s1 + $0xb28] sm:$0xff] }
 0x11f   :  { %5119 = vmatpush.bf16.msra.mxu2 %v8046_v24  ;;  %v4888_v48 = vadd.f32 %v4887_v47, %v9285_v10  ;;  %v8087_v10 = vld [vmem:[%s10156_s1 + $0x9c8] sm:$0xff]  ;;  %v8109_v24 = vld [vmem:[%s10156_s1 + $0xa78] sm:$0xff] }
 0x120   :  { %5106 = vmatpush.bf16.msra.mxu1 %v8038_v29  ;;  %v4900_v51 = vpop.f32.mrf.mxu1  ;;  %v8116_v29 = vld [vmem:[%s10156_s1 + $0xab0] sm:$0xff] }
 0x121   :  { %5132 = vmatpush.bf16.msra.mxu3 %v8054_v30  ;;  %5094 = vmatmul.bf16.vlgmr.msra.gmra.mxu0 %v1336_v33  ;;  %v4901_v52 = vadd.f32 %v4900_v51, %v4888_v48  ;;  %v8108_v30 = vld [vmem:[%s10156_s1 + $0xa70] sm:$0xff]  ;;  %v8115_v33 = vld [vmem:[%s10156_s1 + $0xaa8] sm:$0xff]  ;;  %v8105_v48 = vld [vmem:[%s10156_s1 + $0xa58] sm:$0xff] }
 0x122   :  { %5138 = vmatpush.bf16.msrb.mxu0 %v8069_v25  ;;  %5120 = vmatmul.bf16.vlgmr.msra.gmra.mxu2 %v1338_v34  ;;  %v8125_v25 = vld [vmem:[%s10156_s1 + $0xaf8] sm:$0xff]  ;;  %v8107_v34 = vld [vmem:[%s10156_s1 + $0xa68] sm:$0xff] }
 0x123   :  { %5164 = vmatpush.bf16.msrb.mxu2 %v8085_v28  ;;  %5107 = vmatmul.bf16.vlgmr.msra.gmra.mxu1 %v1337_v37  ;;  %v8100_v28 = vld [vmem:[%s10156_s1 + $0xa30] sm:$0xff] }
 0x124   :  { %5151 = vmatpush.bf16.msrb.mxu1 %v8077_v35  ;;  %5133 = vmatmul.bf16.vlgmr.msra.gmra.mxu3 %v1339_v38  ;;  %v8123_v35 = vld [vmem:[%s10156_s1 + $0xae8] sm:$0xff]  ;;  %v8098_v38 = vld [vmem:[%s10156_s1 + $0xa20] sm:$0xff] }
 0x125   :  { %5177 = vmatpush.bf16.msrb.mxu3 %v8093_v36  ;;  %v4913_v57 = vpop.f32.mrf.mxu2 }
 0x126   :  { %5139 = vmatpush.bf16.msrb.mxu0 %v8068_v39  ;;  %v4914_v58 = vadd.f32 %v4913_v57, %v4901_v52  ;;  %v4889_v62 = vpop.f32.mrf.mxu0  ;;  %v8114_v39 = vld [vmem:[%s10156_s1 + $0xaa0] sm:$0xff]  ;;  %v8120_v57 = vld [vmem:[%s10156_s1 + $0xad0] sm:$0xff] }
 0x127   :  { %5165 = vmatpush.bf16.msrb.mxu2 %v8084_v40  ;;  %v4926_v61 = vpop.f32.mrf.mxu3  ;;  %v8103_v62 = vld [vmem:[%s10156_s1 + $0xa48] sm:$0xff] }
 0x128   :  { %5152 = vmatpush.bf16.msrb.mxu1 %v8076_v41  ;;  %v9387_v63 = vadd.f32 %v4926_v61, %v4914_v58  ;;  %v4902_v2 = vpop.f32.mrf.mxu1  ;;  %v27_v58 = vld [vmem:[%s10155_s0 + $0x58] sm:$0xff] }
 0x129   :  { %5178 = vmatpush.bf16.msrb.mxu3 %v8092_v42  ;;  %v8106_v42 = vld [vmem:[%s10156_s1 + $0xa60] sm:$0xff]  ;;  %1199 = vst [vmem:[#allocation1 + $0x20] ss:$4 sm:$0xff] %v27_v58 }
 0x12a   :  { %5140 = vmatpush.bf16.msrb.mxu0 %v8067_v43  ;;  %v8122_v43 = vld [vmem:[%s10156_s1 + $0xae0] sm:$0xff] }
 0x12b   :  { %5166 = vmatpush.bf16.msrb.mxu2 %v8083_v44  ;;  %v8097_v44 = vld [vmem:[%s10156_s1 + $0xa18] sm:$0xff]  ;;  %v8110_v2 = vld [vmem:[%s10156_s1 + $0xa80] sm:$0xff] }
 0x12c   :  { %5153 = vmatpush.bf16.msrb.mxu1 %v8075_v45  ;;  %v8113_v45 = vld [vmem:[%s10156_s1 + $0xa98] sm:$0xff] }
 0x12d   :  { %5179 = vmatpush.bf16.msrb.mxu3 %v8091_v46  ;;  %v4915_v8 = vpop.f32.mrf.mxu2 }
 0x12e   :  { %5141 = vmatpush.bf16.msrb.mxu0 %v8066_v49  ;;  %v8121_v49 = vld [vmem:[%s10156_s1 + $0xad8] sm:$0xff]  ;;  %v8118_v8 = vld [vmem:[%s10156_s1 + $0xac0] sm:$0xff] }
 0x12f   :  { %5167 = vmatpush.bf16.msrb.mxu2 %v8082_v50  ;;  %v4928_v11 = vpop.f32.mrf.mxu3 }
 0x130   :  { %5154 = vmatpush.bf16.msrb.mxu1 %v8074_v53  ;;  %v8096_v53 = vld [vmem:[%s10156_s1 + $0xa10] sm:$0xff] }
 0x131   :  { %5180 = vmatpush.bf16.msrb.mxu3 %v8090_v54  ;;  %v8112_v54 = vld [vmem:[%s10156_s1 + $0xa90] sm:$0xff] }
 0x132   :  { %5142 = vmatpush.bf16.msrb.mxu0 %v8065_v55  ;;  %v1206_v58 = vld.sshfl [vmem:[#allocation1 + $0x30] sm:$0xff pattern:$0x73625140] }
 0x133   :  { %5168 = vmatpush.bf16.msrb.mxu2 %v8081_v56  ;;  %v8104_v56 = vld [vmem:[%s10156_s1 + $0xa50] sm:$0xff] }
 0x134   :  { %5155 = vmatpush.bf16.msrb.mxu1 %v8073_v59  ;;  %v8095_v59 = vld [vmem:[%s10156_s1 + $0xa08] sm:$0xff] }
 0x135   :  { %5181 = vmatpush.bf16.msrb.mxu3 %v8089_v60  ;;  %v8111_v60 = vld [vmem:[%s10156_s1 + $0xa88] sm:$0xff] }
 0x136   :  { %5143 = vmatpush.bf16.msrb.mxu0 %v8064_v0 }
 0x137   :  { %5169 = vmatpush.bf16.msrb.mxu2 %v8080_v1  ;;  %v8094_v1 = vld [vmem:[%s10156_s1 + $0xa00] sm:$0xff] }
 0x138   :  { %5156 = vmatpush.bf16.msrb.mxu1 %v8072_v3  ;;  %v8133_v3 = vld [vmem:[%s10156_s1 + $0xb38] sm:$0xff] }
 0x139   :  { %5182 = vmatpush.bf16.msrb.mxu3 %v8088_v4  ;;  %v1200_v4 = vld.sshfl [vmem:[#allocation1] sm:$0xff pattern:$0x73625140] }
 0x13a   :  { %5144 = vmatpush.bf16.msrb.mxu0 %v8063_v6  ;;  %v8149_v6 = vld [vmem:[%s10156_s1 + $0xbb8] sm:$0xff]  ;;  %v1344_v11 = vpack.c.bf16 %v1200_v4, %v1200_v4 }
 0x13b   :  { %5170 = vmatpush.bf16.msrb.mxu2 %v8079_v7  ;;  %v8102_v7 = vld [vmem:[%s10156_s1 + $0xa40] sm:$0xff] }
 0x13c   :  { %5157 = vmatpush.bf16.msrb.mxu1 %v8071_v9  ;;  %v1201_v9 = vld.sshfl [vmem:[#allocation1 + $0x8] sm:$0xff pattern:$0x73625140] }
 0x13d   :  { %5183 = vmatpush.bf16.msrb.mxu3 %v8087_v10  ;;  %v1203_v10 = vld.sshfl [vmem:[#allocation1 + $0x18] sm:$0xff pattern:$0x73625140]  ;;  %v1345_v15 = vpack.c.bf16 %v1201_v9, %v1201_v9  ;;  %v8188_v9 = vld [vmem:[%s10156_s1 + $0xcf0] sm:$0xff] }
 0x13e   :  { %5145 = vmatpush.bf16.msrb.mxu0 %v8062_v12  ;;  %v4939_v36 = vpop.f32.mrf.mxu0  ;;  %v1346_v12 = vpack.c.bf16 %v1202_v5, %v1202_v5  ;;  %v1347_v16 = vpack.c.bf16 %v1203_v10, %v1203_v10  ;;  %v8163_v10 = vld [vmem:[%s10156_s1 + $0xc28] sm:$0xff] }
 0x13f   :  { %5171 = vmatpush.bf16.msrb.mxu2 %v8078_v13  ;;  %v4940_v37 = vadd.f32 %v4939_v36, %v9387_v63  ;;  %v8119_v63 = vld [vmem:[%s10156_s1 + $0xac8] sm:$0xff]  ;;  %v8141_v13 = vld [vmem:[%s10156_s1 + $0xb78] sm:$0xff] }
 0x140   :  { %5158 = vmatpush.bf16.msrb.mxu1 %v8070_v18  ;;  %v4952_v40 = vpop.f32.mrf.mxu1  ;;  %v8148_v18 = vld [vmem:[%s10156_s1 + $0xbb0] sm:$0xff] }
 0x141   :  { %5184 = vmatpush.bf16.msrb.mxu3 %v8086_v19  ;;  %5146 = vmatmul.bf16.vlgmr.msrb.gmra.mxu0 %v1340_v22  ;;  %v4953_v41 = vadd.f32 %v4952_v40, %v4940_v37  ;;  %v8140_v19 = vld [vmem:[%s10156_s1 + $0xb70] sm:$0xff]  ;;  %v8147_v22 = vld [vmem:[%s10156_s1 + $0xba8] sm:$0xff]  ;;  %v8137_v37 = vld [vmem:[%s10156_s1 + $0xb58] sm:$0xff] }
 0x142   :  { %5190 = vmatpush.bf16.msra.mxu0 %v8101_v14  ;;  %5172 = vmatmul.bf16.vlgmr.msrb.gmra.mxu2 %v1342_v23  ;;  %v8157_v14 = vld [vmem:[%s10156_s1 + $0xbf8] sm:$0xff]  ;;  %v8139_v23 = vld [vmem:[%s10156_s1 + $0xb68] sm:$0xff] }
 0x143   :  { %5216 = vmatpush.bf16.msra.mxu2 %v8117_v17  ;;  %5159 = vmatmul.bf16.vlgmr.msrb.gmra.mxu1 %v1341_v26  ;;  %v8132_v17 = vld [vmem:[%s10156_s1 + $0xb30] sm:$0xff] }
 0x144   :  { %5203 = vmatpush.bf16.msra.mxu1 %v8109_v24  ;;  %5185 = vmatmul.bf16.vlgmr.msrb.gmra.mxu3 %v1343_v27  ;;  %v8155_v24 = vld [vmem:[%s10156_s1 + $0xbe8] sm:$0xff]  ;;  %v8130_v27 = vld [vmem:[%s10156_s1 + $0xb20] sm:$0xff] }
 0x145   :  { %5229 = vmatpush.bf16.msra.mxu3 %v8125_v25  ;;  %v4965_v46 = vpop.f32.mrf.mxu2 }
 0x146   :  { %5191 = vmatpush.bf16.msra.mxu0 %v8100_v28  ;;  %v4966_v47 = vadd.f32 %v4965_v46, %v4953_v41  ;;  %v4941_v51 = vpop.f32.mrf.mxu0  ;;  %v8146_v28 = vld [vmem:[%s10156_s1 + $0xba0] sm:$0xff]  ;;  %v8152_v46 = vld [vmem:[%s10156_s1 + $0xbd0] sm:$0xff] }
 0x147   :  { %5217 = vmatpush.bf16.msra.mxu2 %v8116_v29  ;;  %v4978_v50 = vpop.f32.mrf.mxu3  ;;  %v8135_v51 = vld [vmem:[%s10156_s1 + $0xb48] sm:$0xff] }
 0x148   :  { %5204 = vmatpush.bf16.msra.mxu1 %v8108_v30  ;;  %v9489_v52 = vadd.f32 %v4978_v50, %v4966_v47  ;;  %v4954_v55 = vpop.f32.mrf.mxu1  ;;  %v28_v47 = vld [vmem:[%s10155_s0 + $0x60] sm:$0xff] }
 0x149   :  { %5230 = vmatpush.bf16.msra.mxu3 %v8124_v31  ;;  %v8138_v31 = vld [vmem:[%s10156_s1 + $0xb60] sm:$0xff]  ;;  %1208 = vst [vmem:[#allocation1] ss:$4 sm:$0xff] %v28_v47 }
 0x14a   :  { %5192 = vmatpush.bf16.msra.mxu0 %v8099_v32  ;;  %v8154_v32 = vld [vmem:[%s10156_s1 + $0xbe0] sm:$0xff] }
 0x14b   :  { %5218 = vmatpush.bf16.msra.mxu2 %v8115_v33  ;;  %v8129_v33 = vld [vmem:[%s10156_s1 + $0xb18] sm:$0xff]  ;;  %v8142_v55 = vld [vmem:[%s10156_s1 + $0xb80] sm:$0xff] }
 0x14c   :  { %5205 = vmatpush.bf16.msra.mxu1 %v8107_v34  ;;  %v8145_v34 = vld [vmem:[%s10156_s1 + $0xb98] sm:$0xff] }
 0x14d   :  { %5231 = vmatpush.bf16.msra.mxu3 %v8123_v35  ;;  %v4967_v61 = vpop.f32.mrf.mxu2 }
 0x14e   :  { %5193 = vmatpush.bf16.msra.mxu0 %v8098_v38  ;;  %v8153_v38 = vld [vmem:[%s10156_s1 + $0xbd8] sm:$0xff]  ;;  %v8150_v61 = vld [vmem:[%s10156_s1 + $0xbc0] sm:$0xff] }
 0x14f   :  { %5219 = vmatpush.bf16.msra.mxu2 %v8114_v39  ;;  %v4980_v0 = vpop.f32.mrf.mxu3 }
 0x150   :  { %5206 = vmatpush.bf16.msra.mxu1 %v8106_v42  ;;  %v8128_v42 = vld [vmem:[%s10156_s1 + $0xb10] sm:$0xff] }
 0x151   :  { %5232 = vmatpush.bf16.msra.mxu3 %v8122_v43  ;;  %v8144_v43 = vld [vmem:[%s10156_s1 + $0xb90] sm:$0xff] }
 0x152   :  { %5194 = vmatpush.bf16.msra.mxu0 %v8097_v44  ;;  %v1212_v47 = vld.sshfl [vmem:[#allocation1 + $0x10] sm:$0xff pattern:$0x73625140] }
 0x153   :  { %5220 = vmatpush.bf16.msra.mxu2 %v8113_v45  ;;  %v8136_v45 = vld [vmem:[%s10156_s1 + $0xb50] sm:$0xff] }
 0x154   :  { %5207 = vmatpush.bf16.msra.mxu1 %v8105_v48  ;;  %v8127_v48 = vld [vmem:[%s10156_s1 + $0xb08] sm:$0xff] }
 0x155   :  { %5233 = vmatpush.bf16.msra.mxu3 %v8121_v49  ;;  %v8143_v49 = vld [vmem:[%s10156_s1 + $0xb88] sm:$0xff] }
 0x156   :  { %5195 = vmatpush.bf16.msra.mxu0 %v8096_v53 }
 0x157   :  { %5221 = vmatpush.bf16.msra.mxu2 %v8112_v54  ;;  %v8126_v54 = vld [vmem:[%s10156_s1 + $0xb00] sm:$0xff] }
 0x158   :  { %5208 = vmatpush.bf16.msra.mxu1 %v8104_v56  ;;  %v8165_v56 = vld [vmem:[%s10156_s1 + $0xc38] sm:$0xff] }
 0x159   :  { %5234 = vmatpush.bf16.msra.mxu3 %v8120_v57  ;;  %v1204_v57 = vld.sshfl [vmem:[#allocation1 + $0x20] sm:$0xff pattern:$0x73625140] }
 0x15a   :  { %5196 = vmatpush.bf16.msra.mxu0 %v8095_v59  ;;  %v8181_v59 = vld [vmem:[%s10156_s1 + $0xcb8] sm:$0xff]  ;;  %v1348_v0 = vpack.c.bf16 %v1204_v57, %v1204_v57 }
 0x15b   :  { %5222 = vmatpush.bf16.msra.mxu2 %v8111_v60  ;;  %v8134_v60 = vld [vmem:[%s10156_s1 + $0xb40] sm:$0xff] }
 0x15c   :  { %5209 = vmatpush.bf16.msra.mxu1 %v8103_v62  ;;  %v1205_v62 = vld.sshfl [vmem:[#allocation1 + $0x28] sm:$0xff pattern:$0x73625140] }
 0x15d   :  { %5235 = vmatpush.bf16.msra.mxu3 %v8119_v63  ;;  %v1207_v63 = vld.sshfl [vmem:[#allocation1 + $0x38] sm:$0xff pattern:$0x73625140]  ;;  %v1349_v4 = vpack.c.bf16 %v1205_v62, %v1205_v62  ;;  %v8220_v62 = vld [vmem:[%s10156_s1 + $0xdf0] sm:$0xff] }
 0x15e   :  { %5197 = vmatpush.bf16.msra.mxu0 %v8094_v1  ;;  %v4991_v25 = vpop.f32.mrf.mxu0  ;;  %v1350_v1 = vpack.c.bf16 %v1206_v58, %v1206_v58  ;;  %v1351_v5 = vpack.c.bf16 %v1207_v63, %v1207_v63  ;;  %v8195_v63 = vld [vmem:[%s10156_s1 + $0xd28] sm:$0xff] }
 0x15f   :  { %5223 = vmatpush.bf16.msra.mxu2 %v8110_v2  ;;  %v4992_v26 = vadd.f32 %v4991_v25, %v9489_v52  ;;  %v8151_v52 = vld [vmem:[%s10156_s1 + $0xbc8] sm:$0xff]  ;;  %v8173_v2 = vld [vmem:[%s10156_s1 + $0xc78] sm:$0xff] }
 0x160   :  { %5210 = vmatpush.bf16.msra.mxu1 %v8102_v7  ;;  %v5004_v29 = vpop.f32.mrf.mxu1  ;;  %v8180_v7 = vld [vmem:[%s10156_s1 + $0xcb0] sm:$0xff] }
 0x161   :  { %5236 = vmatpush.bf16.msra.mxu3 %v8118_v8  ;;  %5198 = vmatmul.bf16.vlgmr.msra.gmra.mxu0 %v1344_v11  ;;  %v5005_v30 = vadd.f32 %v5004_v29, %v4992_v26  ;;  %v8172_v8 = vld [vmem:[%s10156_s1 + $0xc70] sm:$0xff]  ;;  %v8179_v11 = vld [vmem:[%s10156_s1 + $0xca8] sm:$0xff]  ;;  %v8169_v26 = vld [vmem:[%s10156_s1 + $0xc58] sm:$0xff] }
 0x162   :  { %5242 = vmatpush.bf16.msrb.mxu0 %v8133_v3  ;;  %5224 = vmatmul.bf16.vlgmr.msra.gmra.mxu2 %v1346_v12  ;;  %v8189_v3 = vld [vmem:[%s10156_s1 + $0xcf8] sm:$0xff]  ;;  %v8171_v12 = vld [vmem:[%s10156_s1 + $0xc68] sm:$0xff] }
 0x163   :  { %5268 = vmatpush.bf16.msrb.mxu2 %v8149_v6  ;;  %5211 = vmatmul.bf16.vlgmr.msra.gmra.mxu1 %v1345_v15  ;;  %v8164_v6 = vld [vmem:[%s10156_s1 + $0xc30] sm:$0xff] }
 0x164   :  { %5255 = vmatpush.bf16.msrb.mxu1 %v8141_v13  ;;  %5237 = vmatmul.bf16.vlgmr.msra.gmra.mxu3 %v1347_v16  ;;  %v8187_v13 = vld [vmem:[%s10156_s1 + $0xce8] sm:$0xff]  ;;  %v8162_v16 = vld [vmem:[%s10156_s1 + $0xc20] sm:$0xff] }
 0x165   :  { %5281 = vmatpush.bf16.msrb.mxu3 %v8157_v14  ;;  %v5017_v35 = vpop.f32.mrf.mxu2 }
 0x166   :  { %5243 = vmatpush.bf16.msrb.mxu0 %v8132_v17  ;;  %v5018_v36 = vadd.f32 %v5017_v35, %v5005_v30  ;;  %v4993_v40 = vpop.f32.mrf.mxu0  ;;  %v8178_v17 = vld [vmem:[%s10156_s1 + $0xca0] sm:$0xff]  ;;  %v8184_v35 = vld [vmem:[%s10156_s1 + $0xcd0] sm:$0xff] }
 0x167   :  { %5269 = vmatpush.bf16.msrb.mxu2 %v8148_v18  ;;  %v5030_v39 = vpop.f32.mrf.mxu3  ;;  %v8167_v40 = vld [vmem:[%s10156_s1 + $0xc48] sm:$0xff] }
 0x168   :  { %5256 = vmatpush.bf16.msrb.mxu1 %v8140_v19  ;;  %v9591_v41 = vadd.f32 %v5030_v39, %v5018_v36  ;;  %v5006_v44 = vpop.f32.mrf.mxu1  ;;  %v29_v36 = vld [vmem:[%s10155_s0 + $0x68] sm:$0xff] }
 0x169   :  { %5282 = vmatpush.bf16.msrb.mxu3 %v8156_v20  ;;  %v8170_v20 = vld [vmem:[%s10156_s1 + $0xc60] sm:$0xff]  ;;  %1209 = vst [vmem:[#allocation1 + $0x20] ss:$4 sm:$0xff] %v29_v36 }
 0x16a   :  { %5244 = vmatpush.bf16.msrb.mxu0 %v8131_v21  ;;  %v8186_v21 = vld [vmem:[%s10156_s1 + $0xce0] sm:$0xff] }
 0x16b   :  { %5270 = vmatpush.bf16.msrb.mxu2 %v8147_v22  ;;  %v8161_v22 = vld [vmem:[%s10156_s1 + $0xc18] sm:$0xff]  ;;  %v8174_v44 = vld [vmem:[%s10156_s1 + $0xc80] sm:$0xff] }
 0x16c   :  { %5257 = vmatpush.bf16.msrb.mxu1 %v8139_v23  ;;  %v8177_v23 = vld [vmem:[%s10156_s1 + $0xc98] sm:$0xff] }
 0x16d   :  { %5283 = vmatpush.bf16.msrb.mxu3 %v8155_v24  ;;  %v5019_v50 = vpop.f32.mrf.mxu2 }
 0x16e   :  { %5245 = vmatpush.bf16.msrb.mxu0 %v8130_v27  ;;  %v8185_v27 = vld [vmem:[%s10156_s1 + $0xcd8] sm:$0xff]  ;;  %v8182_v50 = vld [vmem:[%s10156_s1 + $0xcc0] sm:$0xff] }
 0x16f   :  { %5271 = vmatpush.bf16.msrb.mxu2 %v8146_v28  ;;  %v5032_v53 = vpop.f32.mrf.mxu3 }
 0x170   :  { %5258 = vmatpush.bf16.msrb.mxu1 %v8138_v31  ;;  %v8160_v31 = vld [vmem:[%s10156_s1 + $0xc10] sm:$0xff] }
 0x171   :  { %5284 = vmatpush.bf16.msrb.mxu3 %v8154_v32  ;;  %v8176_v32 = vld [vmem:[%s10156_s1 + $0xc90] sm:$0xff] }
 0x172   :  { %5246 = vmatpush.bf16.msrb.mxu0 %v8129_v33  ;;  %v1216_v36 = vld.sshfl [vmem:[#allocation1 + $0x30] sm:$0xff pattern:$0x73625140] }
 0x173   :  { %5272 = vmatpush.bf16.msrb.mxu2 %v8145_v34  ;;  %v8168_v34 = vld [vmem:[%s10156_s1 + $0xc50] sm:$0xff] }
 0x174   :  { %5259 = vmatpush.bf16.msrb.mxu1 %v8137_v37  ;;  %v8159_v37 = vld [vmem:[%s10156_s1 + $0xc08] sm:$0xff] }
 0x175   :  { %5285 = vmatpush.bf16.msrb.mxu3 %v8153_v38  ;;  %v8175_v38 = vld [vmem:[%s10156_s1 + $0xc88] sm:$0xff] }
 0x176   :  { %5247 = vmatpush.bf16.msrb.mxu0 %v8128_v42 }
 0x177   :  { %5273 = vmatpush.bf16.msrb.mxu2 %v8144_v43  ;;  %v8158_v43 = vld [vmem:[%s10156_s1 + $0xc00] sm:$0xff] }
 0x178   :  { %5260 = vmatpush.bf16.msrb.mxu1 %v8136_v45  ;;  %v8197_v45 = vld [vmem:[%s10156_s1 + $0xd38] sm:$0xff] }
 0x179   :  { %5286 = vmatpush.bf16.msrb.mxu3 %v8152_v46  ;;  %v1210_v46 = vld.sshfl [vmem:[#allocation1] sm:$0xff pattern:$0x73625140] }
 0x17a   :  { %5248 = vmatpush.bf16.msrb.mxu0 %v8127_v48  ;;  %v8213_v48 = vld [vmem:[%s10156_s1 + $0xdb8] sm:$0xff]  ;;  %v1352_v53 = vpack.c.bf16 %v1210_v46, %v1210_v46 }
 0x17b   :  { %5274 = vmatpush.bf16.msrb.mxu2 %v8143_v49  ;;  %v8166_v49 = vld [vmem:[%s10156_s1 + $0xc40] sm:$0xff] }
 0x17c   :  { %5261 = vmatpush.bf16.msrb.mxu1 %v8135_v51  ;;  %v1211_v51 = vld.sshfl [vmem:[#allocation1 + $0x8] sm:$0xff pattern:$0x73625140] }
 0x17d   :  { %5287 = vmatpush.bf16.msrb.mxu3 %v8151_v52  ;;  %v1213_v52 = vld.sshfl [vmem:[#allocation1 + $0x18] sm:$0xff pattern:$0x73625140]  ;;  %v1353_v57 = vpack.c.bf16 %v1211_v51, %v1211_v51  ;;  %v8252_v51 = vld [vmem:[%s10156_s1 + $0xef0] sm:$0xff] }
 0x17e   :  { %5249 = vmatpush.bf16.msrb.mxu0 %v8126_v54  ;;  %v5043_v14 = vpop.f32.mrf.mxu0  ;;  %v1354_v54 = vpack.c.bf16 %v1212_v47, %v1212_v47  ;;  %v1355_v58 = vpack.c.bf16 %v1213_v52, %v1213_v52  ;;  %v8227_v52 = vld [vmem:[%s10156_s1 + $0xe28] sm:$0xff] }
 0x17f   :  { %5275 = vmatpush.bf16.msrb.mxu2 %v8142_v55  ;;  %v5044_v15 = vadd.f32 %v5043_v14, %v9591_v41  ;;  %v8183_v41 = vld [vmem:[%s10156_s1 + $0xcc8] sm:$0xff]  ;;  %v8205_v55 = vld [vmem:[%s10156_s1 + $0xd78] sm:$0xff] }
 0x180   :  { %5262 = vmatpush.bf16.msrb.mxu1 %v8134_v60  ;;  %v5056_v18 = vpop.f32.mrf.mxu1  ;;  %v8212_v60 = vld [vmem:[%s10156_s1 + $0xdb0] sm:$0xff] }
 0x181   :  { %5288 = vmatpush.bf16.msrb.mxu3 %v8150_v61  ;;  %5250 = vmatmul.bf16.vlgmr.msrb.gmra.mxu0 %v1348_v0  ;;  %v5057_v19 = vadd.f32 %v5056_v18, %v5044_v15  ;;  %v8204_v61 = vld [vmem:[%s10156_s1 + $0xd70] sm:$0xff]  ;;  %v8211_v0 = vld [vmem:[%s10156_s1 + $0xda8] sm:$0xff]  ;;  %v8201_v15 = vld [vmem:[%s10156_s1 + $0xd58] sm:$0xff] }
 0x182   :  { %5294 = vmatpush.bf16.msra.mxu0 %v8165_v56  ;;  %5276 = vmatmul.bf16.vlgmr.msrb.gmra.mxu2 %v1350_v1  ;;  %v8221_v56 = vld [vmem:[%s10156_s1 + $0xdf8] sm:$0xff]  ;;  %v8203_v1 = vld [vmem:[%s10156_s1 + $0xd68] sm:$0xff] }
 0x183   :  { %5320 = vmatpush.bf16.msra.mxu2 %v8181_v59  ;;  %5263 = vmatmul.bf16.vlgmr.msrb.gmra.mxu1 %v1349_v4  ;;  %v8196_v59 = vld [vmem:[%s10156_s1 + $0xd30] sm:$0xff] }
 0x184   :  { %5307 = vmatpush.bf16.msra.mxu1 %v8173_v2  ;;  %5289 = vmatmul.bf16.vlgmr.msrb.gmra.mxu3 %v1351_v5  ;;  %v8219_v2 = vld [vmem:[%s10156_s1 + $0xde8] sm:$0xff]  ;;  %v8194_v5 = vld [vmem:[%s10156_s1 + $0xd20] sm:$0xff] }
 0x185   :  { %5333 = vmatpush.bf16.msra.mxu3 %v8189_v3  ;;  %v5069_v24 = vpop.f32.mrf.mxu2 }
 0x186   :  { %5295 = vmatpush.bf16.msra.mxu0 %v8164_v6  ;;  %v5070_v25 = vadd.f32 %v5069_v24, %v5057_v19  ;;  %v5045_v29 = vpop.f32.mrf.mxu0  ;;  %v8210_v6 = vld [vmem:[%s10156_s1 + $0xda0] sm:$0xff]  ;;  %v8216_v24 = vld [vmem:[%s10156_s1 + $0xdd0] sm:$0xff] }
 0x187   :  { %5321 = vmatpush.bf16.msra.mxu2 %v8180_v7  ;;  %v5082_v28 = vpop.f32.mrf.mxu3  ;;  %v8199_v29 = vld [vmem:[%s10156_s1 + $0xd48] sm:$0xff] }
 0x188   :  { %5308 = vmatpush.bf16.msra.mxu1 %v8172_v8  ;;  %v9693_v30 = vadd.f32 %v5082_v28, %v5070_v25  ;;  %v5058_v33 = vpop.f32.mrf.mxu1  ;;  %v30_v25 = vld [vmem:[%s10155_s0 + $0x70] sm:$0xff] }
 0x189   :  { %5334 = vmatpush.bf16.msra.mxu3 %v8188_v9  ;;  %v8202_v9 = vld [vmem:[%s10156_s1 + $0xd60] sm:$0xff]  ;;  %1218 = vst [vmem:[#allocation1] ss:$4 sm:$0xff] %v30_v25 }
 0x18a   :  { %5296 = vmatpush.bf16.msra.mxu0 %v8163_v10  ;;  %v8218_v10 = vld [vmem:[%s10156_s1 + $0xde0] sm:$0xff] }
 0x18b   :  { %5322 = vmatpush.bf16.msra.mxu2 %v8179_v11  ;;  %v8193_v11 = vld [vmem:[%s10156_s1 + $0xd18] sm:$0xff]  ;;  %v8206_v33 = vld [vmem:[%s10156_s1 + $0xd80] sm:$0xff] }
 0x18c   :  { %5309 = vmatpush.bf16.msra.mxu1 %v8171_v12  ;;  %v8209_v12 = vld [vmem:[%s10156_s1 + $0xd98] sm:$0xff] }
 0x18d   :  { %5335 = vmatpush.bf16.msra.mxu3 %v8187_v13  ;;  %v5071_v39 = vpop.f32.mrf.mxu2 }
 0x18e   :  { %5297 = vmatpush.bf16.msra.mxu0 %v8162_v16  ;;  %v8217_v16 = vld [vmem:[%s10156_s1 + $0xdd8] sm:$0xff]  ;;  %v8214_v39 = vld [vmem:[%s10156_s1 + $0xdc0] sm:$0xff] }
 0x18f   :  { %5323 = vmatpush.bf16.msra.mxu2 %v8178_v17  ;;  %v5084_v42 = vpop.f32.mrf.mxu3 }
 0x190   :  { %5310 = vmatpush.bf16.msra.mxu1 %v8170_v20  ;;  %v8192_v20 = vld [vmem:[%s10156_s1 + $0xd10] sm:$0xff] }
 0x191   :  { %5336 = vmatpush.bf16.msra.mxu3 %v8186_v21  ;;  %v8208_v21 = vld [vmem:[%s10156_s1 + $0xd90] sm:$0xff] }
 0x192   :  { %5298 = vmatpush.bf16.msra.mxu0 %v8161_v22  ;;  %v1222_v25 = vld.sshfl [vmem:[#allocation1 + $0x10] sm:$0xff pattern:$0x73625140] }
 0x193   :  { %5324 = vmatpush.bf16.msra.mxu2 %v8177_v23  ;;  %v8200_v23 = vld [vmem:[%s10156_s1 + $0xd50] sm:$0xff] }
 0x194   :  { %5311 = vmatpush.bf16.msra.mxu1 %v8169_v26  ;;  %v8191_v26 = vld [vmem:[%s10156_s1 + $0xd08] sm:$0xff] }
 0x195   :  { %5337 = vmatpush.bf16.msra.mxu3 %v8185_v27  ;;  %v8207_v27 = vld [vmem:[%s10156_s1 + $0xd88] sm:$0xff] }
 0x196   :  { %5299 = vmatpush.bf16.msra.mxu0 %v8160_v31 }
 0x197   :  { %5325 = vmatpush.bf16.msra.mxu2 %v8176_v32  ;;  %v8190_v32 = vld [vmem:[%s10156_s1 + $0xd00] sm:$0xff] }
 0x198   :  { %5312 = vmatpush.bf16.msra.mxu1 %v8168_v34  ;;  %v8229_v34 = vld [vmem:[%s10156_s1 + $0xe38] sm:$0xff] }
 0x199   :  { %5338 = vmatpush.bf16.msra.mxu3 %v8184_v35  ;;  %v1214_v35 = vld.sshfl [vmem:[#allocation1 + $0x20] sm:$0xff pattern:$0x73625140] }
 0x19a   :  { %5300 = vmatpush.bf16.msra.mxu0 %v8159_v37  ;;  %v8245_v37 = vld [vmem:[%s10156_s1 + $0xeb8] sm:$0xff]  ;;  %v1356_v42 = vpack.c.bf16 %v1214_v35, %v1214_v35 }
 0x19b   :  { %5326 = vmatpush.bf16.msra.mxu2 %v8175_v38  ;;  %v8198_v38 = vld [vmem:[%s10156_s1 + $0xd40] sm:$0xff] }
 0x19c   :  { %5313 = vmatpush.bf16.msra.mxu1 %v8167_v40  ;;  %v1215_v40 = vld.sshfl [vmem:[#allocation1 + $0x28] sm:$0xff pattern:$0x73625140] }
 0x19d   :  { %5339 = vmatpush.bf16.msra.mxu3 %v8183_v41  ;;  %v1217_v41 = vld.sshfl [vmem:[#allocation1 + $0x38] sm:$0xff pattern:$0x73625140]  ;;  %v1357_v46 = vpack.c.bf16 %v1215_v40, %v1215_v40  ;;  %v8284_v40 = vld [vmem:[%s10156_s1 + $0xff0] sm:$0xff] }
 0x19e   :  { %5301 = vmatpush.bf16.msra.mxu0 %v8158_v43  ;;  %v5095_v3 = vpop.f32.mrf.mxu0  ;;  %v1358_v43 = vpack.c.bf16 %v1216_v36, %v1216_v36  ;;  %v1359_v47 = vpack.c.bf16 %v1217_v41, %v1217_v41  ;;  %v8259_v41 = vld [vmem:[%s10156_s1 + $0xf28] sm:$0xff] }
 0x19f   :  { %5327 = vmatpush.bf16.msra.mxu2 %v8174_v44  ;;  %v5096_v4 = vadd.f32 %v5095_v3, %v9693_v30  ;;  %v8215_v30 = vld [vmem:[%s10156_s1 + $0xdc8] sm:$0xff]  ;;  %v8237_v44 = vld [vmem:[%s10156_s1 + $0xe78] sm:$0xff] }
 0x1a0   :  { %5314 = vmatpush.bf16.msra.mxu1 %v8166_v49  ;;  %v5108_v7 = vpop.f32.mrf.mxu1  ;;  %v8244_v49 = vld [vmem:[%s10156_s1 + $0xeb0] sm:$0xff] }
 0x1a1   :  { %5340 = vmatpush.bf16.msra.mxu3 %v8182_v50  ;;  %5302 = vmatmul.bf16.vlgmr.msra.gmra.mxu0 %v1352_v53  ;;  %v5109_v8 = vadd.f32 %v5108_v7, %v5096_v4  ;;  %v8236_v50 = vld [vmem:[%s10156_s1 + $0xe70] sm:$0xff]  ;;  %v8243_v53 = vld [vmem:[%s10156_s1 + $0xea8] sm:$0xff]  ;;  %v8233_v4 = vld [vmem:[%s10156_s1 + $0xe58] sm:$0xff] }
 0x1a2   :  { %5346 = vmatpush.bf16.msrb.mxu0 %v8197_v45  ;;  %5328 = vmatmul.bf16.vlgmr.msra.gmra.mxu2 %v1354_v54  ;;  %v8253_v45 = vld [vmem:[%s10156_s1 + $0xef8] sm:$0xff]  ;;  %v8235_v54 = vld [vmem:[%s10156_s1 + $0xe68] sm:$0xff] }
 0x1a3   :  { %5372 = vmatpush.bf16.msrb.mxu2 %v8213_v48  ;;  %5315 = vmatmul.bf16.vlgmr.msra.gmra.mxu1 %v1353_v57  ;;  %v8228_v48 = vld [vmem:[%s10156_s1 + $0xe30] sm:$0xff] }
 0x1a4   :  { %5359 = vmatpush.bf16.msrb.mxu1 %v8205_v55  ;;  %5341 = vmatmul.bf16.vlgmr.msra.gmra.mxu3 %v1355_v58  ;;  %v8251_v55 = vld [vmem:[%s10156_s1 + $0xee8] sm:$0xff]  ;;  %v8226_v58 = vld [vmem:[%s10156_s1 + $0xe20] sm:$0xff] }
 0x1a5   :  { %5385 = vmatpush.bf16.msrb.mxu3 %v8221_v56  ;;  %v5121_v13 = vpop.f32.mrf.mxu2 }
 0x1a6   :  { %5347 = vmatpush.bf16.msrb.mxu0 %v8196_v59  ;;  %v5122_v14 = vadd.f32 %v5121_v13, %v5109_v8  ;;  %v5097_v18 = vpop.f32.mrf.mxu0  ;;  %v8242_v59 = vld [vmem:[%s10156_s1 + $0xea0] sm:$0xff]  ;;  %v8248_v13 = vld [vmem:[%s10156_s1 + $0xed0] sm:$0xff] }
 0x1a7   :  { %5373 = vmatpush.bf16.msrb.mxu2 %v8212_v60  ;;  %v5134_v17 = vpop.f32.mrf.mxu3  ;;  %v8231_v18 = vld [vmem:[%s10156_s1 + $0xe48] sm:$0xff] }
 0x1a8   :  { %5360 = vmatpush.bf16.msrb.mxu1 %v8204_v61  ;;  %v9795_v19 = vadd.f32 %v5134_v17, %v5122_v14  ;;  %v5110_v22 = vpop.f32.mrf.mxu1  ;;  %v31_v14 = vld [vmem:[%s10155_s0 + $0x78] sm:$0xff] }
 0x1a9   :  { %5386 = vmatpush.bf16.msrb.mxu3 %v8220_v62  ;;  %v8234_v62 = vld [vmem:[%s10156_s1 + $0xe60] sm:$0xff]  ;;  %1219 = vst [vmem:[#allocation1 + $0x20] ss:$4 sm:$0xff] %v31_v14 }
 0x1aa   :  { %5348 = vmatpush.bf16.msrb.mxu0 %v8195_v63  ;;  %v8250_v63 = vld [vmem:[%s10156_s1 + $0xee0] sm:$0xff] }
 0x1ab   :  { %5374 = vmatpush.bf16.msrb.mxu2 %v8211_v0  ;;  %v8225_v0 = vld [vmem:[%s10156_s1 + $0xe18] sm:$0xff]  ;;  %v8238_v22 = vld [vmem:[%s10156_s1 + $0xe80] sm:$0xff] }
 0x1ac   :  { %5361 = vmatpush.bf16.msrb.mxu1 %v8203_v1  ;;  %v8241_v1 = vld [vmem:[%s10156_s1 + $0xe98] sm:$0xff] }
 0x1ad   :  { %5387 = vmatpush.bf16.msrb.mxu3 %v8219_v2  ;;  %v5123_v28 = vpop.f32.mrf.mxu2 }
 0x1ae   :  { %5349 = vmatpush.bf16.msrb.mxu0 %v8194_v5  ;;  %v8249_v5 = vld [vmem:[%s10156_s1 + $0xed8] sm:$0xff]  ;;  %v8246_v28 = vld [vmem:[%s10156_s1 + $0xec0] sm:$0xff] }
 0x1af   :  { %5375 = vmatpush.bf16.msrb.mxu2 %v8210_v6  ;;  %v5136_v31 = vpop.f32.mrf.mxu3 }
 0x1b0   :  { %5362 = vmatpush.bf16.msrb.mxu1 %v8202_v9  ;;  %v8224_v9 = vld [vmem:[%s10156_s1 + $0xe10] sm:$0xff] }
 0x1b1   :  { %5388 = vmatpush.bf16.msrb.mxu3 %v8218_v10  ;;  %v8240_v10 = vld [vmem:[%s10156_s1 + $0xe90] sm:$0xff] }
 0x1b2   :  { %5350 = vmatpush.bf16.msrb.mxu0 %v8193_v11  ;;  %v1226_v14 = vld.sshfl [vmem:[#allocation1 + $0x30] sm:$0xff pattern:$0x73625140] }
 0x1b3   :  { %5376 = vmatpush.bf16.msrb.mxu2 %v8209_v12  ;;  %v8232_v12 = vld [vmem:[%s10156_s1 + $0xe50] sm:$0xff] }
 0x1b4   :  { %5363 = vmatpush.bf16.msrb.mxu1 %v8201_v15  ;;  %v8223_v15 = vld [vmem:[%s10156_s1 + $0xe08] sm:$0xff] }
 0x1b5   :  { %5389 = vmatpush.bf16.msrb.mxu3 %v8217_v16  ;;  %v8239_v16 = vld [vmem:[%s10156_s1 + $0xe88] sm:$0xff] }
 0x1b6   :  { %5351 = vmatpush.bf16.msrb.mxu0 %v8192_v20 }
 0x1b7   :  { %5377 = vmatpush.bf16.msrb.mxu2 %v8208_v21  ;;  %v8222_v21 = vld [vmem:[%s10156_s1 + $0xe00] sm:$0xff] }
 0x1b8   :  { %5364 = vmatpush.bf16.msrb.mxu1 %v8200_v23  ;;  %v8261_v23 = vld [vmem:[%s10156_s1 + $0xf38] sm:$0xff] }
 0x1b9   :  { %5390 = vmatpush.bf16.msrb.mxu3 %v8216_v24  ;;  %v1220_v24 = vld.sshfl [vmem:[#allocation1] sm:$0xff pattern:$0x73625140] }
 0x1ba   :  { %5352 = vmatpush.bf16.msrb.mxu0 %v8191_v26  ;;  %v8277_v26 = vld [vmem:[%s10156_s1 + $0xfb8] sm:$0xff]  ;;  %v1360_v31 = vpack.c.bf16 %v1220_v24, %v1220_v24 }
 0x1bb   :  { %5378 = vmatpush.bf16.msrb.mxu2 %v8207_v27  ;;  %v8230_v27 = vld [vmem:[%s10156_s1 + $0xe40] sm:$0xff] }
 0x1bc   :  { %5365 = vmatpush.bf16.msrb.mxu1 %v8199_v29  ;;  %v1221_v29 = vld.sshfl [vmem:[#allocation1 + $0x8] sm:$0xff pattern:$0x73625140] }
 0x1bd   :  { %5391 = vmatpush.bf16.msrb.mxu3 %v8215_v30  ;;  %v1223_v30 = vld.sshfl [vmem:[#allocation1 + $0x18] sm:$0xff pattern:$0x73625140]  ;;  %v1361_v35 = vpack.c.bf16 %v1221_v29, %v1221_v29  ;;  %v8316_v29 = vld [vmem:[%s10156_s1 + $0x10f0] sm:$0xff] }
 0x1be   :  { %5353 = vmatpush.bf16.msrb.mxu0 %v8190_v32  ;;  %v5147_v56 = vpop.f32.mrf.mxu0  ;;  %v1362_v32 = vpack.c.bf16 %v1222_v25, %v1222_v25  ;;  %v1363_v36 = vpack.c.bf16 %v1223_v30, %v1223_v30  ;;  %v8291_v30 = vld [vmem:[%s10156_s1 + $0x1028] sm:$0xff] }
 0x1bf   :  { %5379 = vmatpush.bf16.msrb.mxu2 %v8206_v33  ;;  %v5148_v57 = vadd.f32 %v5147_v56, %v9795_v19  ;;  %v8247_v19 = vld [vmem:[%s10156_s1 + $0xec8] sm:$0xff]  ;;  %v8269_v33 = vld [vmem:[%s10156_s1 + $0xf78] sm:$0xff] }
 0x1c0   :  { %5366 = vmatpush.bf16.msrb.mxu1 %v8198_v38  ;;  %v5160_v60 = vpop.f32.mrf.mxu1  ;;  %v8276_v38 = vld [vmem:[%s10156_s1 + $0xfb0] sm:$0xff] }
 0x1c1   :  { %5392 = vmatpush.bf16.msrb.mxu3 %v8214_v39  ;;  %5354 = vmatmul.bf16.vlgmr.msrb.gmra.mxu0 %v1356_v42  ;;  %v5161_v61 = vadd.f32 %v5160_v60, %v5148_v57  ;;  %v8268_v39 = vld [vmem:[%s10156_s1 + $0xf70] sm:$0xff]  ;;  %v8275_v42 = vld [vmem:[%s10156_s1 + $0xfa8] sm:$0xff]  ;;  %v8265_v57 = vld [vmem:[%s10156_s1 + $0xf58] sm:$0xff] }
 0x1c2   :  { %5398 = vmatpush.bf16.msra.mxu0 %v8229_v34  ;;  %5380 = vmatmul.bf16.vlgmr.msrb.gmra.mxu2 %v1358_v43  ;;  %v8285_v34 = vld [vmem:[%s10156_s1 + $0xff8] sm:$0xff]  ;;  %v8267_v43 = vld [vmem:[%s10156_s1 + $0xf68] sm:$0xff] }
 0x1c3   :  { %5424 = vmatpush.bf16.msra.mxu2 %v8245_v37  ;;  %5367 = vmatmul.bf16.vlgmr.msrb.gmra.mxu1 %v1357_v46  ;;  %v8260_v37 = vld [vmem:[%s10156_s1 + $0xf30] sm:$0xff] }
 0x1c4   :  { %5411 = vmatpush.bf16.msra.mxu1 %v8237_v44  ;;  %5393 = vmatmul.bf16.vlgmr.msrb.gmra.mxu3 %v1359_v47  ;;  %v8283_v44 = vld [vmem:[%s10156_s1 + $0xfe8] sm:$0xff]  ;;  %v8258_v47 = vld [vmem:[%s10156_s1 + $0xf20] sm:$0xff] }
 0x1c5   :  { %5437 = vmatpush.bf16.msra.mxu3 %v8253_v45  ;;  %v5173_v2 = vpop.f32.mrf.mxu2 }
 0x1c6   :  { %5399 = vmatpush.bf16.msra.mxu0 %v8228_v48  ;;  %v5174_v3 = vadd.f32 %v5173_v2, %v5161_v61  ;;  %v5149_v7 = vpop.f32.mrf.mxu0  ;;  %v8274_v48 = vld [vmem:[%s10156_s1 + $0xfa0] sm:$0xff]  ;;  %v8280_v2 = vld [vmem:[%s10156_s1 + $0xfd0] sm:$0xff] }
 0x1c7   :  { %5425 = vmatpush.bf16.msra.mxu2 %v8244_v49  ;;  %v5186_v6 = vpop.f32.mrf.mxu3  ;;  %v8263_v7 = vld [vmem:[%s10156_s1 + $0xf48] sm:$0xff] }
 0x1c8   :  { %5412 = vmatpush.bf16.msra.mxu1 %v8236_v50  ;;  %v9897_v8 = vadd.f32 %v5186_v6, %v5174_v3  ;;  %v5162_v11 = vpop.f32.mrf.mxu1  ;;  %v32_v3 = vld [vmem:[%s10155_s0 + $0x80] sm:$0xff] }
 0x1c9   :  { %5438 = vmatpush.bf16.msra.mxu3 %v8252_v51  ;;  %v8266_v51 = vld [vmem:[%s10156_s1 + $0xf60] sm:$0xff]  ;;  %1228 = vst [vmem:[#allocation1] ss:$4 sm:$0xff] %v32_v3 }
 0x1ca   :  { %5400 = vmatpush.bf16.msra.mxu0 %v8227_v52  ;;  %v8282_v52 = vld [vmem:[%s10156_s1 + $0xfe0] sm:$0xff] }
 0x1cb   :  { %5426 = vmatpush.bf16.msra.mxu2 %v8243_v53  ;;  %v8257_v53 = vld [vmem:[%s10156_s1 + $0xf18] sm:$0xff]  ;;  %v8270_v11 = vld [vmem:[%s10156_s1 + $0xf80] sm:$0xff] }
 0x1cc   :  { %5413 = vmatpush.bf16.msra.mxu1 %v8235_v54  ;;  %v8273_v54 = vld [vmem:[%s10156_s1 + $0xf98] sm:$0xff]  ;;  %v8302_v3 = vld [vmem:[%s10156_s1 + $0x1080] sm:$0xff] }
 0x1cd   :  { %5439 = vmatpush.bf16.msra.mxu3 %v8251_v55  ;;  %v5175_v17 = vpop.f32.mrf.mxu2 }
 0x1ce   :  { %5401 = vmatpush.bf16.msra.mxu0 %v8226_v58  ;;  %v8281_v58 = vld [vmem:[%s10156_s1 + $0xfd8] sm:$0xff]  ;;  %v8278_v17 = vld [vmem:[%s10156_s1 + $0xfc0] sm:$0xff] }
 0x1cf   :  { %5427 = vmatpush.bf16.msra.mxu2 %v8242_v59  ;;  %v5188_v20 = vpop.f32.mrf.mxu3 }
 0x1d0   :  { %5414 = vmatpush.bf16.msra.mxu1 %v8234_v62  ;;  %v8256_v62 = vld [vmem:[%s10156_s1 + $0xf10] sm:$0xff] }
 0x1d1   :  { %5440 = vmatpush.bf16.msra.mxu3 %v8250_v63  ;;  %v8272_v63 = vld [vmem:[%s10156_s1 + $0xf90] sm:$0xff] }
 0x1d2   :  { %5402 = vmatpush.bf16.msra.mxu0 %v8225_v0 }
 0x1d3   :  { %5428 = vmatpush.bf16.msra.mxu2 %v8241_v1  ;;  %v8264_v1 = vld [vmem:[%s10156_s1 + $0xf50] sm:$0xff] }
 0x1d4   :  { %5415 = vmatpush.bf16.msra.mxu1 %v8233_v4  ;;  %v8255_v4 = vld [vmem:[%s10156_s1 + $0xf08] sm:$0xff] }
 0x1d5   :  { %5441 = vmatpush.bf16.msra.mxu3 %v8249_v5  ;;  %v8271_v5 = vld [vmem:[%s10156_s1 + $0xf88] sm:$0xff] }
 0x1d6   :  { %5403 = vmatpush.bf16.msra.mxu0 %v8224_v9 }
 0x1d7   :  { %5429 = vmatpush.bf16.msra.mxu2 %v8240_v10  ;;  %v8254_v10 = vld [vmem:[%s10156_s1 + $0xf00] sm:$0xff] }
 0x1d8   :  { %5416 = vmatpush.bf16.msra.mxu1 %v8232_v12  ;;  %v8293_v12 = vld [vmem:[%s10156_s1 + $0x1038] sm:$0xff] }
 0x1d9   :  { %5442 = vmatpush.bf16.msra.mxu3 %v8248_v13  ;;  %v1224_v13 = vld.sshfl [vmem:[#allocation1 + $0x20] sm:$0xff pattern:$0x73625140] }
 0x1da   :  { %5404 = vmatpush.bf16.msra.mxu0 %v8223_v15  ;;  %v8309_v15 = vld [vmem:[%s10156_s1 + $0x10b8] sm:$0xff]  ;;  %v1364_v20 = vpack.c.bf16 %v1224_v13, %v1224_v13 }
 0x1db   :  { %5430 = vmatpush.bf16.msra.mxu2 %v8239_v16  ;;  %v8262_v16 = vld [vmem:[%s10156_s1 + $0xf40] sm:$0xff] }
 0x1dc   :  { %5417 = vmatpush.bf16.msra.mxu1 %v8231_v18  ;;  %v1225_v18 = vld.sshfl [vmem:[#allocation1 + $0x28] sm:$0xff pattern:$0x73625140] }
 0x1dd   :  { %5443 = vmatpush.bf16.msra.mxu3 %v8247_v19  ;;  %v1227_v19 = vld.sshfl [vmem:[#allocation1 + $0x38] sm:$0xff pattern:$0x73625140]  ;;  %v1365_v24 = vpack.c.bf16 %v1225_v18, %v1225_v18 }
 0x1de   :  { %5405 = vmatpush.bf16.msra.mxu0 %v8222_v21  ;;  %v5199_v45 = vpop.f32.mrf.mxu0  ;;  %v1366_v21 = vpack.c.bf16 %v1226_v14, %v1226_v14  ;;  %v1367_v25 = vpack.c.bf16 %v1227_v19, %v1227_v19 }
 0x1df   :  { %5431 = vmatpush.bf16.msra.mxu2 %v8238_v22  ;;  %v5200_v46 = vadd.f32 %v5199_v45, %v9897_v8  ;;  %v8279_v8 = vld [vmem:[%s10156_s1 + $0xfc8] sm:$0xff]  ;;  %v8301_v22 = vld [vmem:[%s10156_s1 + $0x1078] sm:$0xff] }
 0x1e0   :  { %5418 = vmatpush.bf16.msra.mxu1 %v8230_v27  ;;  %v5212_v49 = vpop.f32.mrf.mxu1  ;;  %v8308_v27 = vld [vmem:[%s10156_s1 + $0x10b0] sm:$0xff] }
 0x1e1   :  { %5444 = vmatpush.bf16.msra.mxu3 %v8246_v28  ;;  %5406 = vmatmul.bf16.vlgmr.msra.gmra.mxu0 %v1360_v31  ;;  %v5213_v50 = vadd.f32 %v5212_v49, %v5200_v46  ;;  %v8300_v28 = vld [vmem:[%s10156_s1 + $0x1070] sm:$0xff]  ;;  %v8307_v31 = vld [vmem:[%s10156_s1 + $0x10a8] sm:$0xff] }
 0x1e2   :  { %5450 = vmatpush.bf16.msrb.mxu0 %v8261_v23  ;;  %5432 = vmatmul.bf16.vlgmr.msra.gmra.mxu2 %v1362_v32  ;;  %v8317_v23 = vld [vmem:[%s10156_s1 + $0x10f8] sm:$0xff]  ;;  %v33_v32 = vld [vmem:[%s10155_s0 + $0x88] sm:$0x3] }
 0x1e3   :  { %5476 = vmatpush.bf16.msrb.mxu2 %v8277_v26  ;;  %5419 = vmatmul.bf16.vlgmr.msra.gmra.mxu1 %v1361_v35  ;;  %v8292_v26 = vld [vmem:[%s10156_s1 + $0x1030] sm:$0xff]  ;;  %1229 = vst [vmem:[#allocation1 + $0x20] ss:$4 sm:$0xff] %v33_v32 }
 0x1e4   :  { %5463 = vmatpush.bf16.msrb.mxu1 %v8269_v33  ;;  %5445 = vmatmul.bf16.vlgmr.msra.gmra.mxu3 %v1363_v36  ;;  %v8299_v33 = vld [vmem:[%s10156_s1 + $0x1068] sm:$0xff] }
 0x1e5   :  { %5489 = vmatpush.bf16.msrb.mxu3 %v8285_v34  ;;  %v5225_v55 = vpop.f32.mrf.mxu2  ;;  %v8315_v34 = vld [vmem:[%s10156_s1 + $0x10e8] sm:$0xff] }
 0x1e6   :  { %5451 = vmatpush.bf16.msrb.mxu0 %v8260_v37  ;;  %v5226_v56 = vadd.f32 %v5225_v55, %v5213_v50  ;;  %v5201_v60 = vpop.f32.mrf.mxu0  ;;  %v8290_v37 = vld [vmem:[%s10156_s1 + $0x1020] sm:$0xff] }
 0x1e7   :  { %5477 = vmatpush.bf16.msrb.mxu2 %v8276_v38  ;;  %v5238_v59 = vpop.f32.mrf.mxu3  ;;  %v8306_v38 = vld [vmem:[%s10156_s1 + $0x10a0] sm:$0xff]  ;;  %v8303_v60 = vld [vmem:[%s10156_s1 + $0x1088] sm:$0xff] }
 0x1e8   :  { %5464 = vmatpush.bf16.msrb.mxu1 %v8268_v39  ;;  %v9999_v61 = vadd.f32 %v5238_v59, %v5226_v56  ;;  %v5214_v0 = vpop.f32.mrf.mxu1  ;;  %v8296_v56 = vld [vmem:[%s10156_s1 + $0x1050] sm:$0xff]  ;;  %v8287_v59 = vld [vmem:[%s10156_s1 + $0x1008] sm:$0xff] }
 0x1e9   :  { %5490 = vmatpush.bf16.msrb.mxu3 %v8284_v40 }
 0x1ea   :  { %5452 = vmatpush.bf16.msrb.mxu0 %v8259_v41  ;;  %v8298_v41 = vld [vmem:[%s10156_s1 + $0x1060] sm:$0xff] }
 0x1eb   :  { %5478 = vmatpush.bf16.msrb.mxu2 %v8275_v42  ;;  %v8314_v42 = vld [vmem:[%s10156_s1 + $0x10e0] sm:$0xff] }
 0x1ec   :  { %5465 = vmatpush.bf16.msrb.mxu1 %v8267_v43  ;;  %v8289_v43 = vld [vmem:[%s10156_s1 + $0x1018] sm:$0xff] }
 0x1ed   :  { %5491 = vmatpush.bf16.msrb.mxu3 %v8283_v44  ;;  %v5227_v6 = vpop.f32.mrf.mxu2  ;;  %v8305_v44 = vld [vmem:[%s10156_s1 + $0x1098] sm:$0xff] }
 0x1ee   :  { %5453 = vmatpush.bf16.msrb.mxu0 %v8258_v47  ;;  %v8297_v47 = vld [vmem:[%s10156_s1 + $0x1058] sm:$0xff]  ;;  %v1231_v6 = vld.sshfl [vmem:[#allocation1 + $0x8] sm:$0xff pattern:$0x73625140] }
 0x1ef   :  { %5479 = vmatpush.bf16.msrb.mxu2 %v8274_v48  ;;  %v5240_v9 = vpop.f32.mrf.mxu3  ;;  %v8313_v48 = vld [vmem:[%s10156_s1 + $0x10d8] sm:$0xff]  ;;  %v1369_v13 = vpack.c.bf16 %v1231_v6, %v1231_v6 }
 0x1f0   :  { %5466 = vmatpush.bf16.msrb.mxu1 %v8266_v51 }
 0x1f1   :  { %5492 = vmatpush.bf16.msrb.mxu3 %v8282_v52  ;;  %v1128_v52 = vld [vmem:[%s10156_s1 + $0x1118] sm:$0x3] }
 0x1f2   :  { %5454 = vmatpush.bf16.msrb.mxu0 %v8257_v53  ;;  %v8288_v53 = vld [vmem:[%s10156_s1 + $0x1010] sm:$0xff] }
 0x1f3   :  { %5480 = vmatpush.bf16.msrb.mxu2 %v8273_v54  ;;  %v8304_v54 = vld [vmem:[%s10156_s1 + $0x1090] sm:$0xff] }
 0x1f4   :  { %5467 = vmatpush.bf16.msrb.mxu1 %v8265_v57  ;;  %v8312_v57 = vld [vmem:[%s10156_s1 + $0x10d0] sm:$0xff] }
 0x1f5   :  { %5493 = vmatpush.bf16.msrb.mxu3 %v8281_v58  ;;  %v3566_v58 = vunpack.c.l.b16 %v1128_v52 }
 0x1f6   :  { %5455 = vmatpush.bf16.msrb.mxu0 %v8256_v62  ;;  %v8295_v62 = vld [vmem:[%s10156_s1 + $0x1048] sm:$0xff] }
 0x1f7   :  { %5481 = vmatpush.bf16.msrb.mxu2 %v8272_v63  ;;  %v8311_v63 = vld [vmem:[%s10156_s1 + $0x10c8] sm:$0xff]  ;;  %v4114_v0 = vpack.c.b16 %v3566_v58, %v3566_v58 }
 0x1f8   :  { %5468 = vmatpush.bf16.msrb.mxu1 %v8264_v1 }
 0x1f9   :  { %5494 = vmatpush.bf16.msrb.mxu3 %v8280_v2  ;;  %v8286_v2 = vld [vmem:[%s10156_s1 + $0x1000] sm:$0xff]  ;;  %v4668_v9 = vsel %vm4666_vm0, %v4114_v0, 0 }
 0x1fa   :  { %5456 = vmatpush.bf16.msrb.mxu0 %v8255_v4  ;;  %v1230_v4 = vld.sshfl [vmem:[#allocation1] sm:$0xff pattern:$0x73625140] }
 0x1fb   :  { %5482 = vmatpush.bf16.msrb.mxu2 %v8271_v5  ;;  %v1232_v5 = vld.sshfl [vmem:[#allocation1 + $0x10] sm:$0xff pattern:$0x73625140] }
 0x1fc   :  { %5469 = vmatpush.bf16.msrb.mxu1 %v8263_v7  ;;  %v8294_v7 = vld [vmem:[%s10156_s1 + $0x1040] sm:$0xff] }
 0x1fd   :  { %5495 = vmatpush.bf16.msrb.mxu3 %v8279_v8  ;;  %v8310_v8 = vld [vmem:[%s10156_s1 + $0x10c0] sm:$0xff] }
 0x1fe   :  { %5457 = vmatpush.bf16.msrb.mxu0 %v8254_v10  ;;  %v5251_v35 = vpop.f32.mrf.mxu0  ;;  %v1233_v10 = vld.sshfl [vmem:[#allocation1 + $0x18] sm:$0xff pattern:$0x73625140] }
 0x1ff   :  { %5483 = vmatpush.bf16.msrb.mxu2 %v8270_v11  ;;  %v5252_v36 = vadd.f32 %v5251_v35, %v9999_v61  ;;  %v1368_v11 = vpack.c.bf16 %v1230_v4, %v1230_v4  ;;  %v1371_v14 = vpack.c.bf16 %v1233_v10, %v1233_v10 }
 0x200   :  { %5470 = vmatpush.bf16.msrb.mxu1 %v8262_v16  ;;  %v5264_v39 = vpop.f32.mrf.mxu1  ;;  %v8319_v16 = vld [vmem:[%s10156_s1 + $0x1108] sm:$0xff] }
 0x201   :  { %5496 = vmatpush.bf16.msrb.mxu3 %v8278_v17  ;;  %5458 = vmatmul.bf16.vlgmr.msrb.gmra.mxu0 %v1364_v20  ;;  %v5265_v40 = vadd.f32 %v5264_v39, %v5252_v36  ;;  %v8318_v20 = vld [vmem:[%s10156_s1 + $0x1100] sm:$0xff] }
 0x202   :  { %5502 = vmatpush.bf16.msra.mxu0 %v8293_v12  ;;  %5484 = vmatmul.bf16.vlgmr.msrb.gmra.mxu2 %v1366_v21  ;;  %v1370_v12 = vpack.c.bf16 %v1232_v5, %v1232_v5 }
 0x203   :  { %5528 = vmatpush.bf16.msra.mxu2 %v8309_v15  ;;  %5471 = vmatmul.bf16.vlgmr.msrb.gmra.mxu1 %v1365_v24  ;;  %v8320_v15 = vld [vmem:[%s10156_s1 + $0x1110] sm:$0xff]  ;;  %s8349_s1 = smov [#allocation2]  }
 0x204   :  { %5515 = vmatpush.bf16.msra.mxu1 %v8301_v22  ;;  %5497 = vmatmul.bf16.vlgmr.msrb.gmra.mxu3 %v1367_v25  ;;  %v1234_v22 = vld.sshfl [vmem:[#allocation1 + $0x20] sm:$0xff pattern:$0x73625140]  ;;  %s5574_s9 = sshll.u32 %s8349_s1, 4  ;;  %s5575_s9 = int_to_ptr.vmem [resolvable:$true] %s5574_s9 }
 0x205   :  { %5541 = vmatpush.bf16.msra.mxu3 %v8317_v23  ;;  %v5277_v45 = vpop.f32.mrf.mxu2  ;;  %v1372_v25 = vpack.c.bf16 %v1234_v22, %v1234_v22 }
 0x206   :  { %5503 = vmatpush.bf16.msra.mxu0 %v8292_v26  ;;  %v5278_v46 = vadd.f32 %v5277_v45, %v5265_v40  ;;  %v5253_v50 = vpop.f32.mrf.mxu0 }
 0x207   :  { %5529 = vmatpush.bf16.msra.mxu2 %v8308_v27  ;;  %v5290_v49 = vpop.f32.mrf.mxu3 }
 0x208   :  { %5516 = vmatpush.bf16.msra.mxu1 %v8300_v28  ;;  %v5291_v51 = vadd.f32 %v5290_v49, %v5278_v46  ;;  %v5266_v55 = vpop.f32.mrf.mxu1 }
 0x209   :  { %5542 = vmatpush.bf16.msra.mxu3 %v8316_v29 }
 0x20a   :  { %5504 = vmatpush.bf16.msra.mxu0 %v8291_v30 }
 0x20b   :  { %5530 = vmatpush.bf16.msra.mxu2 %v8307_v31 }
 0x20c   :  { %5517 = vmatpush.bf16.msra.mxu1 %v8299_v33 }
 0x20d   :  { %5543 = vmatpush.bf16.msra.mxu3 %v8315_v34  ;;  %v5279_v61 = vpop.f32.mrf.mxu2 }
 0x20e   :  { %5505 = vmatpush.bf16.msra.mxu0 %v8290_v37 }
 0x20f   :  { %5531 = vmatpush.bf16.msra.mxu2 %v8306_v38  ;;  %v5292_v1 = vpop.f32.mrf.mxu3 }
 0x210   :  { %5518 = vmatpush.bf16.msra.mxu1 %v8298_v41 }
 0x211   :  { %5544 = vmatpush.bf16.msra.mxu3 %v8314_v42 }
 0x212   :  { %5506 = vmatpush.bf16.msra.mxu0 %v8289_v43 }
 0x213   :  { %5532 = vmatpush.bf16.msra.mxu2 %v8305_v44 }
 0x214   :  { %5519 = vmatpush.bf16.msra.mxu1 %v8297_v47 }
 0x215   :  { %5545 = vmatpush.bf16.msra.mxu3 %v8313_v48 }
 0x216   :  { %5507 = vmatpush.bf16.msra.mxu0 %v8288_v53 }
 0x217   :  { %5533 = vmatpush.bf16.msra.mxu2 %v8304_v54 }
 0x218   :  { %5520 = vmatpush.bf16.msra.mxu1 %v8296_v56 }
 0x219   :  { %5546 = vmatpush.bf16.msra.mxu3 %v8312_v57 }
 0x21a   :  { %5508 = vmatpush.bf16.msra.mxu0 %v8287_v59 }
 0x21b   :  { %5534 = vmatpush.bf16.msra.mxu2 %v8303_v60 }
 0x21c   :  { %5521 = vmatpush.bf16.msra.mxu1 %v8295_v62 }
 0x21d   :  { %5547 = vmatpush.bf16.msra.mxu3 %v8311_v63 }
 0x21e   :  { %5509 = vmatpush.bf16.msra.mxu0 %v8286_v2  ;;  %v5303_v17 = vpop.f32.mrf.mxu0 }
 0x21f   :  { %5535 = vmatpush.bf16.msra.mxu2 %v8302_v3  ;;  %v5304_v18 = vadd.f32 %v5303_v17, %v5291_v51 }
 0x220   :  { %5522 = vmatpush.bf16.msra.mxu1 %v8294_v7  ;;  %v5316_v19 = vpop.f32.mrf.mxu1 }
 0x221   :  { %5548 = vmatpush.bf16.msra.mxu3 %v8310_v8  ;;  %5510 = vmatmul.bf16.vlgmr.msra.gmra.mxu0 %v1368_v11  ;;  %v5317_v21 = vadd.f32 %v5316_v19, %v5304_v18 }
 0x222   :  { %5558 = vmatpush.bf16.msrb.mxu0 %v4668_v9  ;;  %5536 = vmatmul.bf16.vlgmr.msra.gmra.mxu2 %v1370_v12 }
 0x223   :  { %5523 = vmatmul.bf16.vlgmr.msra.gmra.mxu1 %v1369_v13 }
 0x224   :  { %5549 = vmatmul.bf16.vlgmr.msra.gmra.mxu3 %v1371_v14 }
 0x225   :  { %v5329_v23 = vpop.f32.mrf.mxu2 }
 0x226   :  { %5559 = vmatpush.bf16.msrb.mxu0 %v8320_v15  ;;  %v5330_v24 = vadd.f32 %v5329_v23, %v5317_v21  ;;  %v5305_v27 = vpop.f32.mrf.mxu0 }
 0x227   :  { %v5342_v26 = vpop.f32.mrf.mxu3 }
 0x228   :  { %v5343_v28 = vadd.f32 %v5342_v26, %v5330_v24  ;;  %v5318_v29 = vpop.f32.mrf.mxu1 }
 0x22a   :  { %5560 = vmatpush.bf16.msrb.mxu0 %v8319_v16 }
 0x22d   :  { %v5331_v30 = vpop.f32.mrf.mxu2 }
 0x22e   :  { %5561 = vmatpush.bf16.msrb.mxu0 %v8318_v20 }
 0x22f   :  { %v5344_v31 = vpop.f32.mrf.mxu3 }
 0x231   :  { %7773 = vmatmul.msk.bf16.vlgmr.msrb.gmra.mxu0 %vm4662_vm1, %v1372_v25 }
 0x23e   :  { %v5355_v32 = vpop.f32.mrf.mxu0 }
 0x23f   :  { %v5356_v33 = vadd.f32 %v5355_v32, %v5343_v28 }
 0x240   :  { %v5368_v34 = vpop.f32.mrf.mxu1 }
 0x241   :  { %v5369_v35 = vadd.f32 %v5368_v34, %v5356_v33 }
 0x245   :  { %v5381_v36 = vpop.f32.mrf.mxu2 }
 0x246   :  { %v5382_v37 = vadd.f32 %v5381_v36, %v5369_v35  ;;  %v5357_v39 = vpop.f32.mrf.mxu0 }
 0x247   :  { %v5394_v38 = vpop.f32.mrf.mxu3 }
 0x248   :  { %v5395_v40 = vadd.f32 %v5394_v38, %v5382_v37  ;;  %v5370_v41 = vpop.f32.mrf.mxu1 }
 0x24d   :  { %v5383_v42 = vpop.f32.mrf.mxu2 }
 0x24f   :  { %v5396_v43 = vpop.f32.mrf.mxu3 }
 0x25e   :  { %v5407_v44 = vpop.f32.mrf.mxu0 }
 0x25f   :  { %v5408_v58 = vadd.f32 %v5407_v44, %v5395_v40 }
 0x260   :  { %v5420_v45 = vpop.f32.mrf.mxu1 }
 0x261   :  { %v5421_v60 = vadd.f32 %v5420_v45, %v5408_v58 }
 0x265   :  { %v5433_v46 = vpop.f32.mrf.mxu2 }
 0x266   :  { %v5409_v48 = vpop.f32.mrf.mxu0  ;;  %v5434_v62 = vadd.f32 %v5433_v46, %v5421_v60 }
 0x267   :  { %v5446_v47 = vpop.f32.mrf.mxu3 }
 0x268   :  { %v5422_v49 = vpop.f32.mrf.mxu1  ;;  %v5447_v63 = vadd.f32 %v5446_v47, %v5434_v62 }
 0x26d   :  { %v5435_v50 = vpop.f32.mrf.mxu2 }
 0x26f   :  { %v5448_v51 = vpop.f32.mrf.mxu3 }
 0x27e   :  { %v5459_v52 = vpop.f32.mrf.mxu0 }
 0x27f   :  { %v5460_v0 = vadd.f32 %v5459_v52, %v5447_v63 }
 0x280   :  { %v5472_v53 = vpop.f32.mrf.mxu1 }
 0x281   :  { %v5473_v1 = vadd.f32 %v5472_v53, %v5460_v0 }
 0x285   :  { %v5485_v54 = vpop.f32.mrf.mxu2 }
 0x286   :  { %v5461_v56 = vpop.f32.mrf.mxu0  ;;  %v5486_v2 = vadd.f32 %v5485_v54, %v5473_v1 }
 0x287   :  { %v5498_v55 = vpop.f32.mrf.mxu3 }
 0x288   :  { %v5474_v57 = vpop.f32.mrf.mxu1  ;;  %v5499_v5 = vadd.f32 %v5498_v55, %v5486_v2 }
 0x28d   :  { %v5487_v59 = vpop.f32.mrf.mxu2 }
 0x28f   :  { %v5500_v61 = vpop.f32.mrf.mxu3 }
 0x29e   :  { %v5511_v3 = vpop.f32.mrf.mxu0 }
 0x29f   :  { %v5512_v6 = vadd.f32 %v5511_v3, %v5499_v5 }
 0x2a0   :  { %v5524_v4 = vpop.f32.mrf.mxu1 }
 0x2a1   :  { %v5525_v10 = vadd.f32 %v5524_v4, %v5512_v6 }
 0x2a5   :  { %v5537_v7 = vpop.f32.mrf.mxu2 }
 0x2a6   :  { %v5513_v8 = vpop.f32.mrf.mxu0  ;;  %v5538_v12 = vadd.f32 %v5537_v7, %v5525_v10 }
 0x2a7   :  { %v5550_v9 = vpop.f32.mrf.mxu3 }
 0x2a8   :  { %v5526_v11 = vpop.f32.mrf.mxu1  ;;  %v5551_v14 = vadd.f32 %v5550_v9, %v5538_v12 }
 0x2ad   :  { %v5539_v13 = vpop.f32.mrf.mxu2 }
 0x2ae   :  { %v5563_v16 = vpop.f32.mrf.mxu0 }
 0x2af   :  { %v5552_v15 = vpop.f32.mrf.mxu3  ;;  %v5564_v17 = vadd.f32 %v5563_v16, %v5551_v14 }
 0x2b1   :  { %5568 = vst.msk [vmem:[#allocation2] sm:$0x3] %vm5567_vm2, %v5564_v17 }
 0x2b2   :  { %5579 = dma.vmem_to_hbm [thread:$0]  %s5575_s9, 32, %s5577_s12, [#allocation3]  }
 0x2b6   :  { %v5565_v18 = vpop.f32.mrf.mxu0 }
 0x2b7   :  { %8347 = dma.done.wait [#allocation3], 32  }
 0x2b8   :  { %8348 = vsyncadd [#allocation3], 4294967264 }
 0x2b9   :  { %5584 = vsyncpa [#allocation3], 1 }

// kernel: tpu_custom_call.1
= control target key start
LH: loop header
LB: loop body
LE: loop exit
PB: predicated region body
PF: predicated region fallthrough
CT: control target
= control target key end

     0   :  { %s10155_s0 = inlined_call_operand.vmem [shape: f32[2,8756], index: 0, kind: input, shape index: {}]   ;;  %s10156_s1 = inlined_call_operand.vmem [shape: bf16[8756,48], index: 1, kind: input, shape index: {}]   ;;  %s10157_s2 = inlined_call_operand.vmem [shape: f32[1,48], index: 2, kind: input, shape index: {}]   ;;  %s10158_s3 = inlined_call_operand.hbm [shape: f32[2,48], index: 3, kind: output, shape index: {}]  }
   0x1   :  { %v7781_v0 = vld [vmem:[%s10156_s1 + $0x38] sm:$0xff]  ;;  %v7780_v4 = vld [vmem:[%s10156_s1 + $0x30] sm:$0xff]  ;;  %v7779_v8 = vld [vmem:[%s10156_s1 + $0x28] sm:$0xff] }
   0x2   :  { %v7797_v1 = vld [vmem:[%s10156_s1 + $0xb8] sm:$0xff]  ;;  %4670 = vmatpush.bf16.msra.mxu0 %v7781_v0  ;;  %v7796_v5 = vld [vmem:[%s10156_s1 + $0xb0] sm:$0xff]  ;;  %v7795_v9 = vld [vmem:[%s10156_s1 + $0xa8] sm:$0xff] }
   0x3   :  { %v7789_v2 = vld [vmem:[%s10156_s1 + $0x78] sm:$0xff]  ;;  %4696 = vmatpush.bf16.msra.mxu2 %v7797_v1  ;;  %v7788_v6 = vld [vmem:[%s10156_s1 + $0x70] sm:$0xff]  ;;  %v7787_v10 = vld [vmem:[%s10156_s1 + $0x68] sm:$0xff] }
   0x4   :  { %v7805_v3 = vld [vmem:[%s10156_s1 + $0xf8] sm:$0xff]  ;;  %4683 = vmatpush.bf16.msra.mxu1 %v7789_v2  ;;  %v7804_v7 = vld [vmem:[%s10156_s1 + $0xf0] sm:$0xff]  ;;  %v7803_v11 = vld [vmem:[%s10156_s1 + $0xe8] sm:$0xff] }
   0x5   :  { %4709 = vmatpush.bf16.msra.mxu3 %v7805_v3  ;;  %v7778_v12 = vld [vmem:[%s10156_s1 + $0x20] sm:$0xff]  ;;  %v7777_v16 = vld [vmem:[%s10156_s1 + $0x18] sm:$0xff]  ;;  %v7776_v21 = vld [vmem:[%s10156_s1 + $0x10] sm:$0xff] }
   0x6   :  { %4671 = vmatpush.bf16.msra.mxu0 %v7780_v4  ;;  %v7794_v13 = vld [vmem:[%s10156_s1 + $0xa0] sm:$0xff]  ;;  %v7793_v17 = vld [vmem:[%s10156_s1 + $0x98] sm:$0xff]  ;;  %v7792_v22 = vld [vmem:[%s10156_s1 + $0x90] sm:$0xff] }
   0x7   :  { %4697 = vmatpush.bf16.msra.mxu2 %v7796_v5  ;;  %v7786_v14 = vld [vmem:[%s10156_s1 + $0x60] sm:$0xff]  ;;  %v7785_v18 = vld [vmem:[%s10156_s1 + $0x58] sm:$0xff]  ;;  %v7784_v23 = vld [vmem:[%s10156_s1 + $0x50] sm:$0xff] }
   0x8   :  { %4684 = vmatpush.bf16.msra.mxu1 %v7788_v6  ;;  %v7802_v15 = vld [vmem:[%s10156_s1 + $0xe0] sm:$0xff]  ;;  %v7801_v19 = vld [vmem:[%s10156_s1 + $0xd8] sm:$0xff]  ;;  %v7800_v24 = vld [vmem:[%s10156_s1 + $0xd0] sm:$0xff] }
   0x9   :  { %4710 = vmatpush.bf16.msra.mxu3 %v7804_v7  ;;  %v16_v20 = vld [vmem:[%s10155_s0] sm:$0xff] }
   0xa   :  { %4672 = vmatpush.bf16.msra.mxu0 %v7779_v8  ;;  %1147 = vst [vmem:[#allocation1] ss:$4 sm:$0xff] %v16_v20 }
   0xb   :  { %4698 = vmatpush.bf16.msra.mxu2 %v7795_v9 }
   0xc   :  { %4685 = vmatpush.bf16.msra.mxu1 %v7787_v10 }
   0xd   :  { %4711 = vmatpush.bf16.msra.mxu3 %v7803_v11 }
   0xe   :  { %4673 = vmatpush.bf16.msra.mxu0 %v7778_v12 }
   0xf   :  { %4699 = vmatpush.bf16.msra.mxu2 %v7794_v13 }
  0x10   :  { %4686 = vmatpush.bf16.msra.mxu1 %v7786_v14 }
  0x11   :  { %4712 = vmatpush.bf16.msra.mxu3 %v7802_v15 }
  0x12   :  { %4674 = vmatpush.bf16.msra.mxu0 %v7777_v16 }
  0x13   :  { %4700 = vmatpush.bf16.msra.mxu2 %v7793_v17 }
  0x14   :  { %4687 = vmatpush.bf16.msra.mxu1 %v7785_v18 }
  0x15   :  { %4713 = vmatpush.bf16.msra.mxu3 %v7801_v19 }
  0x16   :  { %8 = vsyncpa [#allocation3], 0  ;;  %4675 = vmatpush.bf16.msra.mxu0 %v7776_v21  ;;  %v7775_v25 = vld [vmem:[%s10156_s1 + $0x8] sm:$0xff]  ;;  %v7774_v30 = vld [vmem:[%s10156_s1] sm:$0xff]  ;;  %vm4666_vm0 = vcmask 1041408   ;;  %vm4662_vm1 = vcmask 424960  }
  0x17   :  { %4701 = vmatpush.bf16.msra.mxu2 %v7792_v22  ;;  %v7791_v26 = vld [vmem:[%s10156_s1 + $0x88] sm:$0xff]  ;;  %v7790_v31 = vld [vmem:[%s10156_s1 + $0x80] sm:$0xff]  ;;  %v18_v32 = vld [vmem:[%s10155_s0 + $0x10] sm:$0xff]  ;;  %s5576_s12 = sshll.u32 %s10158_s3, 4  ;;  %vm5567_vm2 = vcmask 386048   ;;  %s5577_s12 = int_to_ptr.hbm [resolvable:$true] %s5576_s12 }
  0x18   :  { %4688 = vmatpush.bf16.msra.mxu1 %v7784_v23  ;;  %v7783_v27 = vld [vmem:[%s10156_s1 + $0x48] sm:$0xff]  ;;  %v1152_v33 = vld.sshfl [vmem:[#allocation1 + $0x10] sm:$0xff pattern:$0x73625140]  ;;  %v7813_v37 = vld [vmem:[%s10156_s1 + $0x138] sm:$0xff] }
  0x19   :  { %4714 = vmatpush.bf16.msra.mxu3 %v7800_v24  ;;  %v7799_v28 = vld [vmem:[%s10156_s1 + $0xc8] sm:$0xff]  ;;  %v1150_v34 = vld.sshfl [vmem:[#allocation1] sm:$0xff pattern:$0x73625140]  ;;  %v7829_v38 = vld [vmem:[%s10156_s1 + $0x1b8] sm:$0xff]  ;;  %v1306_v43 = vpack.c.bf16 %v1152_v33, %v1152_v33 }
  0x1a   :  { %v17_v29 = vld [vmem:[%s10155_s0 + $0x8] sm:$0xff]  ;;  %4676 = vmatpush.bf16.msra.mxu0 %v7775_v25  ;;  %v1153_v35 = vld.sshfl [vmem:[#allocation1 + $0x18] sm:$0xff pattern:$0x73625140]  ;;  %v7782_v39 = vld [vmem:[%s10156_s1 + $0x40] sm:$0xff]  ;;  %v1304_v44 = vpack.c.bf16 %v1150_v34, %v1150_v34 }
  0x1b   :  { %1149 = vst [vmem:[#allocation1 + $0x20] ss:$4 sm:$0xff] %v17_v29  ;;  %4702 = vmatpush.bf16.msra.mxu2 %v7791_v26  ;;  %v1151_v36 = vld.sshfl [vmem:[#allocation1 + $0x8] sm:$0xff pattern:$0x73625140]  ;;  %v7798_v40 = vld [vmem:[%s10156_s1 + $0xc0] sm:$0xff]  ;;  %v1307_v47 = vpack.c.bf16 %v1153_v35, %v1153_v35 }
  0x1c   :  { %4689 = vmatpush.bf16.msra.mxu1 %v7783_v27  ;;  %1158 = vst [vmem:[#allocation1] ss:$4 sm:$0xff] %v18_v32  ;;  %v7821_v41 = vld [vmem:[%s10156_s1 + $0x178] sm:$0xff]  ;;  %v7812_v45 = vld [vmem:[%s10156_s1 + $0x130] sm:$0xff]  ;;  %v1305_v48 = vpack.c.bf16 %v1151_v36, %v1151_v36  ;;  %v7811_v51 = vld [vmem:[%s10156_s1 + $0x128] sm:$0xff] }
  0x1d   :  { %4715 = vmatpush.bf16.msra.mxu3 %v7799_v28  ;;  %v7837_v42 = vld [vmem:[%s10156_s1 + $0x1f8] sm:$0xff]  ;;  %v7828_v46 = vld [vmem:[%s10156_s1 + $0x1b0] sm:$0xff]  ;;  %v7827_v52 = vld [vmem:[%s10156_s1 + $0x1a8] sm:$0xff] }
  0x1e   :  { %4677 = vmatpush.bf16.msra.mxu0 %v7774_v30  ;;  %v7820_v49 = vld [vmem:[%s10156_s1 + $0x170] sm:$0xff]  ;;  %v19_v56 = vld [vmem:[%s10155_s0 + $0x18] sm:$0xff]  ;;  %v7819_v58 = vld [vmem:[%s10156_s1 + $0x168] sm:$0xff] }
  0x1f   :  { %4703 = vmatpush.bf16.msra.mxu2 %v7790_v31  ;;  %v7836_v50 = vld [vmem:[%s10156_s1 + $0x1f0] sm:$0xff]  ;;  %v7835_v59 = vld [vmem:[%s10156_s1 + $0x1e8] sm:$0xff]  ;;  %v7810_v60 = vld [vmem:[%s10156_s1 + $0x120] sm:$0xff] }
  0x20   :  { %4690 = vmatpush.bf16.msra.mxu1 %v7782_v39  ;;  %v7826_v61 = vld [vmem:[%s10156_s1 + $0x1a0] sm:$0xff]  ;;  %v7809_v0 = vld [vmem:[%s10156_s1 + $0x118] sm:$0xff]  ;;  %v7808_v4 = vld [vmem:[%s10156_s1 + $0x110] sm:$0xff] }
  0x21   :  { %4716 = vmatpush.bf16.msra.mxu3 %v7798_v40  ;;  %4678 = vmatmul.bf16.vlgmr.msra.gmra.mxu0 %v1304_v44  ;;  %v7818_v62 = vld [vmem:[%s10156_s1 + $0x160] sm:$0xff]  ;;  %v7825_v1 = vld [vmem:[%s10156_s1 + $0x198] sm:$0xff]  ;;  %v7824_v5 = vld [vmem:[%s10156_s1 + $0x190] sm:$0xff] }
  0x22   :  { %4722 = vmatpush.bf16.msrb.mxu0 %v7813_v37  ;;  %4704 = vmatmul.bf16.vlgmr.msra.gmra.mxu2 %v1306_v43  ;;  %v8505_v53 = vld.sshfl [vmem:[#allocation1 + $0x30] sm:$0xff pattern:$0x73625140]  ;;  %v8507_v54 = vld.sshfl [vmem:[#allocation1 + $0x20] sm:$0xff pattern:$0x73625140] }
  0x23   :  { %4748 = vmatpush.bf16.msrb.mxu2 %v7829_v38  ;;  %v8509_v55 = vld.sshfl [vmem:[#allocation1 + $0x38] sm:$0xff pattern:$0x73625140]  ;;  %4691 = vmatmul.bf16.vlgmr.msra.gmra.mxu1 %v1305_v48  ;;  %v8514_v57 = vld.sshfl [vmem:[#allocation1 + $0x28] sm:$0xff pattern:$0x73625140]  ;;  %v1310_v22 = vpack.c.bf16 %v8505_v53, %v8505_v53  ;;  %v1308_v23 = vpack.c.bf16 %v8507_v54, %v8507_v54 }
  0x24   :  { %4735 = vmatpush.bf16.msrb.mxu1 %v7821_v41  ;;  %4717 = vmatmul.bf16.vlgmr.msra.gmra.mxu3 %v1307_v47  ;;  %1159 = vst [vmem:[#allocation1 + $0x20] ss:$4 sm:$0xff] %v19_v56  ;;  %v7834_v63 = vld [vmem:[%s10156_s1 + $0x1e0] sm:$0xff]  ;;  %v7817_v2 = vld [vmem:[%s10156_s1 + $0x158] sm:$0xff]  ;;  %v7816_v6 = vld [vmem:[%s10156_s1 + $0x150] sm:$0xff]  ;;  %v1311_v27 = vpack.c.bf16 %v8509_v55, %v8509_v55  ;;  %v1309_v28 = vpack.c.bf16 %v8514_v57, %v8514_v57 }
  0x25   :  { %4761 = vmatpush.bf16.msrb.mxu3 %v7837_v42  ;;  %v7833_v3 = vld [vmem:[%s10156_s1 + $0x1d8] sm:$0xff]  ;;  %v7832_v7 = vld [vmem:[%s10156_s1 + $0x1d0] sm:$0xff]  ;;  %v7807_v8 = vld [vmem:[%s10156_s1 + $0x108] sm:$0xff] }
  0x26   :  { %4723 = vmatpush.bf16.msrb.mxu0 %v7812_v45  ;;  %v7823_v9 = vld [vmem:[%s10156_s1 + $0x188] sm:$0xff]  ;;  %v7806_v12 = vld [vmem:[%s10156_s1 + $0x100] sm:$0xff]  ;;  %v7845_v14 = vld [vmem:[%s10156_s1 + $0x238] sm:$0xff] }
  0x27   :  { %4749 = vmatpush.bf16.msrb.mxu2 %v7828_v46  ;;  %v7815_v10 = vld [vmem:[%s10156_s1 + $0x148] sm:$0xff]  ;;  %v7822_v13 = vld [vmem:[%s10156_s1 + $0x180] sm:$0xff]  ;;  %v7861_v15 = vld [vmem:[%s10156_s1 + $0x2b8] sm:$0xff] }
  0x28   :  { %4736 = vmatpush.bf16.msrb.mxu1 %v7820_v49  ;;  %v7831_v11 = vld [vmem:[%s10156_s1 + $0x1c8] sm:$0xff]  ;;  %v7814_v16 = vld [vmem:[%s10156_s1 + $0x140] sm:$0xff]  ;;  %v7853_v18 = vld [vmem:[%s10156_s1 + $0x278] sm:$0xff] }
  0x29   :  { %4762 = vmatpush.bf16.msrb.mxu3 %v7836_v50  ;;  %v7830_v17 = vld [vmem:[%s10156_s1 + $0x1c0] sm:$0xff]  ;;  %v7869_v19 = vld [vmem:[%s10156_s1 + $0x2f8] sm:$0xff]  ;;  %v7844_v20 = vld [vmem:[%s10156_s1 + $0x230] sm:$0xff] }
  0x2a   :  { %4724 = vmatpush.bf16.msrb.mxu0 %v7811_v51  ;;  %v7860_v21 = vld [vmem:[%s10156_s1 + $0x2b0] sm:$0xff]  ;;  %v8604_v24 = vld.sshfl [vmem:[#allocation1] sm:$0xff pattern:$0x73625140]  ;;  %v7843_v33 = vld [vmem:[%s10156_s1 + $0x228] sm:$0xff] }
  0x2b   :  { %4750 = vmatpush.bf16.msrb.mxu2 %v7827_v52  ;;  %v8606_v25 = vld.sshfl [vmem:[#allocation1 + $0x10] sm:$0xff pattern:$0x73625140]  ;;  %v8608_v26 = vld.sshfl [vmem:[#allocation1 + $0x8] sm:$0xff pattern:$0x73625140] }
  0x2c   :  { %4737 = vmatpush.bf16.msrb.mxu1 %v7819_v58  ;;  %v20_v29 = vld [vmem:[%s10155_s0 + $0x20] sm:$0xff]  ;;  %v8617_v30 = vld.sshfl [vmem:[#allocation1 + $0x18] sm:$0xff pattern:$0x73625140]  ;;  %v7852_v31 = vld [vmem:[%s10156_s1 + $0x270] sm:$0xff] }
  0x2d   :  { %4763 = vmatpush.bf16.msrb.mxu3 %v7835_v59  ;;  %v7868_v32 = vld [vmem:[%s10156_s1 + $0x2f0] sm:$0xff]  ;;  %1168 = vst [vmem:[#allocation1] ss:$4 sm:$0xff] %v20_v29  ;;  %v7859_v34 = vld [vmem:[%s10156_s1 + $0x2a8] sm:$0xff]  ;;  %v7842_v37 = vld [vmem:[%s10156_s1 + $0x220] sm:$0xff]  ;;  %v1312_v59 = vpack.c.bf16 %v8604_v24, %v8604_v24 }
  0x2e   :  { %4725 = vmatpush.bf16.msrb.mxu0 %v7810_v60  ;;  %v7851_v35 = vld [vmem:[%s10156_s1 + $0x268] sm:$0xff]  ;;  %v7858_v38 = vld [vmem:[%s10156_s1 + $0x2a0] sm:$0xff]  ;;  %v7841_v41 = vld [vmem:[%s10156_s1 + $0x218] sm:$0xff]  ;;  %v1314_v60 = vpack.c.bf16 %v8606_v25, %v8606_v25 }
  0x2f   :  { %4751 = vmatpush.bf16.msrb.mxu2 %v7826_v61  ;;  %v7867_v36 = vld [vmem:[%s10156_s1 + $0x2e8] sm:$0xff]  ;;  %v7850_v39 = vld [vmem:[%s10156_s1 + $0x260] sm:$0xff]  ;;  %v7857_v42 = vld [vmem:[%s10156_s1 + $0x298] sm:$0xff] }
  0x30   :  { %4738 = vmatpush.bf16.msrb.mxu1 %v7818_v62  ;;  %v7866_v40 = vld [vmem:[%s10156_s1 + $0x2e0] sm:$0xff]  ;;  %v7849_v43 = vld [vmem:[%s10156_s1 + $0x258] sm:$0xff]  ;;  %v7840_v45 = vld [vmem:[%s10156_s1 + $0x210] sm:$0xff] }
  0x31   :  { %4764 = vmatpush.bf16.msrb.mxu3 %v7834_v63  ;;  %v7865_v44 = vld [vmem:[%s10156_s1 + $0x2d8] sm:$0xff]  ;;  %v7856_v46 = vld [vmem:[%s10156_s1 + $0x290] sm:$0xff]  ;;  %v7839_v49 = vld [vmem:[%s10156_s1 + $0x208] sm:$0xff]  ;;  %v1313_v63 = vpack.c.bf16 %v8608_v26, %v8608_v26 }
  0x32   :  { %4726 = vmatpush.bf16.msrb.mxu0 %v7809_v0  ;;  %v7848_v47 = vld [vmem:[%s10156_s1 + $0x250] sm:$0xff]  ;;  %v7855_v50 = vld [vmem:[%s10156_s1 + $0x288] sm:$0xff]  ;;  %v7838_v53 = vld [vmem:[%s10156_s1 + $0x200] sm:$0xff]  ;;  %v1315_v0 = vpack.c.bf16 %v8617_v30, %v8617_v30 }
  0x33   :  { %4752 = vmatpush.bf16.msrb.mxu2 %v7825_v1  ;;  %v7864_v48 = vld [vmem:[%s10156_s1 + $0x2d0] sm:$0xff]  ;;  %v7847_v51 = vld [vmem:[%s10156_s1 + $0x248] sm:$0xff]  ;;  %v7854_v54 = vld [vmem:[%s10156_s1 + $0x280] sm:$0xff] }
  0x34   :  { %4739 = vmatpush.bf16.msrb.mxu1 %v7817_v2  ;;  %v7863_v52 = vld [vmem:[%s10156_s1 + $0x2c8] sm:$0xff]  ;;  %v7877_v55 = vld [vmem:[%s10156_s1 + $0x338] sm:$0xff]  ;;  %v7846_v57 = vld [vmem:[%s10156_s1 + $0x240] sm:$0xff] }
  0x35   :  { %4765 = vmatpush.bf16.msrb.mxu3 %v7833_v3  ;;  %v7893_v56 = vld [vmem:[%s10156_s1 + $0x3b8] sm:$0xff]  ;;  %v7862_v58 = vld [vmem:[%s10156_s1 + $0x2c0] sm:$0xff]  ;;  %v7876_v1 = vld [vmem:[%s10156_s1 + $0x330] sm:$0xff] }
  0x36   :  { %4727 = vmatpush.bf16.msrb.mxu0 %v7808_v4  ;;  %v7885_v61 = vld [vmem:[%s10156_s1 + $0x378] sm:$0xff]  ;;  %v7892_v2 = vld [vmem:[%s10156_s1 + $0x3b0] sm:$0xff]  ;;  %v8723_v3 = vld.sshfl [vmem:[#allocation1 + $0x20] sm:$0xff pattern:$0x73625140] }
  0x37   :  { %4753 = vmatpush.bf16.msrb.mxu2 %v7824_v5  ;;  %v7901_v62 = vld [vmem:[%s10156_s1 + $0x3f8] sm:$0xff]  ;;  %v8725_v4 = vld.sshfl [vmem:[#allocation1 + $0x30] sm:$0xff pattern:$0x73625140]  ;;  %v7871_v26 = vld [vmem:[%s10156_s1 + $0x308] sm:$0xff] }
  0x38   :  { %4740 = vmatpush.bf16.msrb.mxu1 %v7816_v6  ;;  %v8727_v5 = vld.sshfl [vmem:[#allocation1 + $0x28] sm:$0xff pattern:$0x73625140]  ;;  %v7880_v24 = vld [vmem:[%s10156_s1 + $0x350] sm:$0xff]  ;;  %v7870_v30 = vld [vmem:[%s10156_s1 + $0x300] sm:$0xff] }
  0x39   :  { %4766 = vmatpush.bf16.msrb.mxu3 %v7832_v7  ;;  %v21_v6 = vld [vmem:[%s10155_s0 + $0x28] sm:$0xff]  ;;  %v8732_v7 = vld.sshfl [vmem:[#allocation1 + $0x38] sm:$0xff pattern:$0x73625140]  ;;  %v7896_v25 = vld [vmem:[%s10156_s1 + $0x3d0] sm:$0xff] }
  0x3a   :  { %4728 = vmatpush.bf16.msrb.mxu0 %v7807_v8  ;;  %v7884_v8 = vld [vmem:[%s10156_s1 + $0x370] sm:$0xff]  ;;  %1169 = vst [vmem:[#allocation1 + $0x20] ss:$4 sm:$0xff] %v21_v6  ;;  %v7895_v29 = vld [vmem:[%s10156_s1 + $0x3c8] sm:$0xff] }
  0x3b   :  { %4754 = vmatpush.bf16.msrb.mxu2 %v7823_v9  ;;  %v7900_v9 = vld [vmem:[%s10156_s1 + $0x3f0] sm:$0xff] }
  0x3c   :  { %4741 = vmatpush.bf16.msrb.mxu1 %v7815_v10  ;;  %v7875_v10 = vld [vmem:[%s10156_s1 + $0x328] sm:$0xff]  ;;  %v1172_v6 = vld.sshfl [vmem:[#allocation1 + $0x10] sm:$0xff pattern:$0x73625140] }
  0x3d   :  { %4767 = vmatpush.bf16.msrb.mxu3 %v7831_v11  ;;  %v7891_v11 = vld [vmem:[%s10156_s1 + $0x3a8] sm:$0xff] }
  0x3e   :  { %4729 = vmatpush.bf16.msrb.mxu0 %v7806_v12  ;;  %v7883_v12 = vld [vmem:[%s10156_s1 + $0x368] sm:$0xff] }
  0x3f   :  { %4755 = vmatpush.bf16.msrb.mxu2 %v7822_v13  ;;  %v7899_v13 = vld [vmem:[%s10156_s1 + $0x3e8] sm:$0xff] }
  0x40   :  { %4742 = vmatpush.bf16.msrb.mxu1 %v7814_v16  ;;  %v7882_v16 = vld [vmem:[%s10156_s1 + $0x360] sm:$0xff] }
  0x41   :  { %4768 = vmatpush.bf16.msrb.mxu3 %v7830_v17  ;;  %4730 = vmatmul.bf16.vlgmr.msrb.gmra.mxu0 %v1308_v23  ;;  %v7898_v17 = vld [vmem:[%s10156_s1 + $0x3e0] sm:$0xff]  ;;  %v7888_v23 = vld [vmem:[%s10156_s1 + $0x390] sm:$0xff] }
  0x42   :  { %4774 = vmatpush.bf16.msra.mxu0 %v7845_v14  ;;  %4756 = vmatmul.bf16.vlgmr.msrb.gmra.mxu2 %v1310_v22  ;;  %v7874_v14 = vld [vmem:[%s10156_s1 + $0x320] sm:$0xff]  ;;  %v7872_v22 = vld [vmem:[%s10156_s1 + $0x310] sm:$0xff] }
  0x43   :  { %4800 = vmatpush.bf16.msra.mxu2 %v7861_v15  ;;  %4743 = vmatmul.bf16.vlgmr.msrb.gmra.mxu1 %v1309_v28  ;;  %v7890_v15 = vld [vmem:[%s10156_s1 + $0x3a0] sm:$0xff]  ;;  %v7879_v28 = vld [vmem:[%s10156_s1 + $0x348] sm:$0xff] }
  0x44   :  { %4787 = vmatpush.bf16.msra.mxu1 %v7853_v18  ;;  %4769 = vmatmul.bf16.vlgmr.msrb.gmra.mxu3 %v1311_v27  ;;  %v7873_v18 = vld [vmem:[%s10156_s1 + $0x318] sm:$0xff]  ;;  %v7887_v27 = vld [vmem:[%s10156_s1 + $0x388] sm:$0xff] }
  0x45   :  { %4813 = vmatpush.bf16.msra.mxu3 %v7869_v19  ;;  %v7889_v19 = vld [vmem:[%s10156_s1 + $0x398] sm:$0xff] }
  0x46   :  { %4775 = vmatpush.bf16.msra.mxu0 %v7844_v20  ;;  %v7881_v20 = vld [vmem:[%s10156_s1 + $0x358] sm:$0xff] }
  0x47   :  { %4801 = vmatpush.bf16.msra.mxu2 %v7860_v21  ;;  %v7897_v21 = vld [vmem:[%s10156_s1 + $0x3d8] sm:$0xff] }
  0x48   :  { %4788 = vmatpush.bf16.msra.mxu1 %v7852_v31  ;;  %v7886_v31 = vld [vmem:[%s10156_s1 + $0x380] sm:$0xff] }
  0x49   :  { %4814 = vmatpush.bf16.msra.mxu3 %v7868_v32  ;;  %v7909_v32 = vld [vmem:[%s10156_s1 + $0x438] sm:$0xff] }
  0x4a   :  { %4776 = vmatpush.bf16.msra.mxu0 %v7843_v33  ;;  %v7925_v33 = vld [vmem:[%s10156_s1 + $0x4b8] sm:$0xff] }
  0x4b   :  { %4802 = vmatpush.bf16.msra.mxu2 %v7859_v34  ;;  %v7878_v34 = vld [vmem:[%s10156_s1 + $0x340] sm:$0xff] }
  0x4c   :  { %4789 = vmatpush.bf16.msra.mxu1 %v7851_v35  ;;  %v7894_v35 = vld [vmem:[%s10156_s1 + $0x3c0] sm:$0xff] }
  0x4d   :  { %4815 = vmatpush.bf16.msra.mxu3 %v7867_v36  ;;  %v1316_v36 = vpack.c.bf16 %v8723_v3, %v8723_v3  ;;  %v7918_v3 = vld [vmem:[%s10156_s1 + $0x480] sm:$0xff] }
  0x4e   :  { %4777 = vmatpush.bf16.msra.mxu0 %v7842_v37  ;;  %v1318_v37 = vpack.c.bf16 %v8725_v4, %v8725_v4  ;;  %v7941_v4 = vld [vmem:[%s10156_s1 + $0x538] sm:$0xff] }
  0x4f   :  { %4803 = vmatpush.bf16.msra.mxu2 %v7858_v38  ;;  %v7917_v38 = vld [vmem:[%s10156_s1 + $0x478] sm:$0xff] }
  0x50   :  { %4790 = vmatpush.bf16.msra.mxu1 %v7850_v39  ;;  %v7933_v39 = vld [vmem:[%s10156_s1 + $0x4f8] sm:$0xff] }
  0x51   :  { %4816 = vmatpush.bf16.msra.mxu3 %v7866_v40  ;;  %v1317_v40 = vpack.c.bf16 %v8727_v5, %v8727_v5  ;;  %v1170_v5 = vld.sshfl [vmem:[#allocation1] sm:$0xff pattern:$0x73625140] }
  0x52   :  { %4778 = vmatpush.bf16.msra.mxu0 %v7841_v41  ;;  %v1319_v41 = vpack.c.bf16 %v8732_v7, %v8732_v7  ;;  %v7957_v7 = vld [vmem:[%s10156_s1 + $0x5b8] sm:$0xff] }
  0x53   :  { %4804 = vmatpush.bf16.msra.mxu2 %v7857_v42  ;;  %v7908_v42 = vld [vmem:[%s10156_s1 + $0x430] sm:$0xff] }
  0x54   :  { %4791 = vmatpush.bf16.msra.mxu1 %v7849_v43  ;;  %v7924_v43 = vld [vmem:[%s10156_s1 + $0x4b0] sm:$0xff] }
  0x55   :  { %4817 = vmatpush.bf16.msra.mxu3 %v7865_v44  ;;  %v7916_v44 = vld [vmem:[%s10156_s1 + $0x470] sm:$0xff] }
  0x56   :  { %4779 = vmatpush.bf16.msra.mxu0 %v7840_v45  ;;  %v7932_v45 = vld [vmem:[%s10156_s1 + $0x4f0] sm:$0xff] }
  0x57   :  { %4805 = vmatpush.bf16.msra.mxu2 %v7856_v46  ;;  %v7907_v46 = vld [vmem:[%s10156_s1 + $0x428] sm:$0xff] }
  0x58   :  { %4792 = vmatpush.bf16.msra.mxu1 %v7848_v47  ;;  %v7923_v47 = vld [vmem:[%s10156_s1 + $0x4a8] sm:$0xff] }
  0x59   :  { %4818 = vmatpush.bf16.msra.mxu3 %v7864_v48  ;;  %v7915_v48 = vld [vmem:[%s10156_s1 + $0x468] sm:$0xff] }
  0x5a   :  { %4780 = vmatpush.bf16.msra.mxu0 %v7839_v49  ;;  %v7931_v49 = vld [vmem:[%s10156_s1 + $0x4e8] sm:$0xff] }
  0x5b   :  { %4806 = vmatpush.bf16.msra.mxu2 %v7855_v50  ;;  %v7906_v50 = vld [vmem:[%s10156_s1 + $0x420] sm:$0xff] }
  0x5c   :  { %4793 = vmatpush.bf16.msra.mxu1 %v7847_v51  ;;  %v7922_v51 = vld [vmem:[%s10156_s1 + $0x4a0] sm:$0xff] }
  0x5d   :  { %4819 = vmatpush.bf16.msra.mxu3 %v7863_v52  ;;  %v7914_v52 = vld [vmem:[%s10156_s1 + $0x460] sm:$0xff] }
  0x5e   :  { %4781 = vmatpush.bf16.msra.mxu0 %v7838_v53  ;;  %v7930_v53 = vld [vmem:[%s10156_s1 + $0x4e0] sm:$0xff] }
  0x5f   :  { %4807 = vmatpush.bf16.msra.mxu2 %v7854_v54  ;;  %v7905_v54 = vld [vmem:[%s10156_s1 + $0x418] sm:$0xff] }
  0x60   :  { %4794 = vmatpush.bf16.msra.mxu1 %v7846_v57  ;;  %v7929_v57 = vld [vmem:[%s10156_s1 + $0x4d8] sm:$0xff] }
  0x61   :  { %4820 = vmatpush.bf16.msra.mxu3 %v7862_v58  ;;  %4782 = vmatmul.bf16.vlgmr.msra.gmra.mxu0 %v1312_v59  ;;  %v7904_v58 = vld [vmem:[%s10156_s1 + $0x410] sm:$0xff] }
  0x62   :  { %4826 = vmatpush.bf16.msrb.mxu0 %v7877_v55  ;;  %4808 = vmatmul.bf16.vlgmr.msra.gmra.mxu2 %v1314_v60  ;;  %v7921_v55 = vld [vmem:[%s10156_s1 + $0x498] sm:$0xff]  ;;  %v7920_v59 = vld [vmem:[%s10156_s1 + $0x490] sm:$0xff] }
  0x63   :  { %4852 = vmatpush.bf16.msrb.mxu2 %v7893_v56  ;;  %4795 = vmatmul.bf16.vlgmr.msra.gmra.mxu1 %v1313_v63  ;;  %v7913_v56 = vld [vmem:[%s10156_s1 + $0x458] sm:$0xff]  ;;  %v7912_v60 = vld [vmem:[%s10156_s1 + $0x450] sm:$0xff]  ;;  %v7919_v63 = vld [vmem:[%s10156_s1 + $0x488] sm:$0xff] }
  0x64   :  { %4839 = vmatpush.bf16.msrb.mxu1 %v7885_v61  ;;  %4821 = vmatmul.bf16.vlgmr.msra.gmra.mxu3 %v1315_v0  ;;  %v7928_v61 = vld [vmem:[%s10156_s1 + $0x4d0] sm:$0xff]  ;;  %v7911_v0 = vld [vmem:[%s10156_s1 + $0x448] sm:$0xff] }
  0x65   :  { %4865 = vmatpush.bf16.msrb.mxu3 %v7901_v62  ;;  %v7903_v62 = vld [vmem:[%s10156_s1 + $0x408] sm:$0xff] }
  0x66   :  { %4827 = vmatpush.bf16.msrb.mxu0 %v7876_v1  ;;  %v7927_v1 = vld [vmem:[%s10156_s1 + $0x4c8] sm:$0xff] }
  0x67   :  { %4853 = vmatpush.bf16.msrb.mxu2 %v7892_v2  ;;  %v7902_v2 = vld [vmem:[%s10156_s1 + $0x400] sm:$0xff] }
  0x68   :  { %4840 = vmatpush.bf16.msrb.mxu1 %v7884_v8  ;;  %v7910_v8 = vld [vmem:[%s10156_s1 + $0x440] sm:$0xff] }
  0x69   :  { %4866 = vmatpush.bf16.msrb.mxu3 %v7900_v9  ;;  %v7926_v9 = vld [vmem:[%s10156_s1 + $0x4c0] sm:$0xff] }
  0x6a   :  { %4828 = vmatpush.bf16.msrb.mxu0 %v7875_v10  ;;  %v1171_v10 = vld.sshfl [vmem:[#allocation1 + $0x8] sm:$0xff pattern:$0x73625140] }
  0x6b   :  { %4854 = vmatpush.bf16.msrb.mxu2 %v7891_v11  ;;  %v1173_v11 = vld.sshfl [vmem:[#allocation1 + $0x18] sm:$0xff pattern:$0x73625140] }
  0x6c   :  { %4841 = vmatpush.bf16.msrb.mxu1 %v7883_v12  ;;  %v1320_v12 = vpack.c.bf16 %v1170_v5, %v1170_v5  ;;  %v7997_v5 = vld [vmem:[%s10156_s1 + $0x6f8] sm:$0xff] }
  0x6d   :  { %4867 = vmatpush.bf16.msrb.mxu3 %v7899_v13  ;;  %v1322_v13 = vpack.c.bf16 %v1172_v6, %v1172_v6 }
  0x6e   :  { %4829 = vmatpush.bf16.msrb.mxu0 %v7874_v14  ;;  %v7949_v14 = vld [vmem:[%s10156_s1 + $0x578] sm:$0xff] }
  0x6f   :  { %4855 = vmatpush.bf16.msrb.mxu2 %v7890_v15  ;;  %v7965_v15 = vld [vmem:[%s10156_s1 + $0x5f8] sm:$0xff] }
  0x70   :  { %4842 = vmatpush.bf16.msrb.mxu1 %v7882_v16  ;;  %v1321_v16 = vpack.c.bf16 %v1171_v10, %v1171_v10  ;;  %v7980_v10 = vld [vmem:[%s10156_s1 + $0x670] sm:$0xff] }
  0x71   :  { %4868 = vmatpush.bf16.msrb.mxu3 %v7898_v17  ;;  %v1323_v17 = vpack.c.bf16 %v1173_v11, %v1173_v11  ;;  %v7996_v11 = vld [vmem:[%s10156_s1 + $0x6f0] sm:$0xff] }
  0x72   :  { %4830 = vmatpush.bf16.msrb.mxu0 %v7873_v18  ;;  %v7940_v18 = vld [vmem:[%s10156_s1 + $0x530] sm:$0xff] }
  0x73   :  { %4856 = vmatpush.bf16.msrb.mxu2 %v7889_v19  ;;  %v7956_v19 = vld [vmem:[%s10156_s1 + $0x5b0] sm:$0xff] }
  0x74   :  { %4843 = vmatpush.bf16.msrb.mxu1 %v7881_v20  ;;  %v7948_v20 = vld [vmem:[%s10156_s1 + $0x570] sm:$0xff] }
  0x75   :  { %4869 = vmatpush.bf16.msrb.mxu3 %v7897_v21  ;;  %v7964_v21 = vld [vmem:[%s10156_s1 + $0x5f0] sm:$0xff] }
  0x76   :  { %4831 = vmatpush.bf16.msrb.mxu0 %v7872_v22  ;;  %v7939_v22 = vld [vmem:[%s10156_s1 + $0x528] sm:$0xff] }
  0x77   :  { %4857 = vmatpush.bf16.msrb.mxu2 %v7888_v23  ;;  %v7955_v23 = vld [vmem:[%s10156_s1 + $0x5a8] sm:$0xff] }
  0x78   :  { %4844 = vmatpush.bf16.msrb.mxu1 %v7880_v24  ;;  %v7947_v24 = vld [vmem:[%s10156_s1 + $0x568] sm:$0xff] }
  0x79   :  { %4870 = vmatpush.bf16.msrb.mxu3 %v7896_v25  ;;  %v7963_v25 = vld [vmem:[%s10156_s1 + $0x5e8] sm:$0xff] }
  0x7a   :  { %4832 = vmatpush.bf16.msrb.mxu0 %v7871_v26  ;;  %v8322_v26 = vld [vmem:[%s10157_s2] ss:$0 sm:$0xff] }
  0x7b   :  { %4858 = vmatpush.bf16.msrb.mxu2 %v7887_v27  ;;  %v7938_v27 = vld [vmem:[%s10156_s1 + $0x520] sm:$0xff] }
  0x7c   :  { %4845 = vmatpush.bf16.msrb.mxu1 %v7879_v28  ;;  %v7954_v28 = vld [vmem:[%s10156_s1 + $0x5a0] sm:$0xff] }
  0x7d   :  { %4871 = vmatpush.bf16.msrb.mxu3 %v7895_v29 }
  0x7e   :  { %4833 = vmatpush.bf16.msrb.mxu0 %v7870_v30  ;;  %v7946_v30 = vld [vmem:[%s10156_s1 + $0x560] sm:$0xff] }
  0x7f   :  { %4859 = vmatpush.bf16.msrb.mxu2 %v7886_v31  ;;  %v7962_v31 = vld [vmem:[%s10156_s1 + $0x5e0] sm:$0xff] }
  0x80   :  { %4846 = vmatpush.bf16.msrb.mxu1 %v7878_v34  ;;  %v7937_v34 = vld [vmem:[%s10156_s1 + $0x518] sm:$0xff] }
  0x81   :  { %4872 = vmatpush.bf16.msrb.mxu3 %v7894_v35  ;;  %4834 = vmatmul.bf16.vlgmr.msrb.gmra.mxu0 %v1316_v36  ;;  %v7953_v35 = vld [vmem:[%s10156_s1 + $0x598] sm:$0xff] }
  0x82   :  { %4878 = vmatpush.bf16.msra.mxu0 %v7909_v32  ;;  %4860 = vmatmul.bf16.vlgmr.msrb.gmra.mxu2 %v1318_v37  ;;  %v7945_v37 = vld [vmem:[%s10156_s1 + $0x558] sm:$0xff] }
  0x83   :  { %4904 = vmatpush.bf16.msra.mxu2 %v7925_v33  ;;  %4847 = vmatmul.bf16.vlgmr.msrb.gmra.mxu1 %v1317_v40  ;;  %v7936_v40 = vld [vmem:[%s10156_s1 + $0x510] sm:$0xff] }
  0x84   :  { %4891 = vmatpush.bf16.msra.mxu1 %v7917_v38  ;;  %4873 = vmatmul.bf16.vlgmr.msrb.gmra.mxu3 %v1319_v41  ;;  %v7961_v38 = vld [vmem:[%s10156_s1 + $0x5d8] sm:$0xff]  ;;  %v7952_v41 = vld [vmem:[%s10156_s1 + $0x590] sm:$0xff] }
  0x85   :  { %4917 = vmatpush.bf16.msra.mxu3 %v7933_v39 }
  0x86   :  { %4879 = vmatpush.bf16.msra.mxu0 %v7908_v42 }
  0x87   :  { %4905 = vmatpush.bf16.msra.mxu2 %v7924_v43 }
  0x88   :  { %4892 = vmatpush.bf16.msra.mxu1 %v7916_v44 }
  0x89   :  { %4918 = vmatpush.bf16.msra.mxu3 %v7932_v45  ;;  %v7944_v45 = vld [vmem:[%s10156_s1 + $0x550] sm:$0xff] }
  0x8a   :  { %4880 = vmatpush.bf16.msra.mxu0 %v7907_v46  ;;  %v7960_v46 = vld [vmem:[%s10156_s1 + $0x5d0] sm:$0xff] }
  0x8b   :  { %4906 = vmatpush.bf16.msra.mxu2 %v7923_v47 }
  0x8c   :  { %4893 = vmatpush.bf16.msra.mxu1 %v7915_v48  ;;  %v22_v48 = vld [vmem:[%s10155_s0 + $0x30] sm:$0xff] }
  0x8d   :  { %4919 = vmatpush.bf16.msra.mxu3 %v7931_v49  ;;  %1178 = vst [vmem:[#allocation1] ss:$4 sm:$0xff] %v22_v48 }
  0x8e   :  { %4881 = vmatpush.bf16.msra.mxu0 %v7906_v50  ;;  %v7935_v50 = vld [vmem:[%s10156_s1 + $0x508] sm:$0xff] }
  0x8f   :  { %4907 = vmatpush.bf16.msra.mxu2 %v7922_v51  ;;  %v7951_v51 = vld [vmem:[%s10156_s1 + $0x588] sm:$0xff] }
  0x90   :  { %4894 = vmatpush.bf16.msra.mxu1 %v7914_v52  ;;  %v7943_v52 = vld [vmem:[%s10156_s1 + $0x548] sm:$0xff] }
  0x91   :  { %4920 = vmatpush.bf16.msra.mxu3 %v7930_v53  ;;  %v7959_v53 = vld [vmem:[%s10156_s1 + $0x5c8] sm:$0xff] }
  0x92   :  { %4882 = vmatpush.bf16.msra.mxu0 %v7905_v54  ;;  %v7934_v54 = vld [vmem:[%s10156_s1 + $0x500] sm:$0xff] }
  0x93   :  { %4908 = vmatpush.bf16.msra.mxu2 %v7921_v55  ;;  %v7950_v55 = vld [vmem:[%s10156_s1 + $0x580] sm:$0xff] }
  0x94   :  { %4895 = vmatpush.bf16.msra.mxu1 %v7913_v56  ;;  %v7973_v56 = vld [vmem:[%s10156_s1 + $0x638] sm:$0xff]  ;;  %v1182_v48 = vld.sshfl [vmem:[#allocation1 + $0x10] sm:$0xff pattern:$0x73625140] }
  0x95   :  { %4921 = vmatpush.bf16.msra.mxu3 %v7929_v57 }
  0x96   :  { %4883 = vmatpush.bf16.msra.mxu0 %v7904_v58  ;;  %v1174_v58 = vld.sshfl [vmem:[#allocation1 + $0x20] sm:$0xff pattern:$0x73625140] }
  0x97   :  { %4909 = vmatpush.bf16.msra.mxu2 %v7920_v59  ;;  %v1176_v59 = vld.sshfl [vmem:[#allocation1 + $0x30] sm:$0xff pattern:$0x73625140] }
  0x98   :  { %4896 = vmatpush.bf16.msra.mxu1 %v7912_v60  ;;  %v7989_v60 = vld [vmem:[%s10156_s1 + $0x6b8] sm:$0xff] }
  0x99   :  { %4922 = vmatpush.bf16.msra.mxu3 %v7928_v61  ;;  %v7942_v61 = vld [vmem:[%s10156_s1 + $0x540] sm:$0xff] }
  0x9a   :  { %4884 = vmatpush.bf16.msra.mxu0 %v7903_v62  ;;  %v7958_v62 = vld [vmem:[%s10156_s1 + $0x5c0] sm:$0xff] }
  0x9b   :  { %4910 = vmatpush.bf16.msra.mxu2 %v7919_v63 }
  0x9c   :  { %4897 = vmatpush.bf16.msra.mxu1 %v7911_v0  ;;  %v1175_v0 = vld.sshfl [vmem:[#allocation1 + $0x28] sm:$0xff pattern:$0x73625140] }
  0x9d   :  { %4923 = vmatpush.bf16.msra.mxu3 %v7927_v1  ;;  %v1177_v1 = vld.sshfl [vmem:[#allocation1 + $0x38] sm:$0xff pattern:$0x73625140]  ;;  %v1325_v6 = vpack.c.bf16 %v1175_v0, %v1175_v0  ;;  %v8028_v0 = vld [vmem:[%s10156_s1 + $0x7f0] sm:$0xff] }
  0x9e   :  { %4885 = vmatpush.bf16.msra.mxu0 %v7902_v2  ;;  %v4679_v29 = vpop.f32.mrf.mxu0  ;;  %v1324_v2 = vpack.c.bf16 %v1174_v58, %v1174_v58  ;;  %v8029_v58 = vld [vmem:[%s10156_s1 + $0x7f8] sm:$0xff] }
  0x9f   :  { %4911 = vmatpush.bf16.msra.mxu2 %v7918_v3  ;;  %v4680_v32 = vadd.f32 %v8322_v26, %v4679_v29  ;;  %v1326_v3 = vpack.c.bf16 %v1176_v59, %v1176_v59  ;;  %v7977_v26 = vld [vmem:[%s10156_s1 + $0x658] sm:$0xff] }
  0xa0   :  { %4898 = vmatpush.bf16.msra.mxu1 %v7910_v8  ;;  %v4692_v33 = vpop.f32.mrf.mxu1  ;;  %v7972_v8 = vld [vmem:[%s10156_s1 + $0x630] sm:$0xff] }
  0xa1   :  { %4924 = vmatpush.bf16.msra.mxu3 %v7926_v9  ;;  %4886 = vmatmul.bf16.vlgmr.msra.gmra.mxu0 %v1320_v12  ;;  %v4693_v36 = vadd.f32 %v4692_v33, %v4680_v32  ;;  %v7988_v9 = vld [vmem:[%s10156_s1 + $0x6b0] sm:$0xff]  ;;  %v7971_v12 = vld [vmem:[%s10156_s1 + $0x628] sm:$0xff] }
  0xa2   :  { %4930 = vmatpush.bf16.msrb.mxu0 %v7941_v4  ;;  %4912 = vmatmul.bf16.vlgmr.msra.gmra.mxu2 %v1322_v13  ;;  %v7981_v4 = vld [vmem:[%s10156_s1 + $0x678] sm:$0xff]  ;;  %v7987_v13 = vld [vmem:[%s10156_s1 + $0x6a8] sm:$0xff] }
  0xa3   :  { %4956 = vmatpush.bf16.msrb.mxu2 %v7957_v7  ;;  %4899 = vmatmul.bf16.vlgmr.msra.gmra.mxu1 %v1321_v16  ;;  %v1327_v7 = vpack.c.bf16 %v1177_v1, %v1177_v1  ;;  %v7970_v16 = vld [vmem:[%s10156_s1 + $0x620] sm:$0xff]  ;;  %v8003_v1 = vld [vmem:[%s10156_s1 + $0x728] sm:$0xff] }
  0xa4   :  { %4943 = vmatpush.bf16.msrb.mxu1 %v7949_v14  ;;  %4925 = vmatmul.bf16.vlgmr.msra.gmra.mxu3 %v1323_v17  ;;  %v7979_v14 = vld [vmem:[%s10156_s1 + $0x668] sm:$0xff]  ;;  %v7986_v17 = vld [vmem:[%s10156_s1 + $0x6a0] sm:$0xff] }
  0xa5   :  { %4969 = vmatpush.bf16.msrb.mxu3 %v7965_v15  ;;  %v4705_v39 = vpop.f32.mrf.mxu2  ;;  %v7995_v15 = vld [vmem:[%s10156_s1 + $0x6e8] sm:$0xff] }
  0xa6   :  { %4931 = vmatpush.bf16.msrb.mxu0 %v7940_v18  ;;  %v4706_v42 = vadd.f32 %v4705_v39, %v4693_v36  ;;  %v4681_v44 = vpop.f32.mrf.mxu0  ;;  %v7992_v36 = vld [vmem:[%s10156_s1 + $0x6d0] sm:$0xff]  ;;  %v7967_v39 = vld [vmem:[%s10156_s1 + $0x608] sm:$0xff] }
  0xa7   :  { %4957 = vmatpush.bf16.msrb.mxu2 %v7956_v19  ;;  %v4718_v43 = vpop.f32.mrf.mxu3  ;;  %v7966_v44 = vld [vmem:[%s10156_s1 + $0x600] sm:$0xff] }
  0xa8   :  { %4944 = vmatpush.bf16.msrb.mxu1 %v7948_v20  ;;  %v8991_v47 = vadd.f32 %v4718_v43, %v4706_v42  ;;  %v4694_v49 = vpop.f32.mrf.mxu1  ;;  %v7978_v20 = vld [vmem:[%s10156_s1 + $0x660] sm:$0xff]  ;;  %v7991_v42 = vld [vmem:[%s10156_s1 + $0x6c8] sm:$0xff] }
  0xa9   :  { %4970 = vmatpush.bf16.msrb.mxu3 %v7964_v21  ;;  %v7994_v21 = vld [vmem:[%s10156_s1 + $0x6e0] sm:$0xff] }
  0xaa   :  { %4932 = vmatpush.bf16.msrb.mxu0 %v7939_v22 }
  0xab   :  { %4958 = vmatpush.bf16.msrb.mxu2 %v7955_v23 }
  0xac   :  { %4945 = vmatpush.bf16.msrb.mxu1 %v7947_v24  ;;  %v7969_v24 = vld [vmem:[%s10156_s1 + $0x618] sm:$0xff] }
  0xad   :  { %4971 = vmatpush.bf16.msrb.mxu3 %v7963_v25  ;;  %v4707_v57 = vpop.f32.mrf.mxu2  ;;  %v7985_v25 = vld [vmem:[%s10156_s1 + $0x698] sm:$0xff] }
  0xae   :  { %4933 = vmatpush.bf16.msrb.mxu0 %v7938_v27  ;;  %v7993_v27 = vld [vmem:[%s10156_s1 + $0x6d8] sm:$0xff] }
  0xaf   :  { %4959 = vmatpush.bf16.msrb.mxu2 %v7954_v28  ;;  %v4720_v63 = vpop.f32.mrf.mxu3  ;;  %v8013_v57 = vld [vmem:[%s10156_s1 + $0x778] sm:$0xff] }
  0xb0   :  { %4946 = vmatpush.bf16.msrb.mxu1 %v7946_v30  ;;  %v7968_v30 = vld [vmem:[%s10156_s1 + $0x610] sm:$0xff] }
  0xb1   :  { %4972 = vmatpush.bf16.msrb.mxu3 %v7962_v31  ;;  %v7984_v31 = vld [vmem:[%s10156_s1 + $0x690] sm:$0xff] }
  0xb2   :  { %4934 = vmatpush.bf16.msrb.mxu0 %v7937_v34  ;;  %v8012_v63 = vld [vmem:[%s10156_s1 + $0x770] sm:$0xff] }
  0xb3   :  { %4960 = vmatpush.bf16.msrb.mxu2 %v7953_v35  ;;  %v7976_v35 = vld [vmem:[%s10156_s1 + $0x650] sm:$0xff] }
  0xb4   :  { %4947 = vmatpush.bf16.msrb.mxu1 %v7945_v37 }
  0xb5   :  { %4973 = vmatpush.bf16.msrb.mxu3 %v7961_v38  ;;  %v23_v38 = vld [vmem:[%s10155_s0 + $0x38] sm:$0xff] }
  0xb6   :  { %4935 = vmatpush.bf16.msrb.mxu0 %v7936_v40  ;;  %1179 = vst [vmem:[#allocation1 + $0x20] ss:$4 sm:$0xff] %v23_v38  ;;  %v7983_v40 = vld [vmem:[%s10156_s1 + $0x688] sm:$0xff] }
  0xb7   :  { %4961 = vmatpush.bf16.msrb.mxu2 %v7952_v41  ;;  %v7975_v41 = vld [vmem:[%s10156_s1 + $0x648] sm:$0xff] }
  0xb8   :  { %4948 = vmatpush.bf16.msrb.mxu1 %v7944_v45  ;;  %v7982_v45 = vld [vmem:[%s10156_s1 + $0x680] sm:$0xff] }
  0xb9   :  { %4974 = vmatpush.bf16.msrb.mxu3 %v7960_v46  ;;  %v8005_v46 = vld [vmem:[%s10156_s1 + $0x738] sm:$0xff] }
  0xba   :  { %4936 = vmatpush.bf16.msrb.mxu0 %v7935_v50  ;;  %v8021_v50 = vld [vmem:[%s10156_s1 + $0x7b8] sm:$0xff] }
  0xbb   :  { %4962 = vmatpush.bf16.msrb.mxu2 %v7951_v51  ;;  %v7974_v51 = vld [vmem:[%s10156_s1 + $0x640] sm:$0xff] }
  0xbc   :  { %4949 = vmatpush.bf16.msrb.mxu1 %v7943_v52  ;;  %v7990_v52 = vld [vmem:[%s10156_s1 + $0x6c0] sm:$0xff] }
  0xbd   :  { %4975 = vmatpush.bf16.msrb.mxu3 %v7959_v53  ;;  %v1181_v53 = vld.sshfl [vmem:[#allocation1 + $0x8] sm:$0xff pattern:$0x73625140]  ;;  %v1186_v38 = vld.sshfl [vmem:[#allocation1 + $0x30] sm:$0xff pattern:$0x73625140] }
  0xbe   :  { %4937 = vmatpush.bf16.msrb.mxu0 %v7934_v54  ;;  %v4731_v18 = vpop.f32.mrf.mxu0  ;;  %v1183_v54 = vld.sshfl [vmem:[#allocation1 + $0x18] sm:$0xff pattern:$0x73625140]  ;;  %v1329_v59 = vpack.c.bf16 %v1181_v53, %v1181_v53  ;;  %v8060_v53 = vld [vmem:[%s10156_s1 + $0x8f0] sm:$0xff] }
  0xbf   :  { %4963 = vmatpush.bf16.msrb.mxu2 %v7950_v55  ;;  %v4732_v19 = vadd.f32 %v4731_v18, %v8991_v47  ;;  %v1180_v47 = vld.sshfl [vmem:[#allocation1] sm:$0xff pattern:$0x73625140]  ;;  %v8025_v18 = vld [vmem:[%s10156_s1 + $0x7d8] sm:$0xff] }
  0xc0   :  { %4950 = vmatpush.bf16.msrb.mxu1 %v7942_v61  ;;  %v4744_v22 = vpop.f32.mrf.mxu1  ;;  %v1328_v55 = vpack.c.bf16 %v1180_v47, %v1180_v47  ;;  %v8004_v61 = vld [vmem:[%s10156_s1 + $0x730] sm:$0xff]  ;;  %v8061_v47 = vld [vmem:[%s10156_s1 + $0x8f8] sm:$0xff] }
  0xc1   :  { %4976 = vmatpush.bf16.msrb.mxu3 %v7958_v62  ;;  %4938 = vmatmul.bf16.vlgmr.msrb.gmra.mxu0 %v1324_v2  ;;  %v4745_v23 = vadd.f32 %v4744_v22, %v4732_v19  ;;  %v8020_v62 = vld [vmem:[%s10156_s1 + $0x7b0] sm:$0xff]  ;;  %v8019_v2 = vld [vmem:[%s10156_s1 + $0x7a8] sm:$0xff] }
  0xc2   :  { %4982 = vmatpush.bf16.msra.mxu0 %v7973_v56  ;;  %4964 = vmatmul.bf16.vlgmr.msrb.gmra.mxu2 %v1326_v3  ;;  %v1330_v56 = vpack.c.bf16 %v1182_v48, %v1182_v48  ;;  %v8011_v3 = vld [vmem:[%s10156_s1 + $0x768] sm:$0xff]  ;;  %v8000_v22 = vld [vmem:[%s10156_s1 + $0x710] sm:$0xff] }
  0xc3   :  { %5008 = vmatpush.bf16.msra.mxu2 %v7989_v60  ;;  %4951 = vmatmul.bf16.vlgmr.msrb.gmra.mxu1 %v1325_v6  ;;  %v1331_v60 = vpack.c.bf16 %v1183_v54, %v1183_v54  ;;  %v8035_v54 = vld [vmem:[%s10156_s1 + $0x828] sm:$0xff] }
  0xc4   :  { %4995 = vmatpush.bf16.msra.mxu1 %v7981_v4  ;;  %4977 = vmatmul.bf16.vlgmr.msrb.gmra.mxu3 %v1327_v7  ;;  %v8027_v4 = vld [vmem:[%s10156_s1 + $0x7e8] sm:$0xff]  ;;  %v8002_v7 = vld [vmem:[%s10156_s1 + $0x720] sm:$0xff] }
  0xc5   :  { %5021 = vmatpush.bf16.msra.mxu3 %v7997_v5  ;;  %v4757_v28 = vpop.f32.mrf.mxu2 }
  0xc6   :  { %4983 = vmatpush.bf16.msra.mxu0 %v7972_v8  ;;  %v4758_v29 = vadd.f32 %v4757_v28, %v4745_v23  ;;  %v4733_v33 = vpop.f32.mrf.mxu0  ;;  %v8018_v8 = vld [vmem:[%s10156_s1 + $0x7a0] sm:$0xff]  ;;  %v8016_v23 = vld [vmem:[%s10156_s1 + $0x790] sm:$0xff]  ;;  %v7999_v28 = vld [vmem:[%s10156_s1 + $0x708] sm:$0xff] }
  0xc7   :  { %5009 = vmatpush.bf16.msra.mxu2 %v7988_v9  ;;  %v4770_v32 = vpop.f32.mrf.mxu3 }
  0xc8   :  { %4996 = vmatpush.bf16.msra.mxu1 %v7980_v10  ;;  %v9087_v34 = vadd.f32 %v4770_v32, %v4758_v29  ;;  %v4746_v37 = vpop.f32.mrf.mxu1  ;;  %v8015_v29 = vld [vmem:[%s10156_s1 + $0x788] sm:$0xff] }
  0xc9   :  { %5022 = vmatpush.bf16.msra.mxu3 %v7996_v11  ;;  %v8010_v11 = vld [vmem:[%s10156_s1 + $0x760] sm:$0xff]  ;;  %v8023_v32 = vld [vmem:[%s10156_s1 + $0x7c8] sm:$0xff] }
  0xca   :  { %4984 = vmatpush.bf16.msra.mxu0 %v7971_v12  ;;  %v8026_v12 = vld [vmem:[%s10156_s1 + $0x7e0] sm:$0xff] }
  0xcb   :  { %5010 = vmatpush.bf16.msra.mxu2 %v7987_v13  ;;  %v8001_v13 = vld [vmem:[%s10156_s1 + $0x718] sm:$0xff]  ;;  %v1184_v37 = vld.sshfl [vmem:[#allocation1 + $0x20] sm:$0xff pattern:$0x73625140] }
  0xcc   :  { %4997 = vmatpush.bf16.msra.mxu1 %v7979_v14  ;;  %v8017_v14 = vld [vmem:[%s10156_s1 + $0x798] sm:$0xff] }
  0xcd   :  { %5023 = vmatpush.bf16.msra.mxu3 %v7995_v15  ;;  %v4759_v43 = vpop.f32.mrf.mxu2 }
  0xce   :  { %4985 = vmatpush.bf16.msra.mxu0 %v7970_v16  ;;  %v1187_v43 = vld.sshfl [vmem:[#allocation1 + $0x38] sm:$0xff pattern:$0x73625140] }
  0xcf   :  { %5011 = vmatpush.bf16.msra.mxu2 %v7986_v17  ;;  %v4772_v49 = vpop.f32.mrf.mxu3  ;;  %v8009_v17 = vld [vmem:[%s10156_s1 + $0x758] sm:$0xff] }
  0xd0   :  { %4998 = vmatpush.bf16.msra.mxu1 %v7978_v20  ;;  %v1335_v49 = vpack.c.bf16 %v1187_v43, %v1187_v43  ;;  %v8067_v43 = vld [vmem:[%s10156_s1 + $0x928] sm:$0xff] }
  0xd1   :  { %5024 = vmatpush.bf16.msra.mxu3 %v7994_v21 }
  0xd2   :  { %4986 = vmatpush.bf16.msra.mxu0 %v7969_v24 }
  0xd3   :  { %5012 = vmatpush.bf16.msra.mxu2 %v7985_v25  ;;  %v8008_v25 = vld [vmem:[%s10156_s1 + $0x750] sm:$0xff] }
  0xd4   :  { %4999 = vmatpush.bf16.msra.mxu1 %v7977_v26  ;;  %v8024_v26 = vld [vmem:[%s10156_s1 + $0x7d0] sm:$0xff] }
  0xd5   :  { %5025 = vmatpush.bf16.msra.mxu3 %v7993_v27  ;;  %v24_v27 = vld [vmem:[%s10155_s0 + $0x40] sm:$0xff] }
  0xd6   :  { %4987 = vmatpush.bf16.msra.mxu0 %v7968_v30  ;;  %1188 = vst [vmem:[#allocation1] ss:$4 sm:$0xff] %v24_v27 }
  0xd7   :  { %5013 = vmatpush.bf16.msra.mxu2 %v7984_v31  ;;  %v8007_v31 = vld [vmem:[%s10156_s1 + $0x748] sm:$0xff] }
  0xd8   :  { %5000 = vmatpush.bf16.msra.mxu1 %v7976_v35  ;;  %v8014_v35 = vld [vmem:[%s10156_s1 + $0x780] sm:$0xff] }
  0xd9   :  { %5026 = vmatpush.bf16.msra.mxu3 %v7992_v36  ;;  %v8037_v36 = vld [vmem:[%s10156_s1 + $0x838] sm:$0xff] }
  0xda   :  { %4988 = vmatpush.bf16.msra.mxu0 %v7967_v39  ;;  %v8053_v39 = vld [vmem:[%s10156_s1 + $0x8b8] sm:$0xff] }
  0xdb   :  { %5014 = vmatpush.bf16.msra.mxu2 %v7983_v40  ;;  %v8006_v40 = vld [vmem:[%s10156_s1 + $0x740] sm:$0xff] }
  0xdc   :  { %5001 = vmatpush.bf16.msra.mxu1 %v7975_v41  ;;  %v8022_v41 = vld [vmem:[%s10156_s1 + $0x7c0] sm:$0xff] }
  0xdd   :  { %5027 = vmatpush.bf16.msra.mxu3 %v7991_v42  ;;  %v1185_v42 = vld.sshfl [vmem:[#allocation1 + $0x28] sm:$0xff pattern:$0x73625140]  ;;  %v1192_v27 = vld.sshfl [vmem:[#allocation1 + $0x10] sm:$0xff pattern:$0x73625140] }
  0xde   :  { %4989 = vmatpush.bf16.msra.mxu0 %v7966_v44  ;;  %v4783_v5 = vpop.f32.mrf.mxu0  ;;  %v1332_v44 = vpack.c.bf16 %v1184_v37, %v1184_v37  ;;  %v1333_v48 = vpack.c.bf16 %v1185_v42, %v1185_v42  ;;  %v8092_v42 = vld [vmem:[%s10156_s1 + $0x9f0] sm:$0xff] }
  0xdf   :  { %5015 = vmatpush.bf16.msra.mxu2 %v7982_v45  ;;  %v4784_v6 = vadd.f32 %v4783_v5, %v9087_v34  ;;  %v7998_v34 = vld [vmem:[%s10156_s1 + $0x700] sm:$0xff]  ;;  %v1334_v45 = vpack.c.bf16 %v1186_v38, %v1186_v38 }
  0xe0   :  { %5002 = vmatpush.bf16.msra.mxu1 %v7974_v51  ;;  %v4796_v9 = vpop.f32.mrf.mxu1  ;;  %v8052_v51 = vld [vmem:[%s10156_s1 + $0x8b0] sm:$0xff] }
  0xe1   :  { %5028 = vmatpush.bf16.msra.mxu3 %v7990_v52  ;;  %4990 = vmatmul.bf16.vlgmr.msra.gmra.mxu0 %v1328_v55  ;;  %v4797_v10 = vadd.f32 %v4796_v9, %v4784_v6  ;;  %v8044_v52 = vld [vmem:[%s10156_s1 + $0x870] sm:$0xff]  ;;  %v8051_v55 = vld [vmem:[%s10156_s1 + $0x8a8] sm:$0xff]  ;;  %v8041_v6 = vld [vmem:[%s10156_s1 + $0x858] sm:$0xff] }
  0xe2   :  { %5034 = vmatpush.bf16.msrb.mxu0 %v8005_v46  ;;  %5016 = vmatmul.bf16.vlgmr.msra.gmra.mxu2 %v1330_v56  ;;  %v8045_v46 = vld [vmem:[%s10156_s1 + $0x878] sm:$0xff]  ;;  %v8043_v56 = vld [vmem:[%s10156_s1 + $0x868] sm:$0xff] }
  0xe3   :  { %5060 = vmatpush.bf16.msrb.mxu2 %v8021_v50  ;;  %5003 = vmatmul.bf16.vlgmr.msra.gmra.mxu1 %v1329_v59  ;;  %v8036_v50 = vld [vmem:[%s10156_s1 + $0x830] sm:$0xff] }
  0xe4   :  { %5047 = vmatpush.bf16.msrb.mxu1 %v8013_v57  ;;  %5029 = vmatmul.bf16.vlgmr.msra.gmra.mxu3 %v1331_v60  ;;  %v8059_v57 = vld [vmem:[%s10156_s1 + $0x8e8] sm:$0xff]  ;;  %v8034_v60 = vld [vmem:[%s10156_s1 + $0x820] sm:$0xff] }
  0xe5   :  { %5073 = vmatpush.bf16.msrb.mxu3 %v8029_v58  ;;  %v4809_v15 = vpop.f32.mrf.mxu2 }
  0xe6   :  { %5035 = vmatpush.bf16.msrb.mxu0 %v8004_v61  ;;  %v4810_v16 = vadd.f32 %v4809_v15, %v4797_v10  ;;  %v4785_v20 = vpop.f32.mrf.mxu0  ;;  %v8050_v61 = vld [vmem:[%s10156_s1 + $0x8a0] sm:$0xff]  ;;  %v8056_v15 = vld [vmem:[%s10156_s1 + $0x8d0] sm:$0xff] }
  0xe7   :  { %5061 = vmatpush.bf16.msrb.mxu2 %v8020_v62  ;;  %v4822_v19 = vpop.f32.mrf.mxu3  ;;  %v8039_v20 = vld [vmem:[%s10156_s1 + $0x848] sm:$0xff] }
  0xe8   :  { %5048 = vmatpush.bf16.msrb.mxu1 %v8012_v63  ;;  %v9183_v21 = vadd.f32 %v4822_v19, %v4810_v16  ;;  %v4798_v24 = vpop.f32.mrf.mxu1  ;;  %v25_v16 = vld [vmem:[%s10155_s0 + $0x48] sm:$0xff] }
  0xe9   :  { %5074 = vmatpush.bf16.msrb.mxu3 %v8028_v0  ;;  %v8042_v0 = vld [vmem:[%s10156_s1 + $0x860] sm:$0xff]  ;;  %1189 = vst [vmem:[#allocation1 + $0x20] ss:$4 sm:$0xff] %v25_v16 }
  0xea   :  { %5036 = vmatpush.bf16.msrb.mxu0 %v8003_v1  ;;  %v8058_v1 = vld [vmem:[%s10156_s1 + $0x8e0] sm:$0xff] }
  0xeb   :  { %5062 = vmatpush.bf16.msrb.mxu2 %v8019_v2  ;;  %v8033_v2 = vld [vmem:[%s10156_s1 + $0x818] sm:$0xff]  ;;  %v8046_v24 = vld [vmem:[%s10156_s1 + $0x880] sm:$0xff] }
  0xec   :  { %5049 = vmatpush.bf16.msrb.mxu1 %v8011_v3  ;;  %v8049_v3 = vld [vmem:[%s10156_s1 + $0x898] sm:$0xff] }
  0xed   :  { %5075 = vmatpush.bf16.msrb.mxu3 %v8027_v4  ;;  %v4811_v30 = vpop.f32.mrf.mxu2 }
  0xee   :  { %5037 = vmatpush.bf16.msrb.mxu0 %v8002_v7  ;;  %v8057_v7 = vld [vmem:[%s10156_s1 + $0x8d8] sm:$0xff]  ;;  %v8054_v30 = vld [vmem:[%s10156_s1 + $0x8c0] sm:$0xff] }
  0xef   :  { %5063 = vmatpush.bf16.msrb.mxu2 %v8018_v8  ;;  %v4824_v33 = vpop.f32.mrf.mxu3 }
  0xf0   :  { %5050 = vmatpush.bf16.msrb.mxu1 %v8010_v11  ;;  %v8032_v11 = vld [vmem:[%s10156_s1 + $0x810] sm:$0xff] }
  0xf1   :  { %5076 = vmatpush.bf16.msrb.mxu3 %v8026_v12  ;;  %v8048_v12 = vld [vmem:[%s10156_s1 + $0x890] sm:$0xff] }
  0xf2   :  { %5038 = vmatpush.bf16.msrb.mxu0 %v8001_v13  ;;  %v1196_v16 = vld.sshfl [vmem:[#allocation1 + $0x30] sm:$0xff pattern:$0x73625140] }
  0xf3   :  { %5064 = vmatpush.bf16.msrb.mxu2 %v8017_v14  ;;  %v8040_v14 = vld [vmem:[%s10156_s1 + $0x850] sm:$0xff] }
  0xf4   :  { %5051 = vmatpush.bf16.msrb.mxu1 %v8009_v17  ;;  %v8031_v17 = vld [vmem:[%s10156_s1 + $0x808] sm:$0xff] }
  0xf5   :  { %5077 = vmatpush.bf16.msrb.mxu3 %v8025_v18  ;;  %v8047_v18 = vld [vmem:[%s10156_s1 + $0x888] sm:$0xff] }
  0xf6   :  { %5039 = vmatpush.bf16.msrb.mxu0 %v8000_v22 }
  0xf7   :  { %5065 = vmatpush.bf16.msrb.mxu2 %v8016_v23  ;;  %v8030_v23 = vld [vmem:[%s10156_s1 + $0x800] sm:$0xff] }
  0xf8   :  { %5052 = vmatpush.bf16.msrb.mxu1 %v8008_v25  ;;  %v8069_v25 = vld [vmem:[%s10156_s1 + $0x938] sm:$0xff] }
  0xf9   :  { %5078 = vmatpush.bf16.msrb.mxu3 %v8024_v26  ;;  %v1190_v26 = vld.sshfl [vmem:[#allocation1] sm:$0xff pattern:$0x73625140] }
  0xfa   :  { %5040 = vmatpush.bf16.msrb.mxu0 %v7999_v28  ;;  %v8085_v28 = vld [vmem:[%s10156_s1 + $0x9b8] sm:$0xff]  ;;  %v1336_v33 = vpack.c.bf16 %v1190_v26, %v1190_v26 }
  0xfb   :  { %5066 = vmatpush.bf16.msrb.mxu2 %v8015_v29  ;;  %v8038_v29 = vld [vmem:[%s10156_s1 + $0x840] sm:$0xff] }
  0xfc   :  { %5053 = vmatpush.bf16.msrb.mxu1 %v8007_v31  ;;  %v1191_v31 = vld.sshfl [vmem:[#allocation1 + $0x8] sm:$0xff pattern:$0x73625140] }
  0xfd   :  { %5079 = vmatpush.bf16.msrb.mxu3 %v8023_v32  ;;  %v1193_v32 = vld.sshfl [vmem:[#allocation1 + $0x18] sm:$0xff pattern:$0x73625140]  ;;  %v1337_v37 = vpack.c.bf16 %v1191_v31, %v1191_v31  ;;  %v8124_v31 = vld [vmem:[%s10156_s1 + $0xaf0] sm:$0xff] }
  0xfe   :  { %5041 = vmatpush.bf16.msrb.mxu0 %v7998_v34  ;;  %v4835_v58 = vpop.f32.mrf.mxu0  ;;  %v1338_v34 = vpack.c.bf16 %v1192_v27, %v1192_v27  ;;  %v1339_v38 = vpack.c.bf16 %v1193_v32, %v1193_v32  ;;  %v8099_v32 = vld [vmem:[%s10156_s1 + $0xa28] sm:$0xff] }
  0xff   :  { %5067 = vmatpush.bf16.msrb.mxu2 %v8014_v35  ;;  %v4836_v59 = vadd.f32 %v4835_v58, %v9183_v21  ;;  %v8055_v21 = vld [vmem:[%s10156_s1 + $0x8c8] sm:$0xff]  ;;  %v8077_v35 = vld [vmem:[%s10156_s1 + $0x978] sm:$0xff] }
 0x100   :  { %5054 = vmatpush.bf16.msrb.mxu1 %v8006_v40  ;;  %v4848_v62 = vpop.f32.mrf.mxu1  ;;  %v8084_v40 = vld [vmem:[%s10156_s1 + $0x9b0] sm:$0xff] }
 0x101   :  { %5080 = vmatpush.bf16.msrb.mxu3 %v8022_v41  ;;  %5042 = vmatmul.bf16.vlgmr.msrb.gmra.mxu0 %v1332_v44  ;;  %v4849_v63 = vadd.f32 %v4848_v62, %v4836_v59  ;;  %v8076_v41 = vld [vmem:[%s10156_s1 + $0x970] sm:$0xff]  ;;  %v8083_v44 = vld [vmem:[%s10156_s1 + $0x9a8] sm:$0xff]  ;;  %v8073_v59 = vld [vmem:[%s10156_s1 + $0x958] sm:$0xff] }
 0x102   :  { %5086 = vmatpush.bf16.msra.mxu0 %v8037_v36  ;;  %5068 = vmatmul.bf16.vlgmr.msrb.gmra.mxu2 %v1334_v45  ;;  %v8093_v36 = vld [vmem:[%s10156_s1 + $0x9f8] sm:$0xff]  ;;  %v8075_v45 = vld [vmem:[%s10156_s1 + $0x968] sm:$0xff] }
 0x103   :  { %5112 = vmatpush.bf16.msra.mxu2 %v8053_v39  ;;  %5055 = vmatmul.bf16.vlgmr.msrb.gmra.mxu1 %v1333_v48  ;;  %v8068_v39 = vld [vmem:[%s10156_s1 + $0x930] sm:$0xff] }
 0x104   :  { %5099 = vmatpush.bf16.msra.mxu1 %v8045_v46  ;;  %5081 = vmatmul.bf16.vlgmr.msrb.gmra.mxu3 %v1335_v49  ;;  %v8091_v46 = vld [vmem:[%s10156_s1 + $0x9e8] sm:$0xff]  ;;  %v8066_v49 = vld [vmem:[%s10156_s1 + $0x920] sm:$0xff] }
 0x105   :  { %5125 = vmatpush.bf16.msra.mxu3 %v8061_v47  ;;  %v4861_v4 = vpop.f32.mrf.mxu2 }
 0x106   :  { %5087 = vmatpush.bf16.msra.mxu0 %v8036_v50  ;;  %v4862_v5 = vadd.f32 %v4861_v4, %v4849_v63  ;;  %v4837_v9 = vpop.f32.mrf.mxu0  ;;  %v8082_v50 = vld [vmem:[%s10156_s1 + $0x9a0] sm:$0xff]  ;;  %v8088_v4 = vld [vmem:[%s10156_s1 + $0x9d0] sm:$0xff] }
 0x107   :  { %5113 = vmatpush.bf16.msra.mxu2 %v8052_v51  ;;  %v4874_v8 = vpop.f32.mrf.mxu3  ;;  %v8071_v9 = vld [vmem:[%s10156_s1 + $0x948] sm:$0xff] }
 0x108   :  { %5100 = vmatpush.bf16.msra.mxu1 %v8044_v52  ;;  %v9285_v10 = vadd.f32 %v4874_v8, %v4862_v5  ;;  %v4850_v13 = vpop.f32.mrf.mxu1  ;;  %v26_v5 = vld [vmem:[%s10155_s0 + $0x50] sm:$0xff] }
 0x109   :  { %5126 = vmatpush.bf16.msra.mxu3 %v8060_v53  ;;  %v8074_v53 = vld [vmem:[%s10156_s1 + $0x960] sm:$0xff]  ;;  %1198 = vst [vmem:[#allocation1] ss:$4 sm:$0xff] %v26_v5 }
 0x10a   :  { %5088 = vmatpush.bf16.msra.mxu0 %v8035_v54  ;;  %v8090_v54 = vld [vmem:[%s10156_s1 + $0x9e0] sm:$0xff] }
 0x10b   :  { %5114 = vmatpush.bf16.msra.mxu2 %v8051_v55  ;;  %v8065_v55 = vld [vmem:[%s10156_s1 + $0x918] sm:$0xff]  ;;  %v8078_v13 = vld [vmem:[%s10156_s1 + $0x980] sm:$0xff] }
 0x10c   :  { %5101 = vmatpush.bf16.msra.mxu1 %v8043_v56  ;;  %v8081_v56 = vld [vmem:[%s10156_s1 + $0x998] sm:$0xff] }
 0x10d   :  { %5127 = vmatpush.bf16.msra.mxu3 %v8059_v57  ;;  %v4863_v19 = vpop.f32.mrf.mxu2 }
 0x10e   :  { %5089 = vmatpush.bf16.msra.mxu0 %v8034_v60  ;;  %v8089_v60 = vld [vmem:[%s10156_s1 + $0x9d8] sm:$0xff]  ;;  %v8086_v19 = vld [vmem:[%s10156_s1 + $0x9c0] sm:$0xff] }
 0x10f   :  { %5115 = vmatpush.bf16.msra.mxu2 %v8050_v61  ;;  %v4876_v22 = vpop.f32.mrf.mxu3 }
 0x110   :  { %5102 = vmatpush.bf16.msra.mxu1 %v8042_v0  ;;  %v8064_v0 = vld [vmem:[%s10156_s1 + $0x910] sm:$0xff] }
 0x111   :  { %5128 = vmatpush.bf16.msra.mxu3 %v8058_v1  ;;  %v8080_v1 = vld [vmem:[%s10156_s1 + $0x990] sm:$0xff] }
 0x112   :  { %5090 = vmatpush.bf16.msra.mxu0 %v8033_v2  ;;  %v1202_v5 = vld.sshfl [vmem:[#allocation1 + $0x10] sm:$0xff pattern:$0x73625140] }
 0x113   :  { %5116 = vmatpush.bf16.msra.mxu2 %v8049_v3  ;;  %v8072_v3 = vld [vmem:[%s10156_s1 + $0x950] sm:$0xff] }
 0x114   :  { %5103 = vmatpush.bf16.msra.mxu1 %v8041_v6  ;;  %v8063_v6 = vld [vmem:[%s10156_s1 + $0x908] sm:$0xff] }
 0x115   :  { %5129 = vmatpush.bf16.msra.mxu3 %v8057_v7  ;;  %v8079_v7 = vld [vmem:[%s10156_s1 + $0x988] sm:$0xff] }
 0x116   :  { %5091 = vmatpush.bf16.msra.mxu0 %v8032_v11 }
 0x117   :  { %5117 = vmatpush.bf16.msra.mxu2 %v8048_v12  ;;  %v8062_v12 = vld [vmem:[%s10156_s1 + $0x900] sm:$0xff] }
 0x118   :  { %5104 = vmatpush.bf16.msra.mxu1 %v8040_v14  ;;  %v8101_v14 = vld [vmem:[%s10156_s1 + $0xa38] sm:$0xff] }
 0x119   :  { %5130 = vmatpush.bf16.msra.mxu3 %v8056_v15  ;;  %v1194_v15 = vld.sshfl [vmem:[#allocation1 + $0x20] sm:$0xff pattern:$0x73625140] }
 0x11a   :  { %5092 = vmatpush.bf16.msra.mxu0 %v8031_v17  ;;  %v8117_v17 = vld [vmem:[%s10156_s1 + $0xab8] sm:$0xff]  ;;  %v1340_v22 = vpack.c.bf16 %v1194_v15, %v1194_v15 }
 0x11b   :  { %5118 = vmatpush.bf16.msra.mxu2 %v8047_v18  ;;  %v8070_v18 = vld [vmem:[%s10156_s1 + $0x940] sm:$0xff] }
 0x11c   :  { %5105 = vmatpush.bf16.msra.mxu1 %v8039_v20  ;;  %v1195_v20 = vld.sshfl [vmem:[#allocation1 + $0x28] sm:$0xff pattern:$0x73625140] }
 0x11d   :  { %5131 = vmatpush.bf16.msra.mxu3 %v8055_v21  ;;  %v1197_v21 = vld.sshfl [vmem:[#allocation1 + $0x38] sm:$0xff pattern:$0x73625140]  ;;  %v1341_v26 = vpack.c.bf16 %v1195_v20, %v1195_v20  ;;  %v8156_v20 = vld [vmem:[%s10156_s1 + $0xbf0] sm:$0xff] }
 0x11e   :  { %5093 = vmatpush.bf16.msra.mxu0 %v8030_v23  ;;  %v4887_v47 = vpop.f32.mrf.mxu0  ;;  %v1342_v23 = vpack.c.bf16 %v1196_v16, %v1196_v16  ;;  %v1343_v27 = vpack.c.bf16 %v1197_v21, %v1197_v21  ;;  %v8131_v21 = vld [vmem:[%s10156_s1 + $0xb28] sm:$0xff] }
 0x11f   :  { %5119 = vmatpush.bf16.msra.mxu2 %v8046_v24  ;;  %v4888_v48 = vadd.f32 %v4887_v47, %v9285_v10  ;;  %v8087_v10 = vld [vmem:[%s10156_s1 + $0x9c8] sm:$0xff]  ;;  %v8109_v24 = vld [vmem:[%s10156_s1 + $0xa78] sm:$0xff] }
 0x120   :  { %5106 = vmatpush.bf16.msra.mxu1 %v8038_v29  ;;  %v4900_v51 = vpop.f32.mrf.mxu1  ;;  %v8116_v29 = vld [vmem:[%s10156_s1 + $0xab0] sm:$0xff] }
 0x121   :  { %5132 = vmatpush.bf16.msra.mxu3 %v8054_v30  ;;  %5094 = vmatmul.bf16.vlgmr.msra.gmra.mxu0 %v1336_v33  ;;  %v4901_v52 = vadd.f32 %v4900_v51, %v4888_v48  ;;  %v8108_v30 = vld [vmem:[%s10156_s1 + $0xa70] sm:$0xff]  ;;  %v8115_v33 = vld [vmem:[%s10156_s1 + $0xaa8] sm:$0xff]  ;;  %v8105_v48 = vld [vmem:[%s10156_s1 + $0xa58] sm:$0xff] }
 0x122   :  { %5138 = vmatpush.bf16.msrb.mxu0 %v8069_v25  ;;  %5120 = vmatmul.bf16.vlgmr.msra.gmra.mxu2 %v1338_v34  ;;  %v8125_v25 = vld [vmem:[%s10156_s1 + $0xaf8] sm:$0xff]  ;;  %v8107_v34 = vld [vmem:[%s10156_s1 + $0xa68] sm:$0xff] }
 0x123   :  { %5164 = vmatpush.bf16.msrb.mxu2 %v8085_v28  ;;  %5107 = vmatmul.bf16.vlgmr.msra.gmra.mxu1 %v1337_v37  ;;  %v8100_v28 = vld [vmem:[%s10156_s1 + $0xa30] sm:$0xff] }
 0x124   :  { %5151 = vmatpush.bf16.msrb.mxu1 %v8077_v35  ;;  %5133 = vmatmul.bf16.vlgmr.msra.gmra.mxu3 %v1339_v38  ;;  %v8123_v35 = vld [vmem:[%s10156_s1 + $0xae8] sm:$0xff]  ;;  %v8098_v38 = vld [vmem:[%s10156_s1 + $0xa20] sm:$0xff] }
 0x125   :  { %5177 = vmatpush.bf16.msrb.mxu3 %v8093_v36  ;;  %v4913_v57 = vpop.f32.mrf.mxu2 }
 0x126   :  { %5139 = vmatpush.bf16.msrb.mxu0 %v8068_v39  ;;  %v4914_v58 = vadd.f32 %v4913_v57, %v4901_v52  ;;  %v4889_v62 = vpop.f32.mrf.mxu0  ;;  %v8114_v39 = vld [vmem:[%s10156_s1 + $0xaa0] sm:$0xff]  ;;  %v8120_v57 = vld [vmem:[%s10156_s1 + $0xad0] sm:$0xff] }
 0x127   :  { %5165 = vmatpush.bf16.msrb.mxu2 %v8084_v40  ;;  %v4926_v61 = vpop.f32.mrf.mxu3  ;;  %v8103_v62 = vld [vmem:[%s10156_s1 + $0xa48] sm:$0xff] }
 0x128   :  { %5152 = vmatpush.bf16.msrb.mxu1 %v8076_v41  ;;  %v9387_v63 = vadd.f32 %v4926_v61, %v4914_v58  ;;  %v4902_v2 = vpop.f32.mrf.mxu1  ;;  %v27_v58 = vld [vmem:[%s10155_s0 + $0x58] sm:$0xff] }
 0x129   :  { %5178 = vmatpush.bf16.msrb.mxu3 %v8092_v42  ;;  %v8106_v42 = vld [vmem:[%s10156_s1 + $0xa60] sm:$0xff]  ;;  %1199 = vst [vmem:[#allocation1 + $0x20] ss:$4 sm:$0xff] %v27_v58 }
 0x12a   :  { %5140 = vmatpush.bf16.msrb.mxu0 %v8067_v43  ;;  %v8122_v43 = vld [vmem:[%s10156_s1 + $0xae0] sm:$0xff] }
 0x12b   :  { %5166 = vmatpush.bf16.msrb.mxu2 %v8083_v44  ;;  %v8097_v44 = vld [vmem:[%s10156_s1 + $0xa18] sm:$0xff]  ;;  %v8110_v2 = vld [vmem:[%s10156_s1 + $0xa80] sm:$0xff] }
 0x12c   :  { %5153 = vmatpush.bf16.msrb.mxu1 %v8075_v45  ;;  %v8113_v45 = vld [vmem:[%s10156_s1 + $0xa98] sm:$0xff] }
 0x12d   :  { %5179 = vmatpush.bf16.msrb.mxu3 %v8091_v46  ;;  %v4915_v8 = vpop.f32.mrf.mxu2 }
 0x12e   :  { %5141 = vmatpush.bf16.msrb.mxu0 %v8066_v49  ;;  %v8121_v49 = vld [vmem:[%s10156_s1 + $0xad8] sm:$0xff]  ;;  %v8118_v8 = vld [vmem:[%s10156_s1 + $0xac0] sm:$0xff] }
 0x12f   :  { %5167 = vmatpush.bf16.msrb.mxu2 %v8082_v50  ;;  %v4928_v11 = vpop.f32.mrf.mxu3 }
 0x130   :  { %5154 = vmatpush.bf16.msrb.mxu1 %v8074_v53  ;;  %v8096_v53 = vld [vmem:[%s10156_s1 + $0xa10] sm:$0xff] }
 0x131   :  { %5180 = vmatpush.bf16.msrb.mxu3 %v8090_v54  ;;  %v8112_v54 = vld [vmem:[%s10156_s1 + $0xa90] sm:$0xff] }
 0x132   :  { %5142 = vmatpush.bf16.msrb.mxu0 %v8065_v55  ;;  %v1206_v58 = vld.sshfl [vmem:[#allocation1 + $0x30] sm:$0xff pattern:$0x73625140] }
 0x133   :  { %5168 = vmatpush.bf16.msrb.mxu2 %v8081_v56  ;;  %v8104_v56 = vld [vmem:[%s10156_s1 + $0xa50] sm:$0xff] }
 0x134   :  { %5155 = vmatpush.bf16.msrb.mxu1 %v8073_v59  ;;  %v8095_v59 = vld [vmem:[%s10156_s1 + $0xa08] sm:$0xff] }
 0x135   :  { %5181 = vmatpush.bf16.msrb.mxu3 %v8089_v60  ;;  %v8111_v60 = vld [vmem:[%s10156_s1 + $0xa88] sm:$0xff] }
 0x136   :  { %5143 = vmatpush.bf16.msrb.mxu0 %v8064_v0 }
 0x137   :  { %5169 = vmatpush.bf16.msrb.mxu2 %v8080_v1  ;;  %v8094_v1 = vld [vmem:[%s10156_s1 + $0xa00] sm:$0xff] }
 0x138   :  { %5156 = vmatpush.bf16.msrb.mxu1 %v8072_v3  ;;  %v8133_v3 = vld [vmem:[%s10156_s1 + $0xb38] sm:$0xff] }
 0x139   :  { %5182 = vmatpush.bf16.msrb.mxu3 %v8088_v4  ;;  %v1200_v4 = vld.sshfl [vmem:[#allocation1] sm:$0xff pattern:$0x73625140] }
 0x13a   :  { %5144 = vmatpush.bf16.msrb.mxu0 %v8063_v6  ;;  %v8149_v6 = vld [vmem:[%s10156_s1 + $0xbb8] sm:$0xff]  ;;  %v1344_v11 = vpack.c.bf16 %v1200_v4, %v1200_v4 }
 0x13b   :  { %5170 = vmatpush.bf16.msrb.mxu2 %v8079_v7  ;;  %v8102_v7 = vld [vmem:[%s10156_s1 + $0xa40] sm:$0xff] }
 0x13c   :  { %5157 = vmatpush.bf16.msrb.mxu1 %v8071_v9  ;;  %v1201_v9 = vld.sshfl [vmem:[#allocation1 + $0x8] sm:$0xff pattern:$0x73625140] }
 0x13d   :  { %5183 = vmatpush.bf16.msrb.mxu3 %v8087_v10  ;;  %v1203_v10 = vld.sshfl [vmem:[#allocation1 + $0x18] sm:$0xff pattern:$0x73625140]  ;;  %v1345_v15 = vpack.c.bf16 %v1201_v9, %v1201_v9  ;;  %v8188_v9 = vld [vmem:[%s10156_s1 + $0xcf0] sm:$0xff] }
 0x13e   :  { %5145 = vmatpush.bf16.msrb.mxu0 %v8062_v12  ;;  %v4939_v36 = vpop.f32.mrf.mxu0  ;;  %v1346_v12 = vpack.c.bf16 %v1202_v5, %v1202_v5  ;;  %v1347_v16 = vpack.c.bf16 %v1203_v10, %v1203_v10  ;;  %v8163_v10 = vld [vmem:[%s10156_s1 + $0xc28] sm:$0xff] }
 0x13f   :  { %5171 = vmatpush.bf16.msrb.mxu2 %v8078_v13  ;;  %v4940_v37 = vadd.f32 %v4939_v36, %v9387_v63  ;;  %v8119_v63 = vld [vmem:[%s10156_s1 + $0xac8] sm:$0xff]  ;;  %v8141_v13 = vld [vmem:[%s10156_s1 + $0xb78] sm:$0xff] }
 0x140   :  { %5158 = vmatpush.bf16.msrb.mxu1 %v8070_v18  ;;  %v4952_v40 = vpop.f32.mrf.mxu1  ;;  %v8148_v18 = vld [vmem:[%s10156_s1 + $0xbb0] sm:$0xff] }
 0x141   :  { %5184 = vmatpush.bf16.msrb.mxu3 %v8086_v19  ;;  %5146 = vmatmul.bf16.vlgmr.msrb.gmra.mxu0 %v1340_v22  ;;  %v4953_v41 = vadd.f32 %v4952_v40, %v4940_v37  ;;  %v8140_v19 = vld [vmem:[%s10156_s1 + $0xb70] sm:$0xff]  ;;  %v8147_v22 = vld [vmem:[%s10156_s1 + $0xba8] sm:$0xff]  ;;  %v8137_v37 = vld [vmem:[%s10156_s1 + $0xb58] sm:$0xff] }
 0x142   :  { %5190 = vmatpush.bf16.msra.mxu0 %v8101_v14  ;;  %5172 = vmatmul.bf16.vlgmr.msrb.gmra.mxu2 %v1342_v23  ;;  %v8157_v14 = vld [vmem:[%s10156_s1 + $0xbf8] sm:$0xff]  ;;  %v8139_v23 = vld [vmem:[%s10156_s1 + $0xb68] sm:$0xff] }
 0x143   :  { %5216 = vmatpush.bf16.msra.mxu2 %v8117_v17  ;;  %5159 = vmatmul.bf16.vlgmr.msrb.gmra.mxu1 %v1341_v26  ;;  %v8132_v17 = vld [vmem:[%s10156_s1 + $0xb30] sm:$0xff] }
 0x144   :  { %5203 = vmatpush.bf16.msra.mxu1 %v8109_v24  ;;  %5185 = vmatmul.bf16.vlgmr.msrb.gmra.mxu3 %v1343_v27  ;;  %v8155_v24 = vld [vmem:[%s10156_s1 + $0xbe8] sm:$0xff]  ;;  %v8130_v27 = vld [vmem:[%s10156_s1 + $0xb20] sm:$0xff] }
 0x145   :  { %5229 = vmatpush.bf16.msra.mxu3 %v8125_v25  ;;  %v4965_v46 = vpop.f32.mrf.mxu2 }
 0x146   :  { %5191 = vmatpush.bf16.msra.mxu0 %v8100_v28  ;;  %v4966_v47 = vadd.f32 %v4965_v46, %v4953_v41  ;;  %v4941_v51 = vpop.f32.mrf.mxu0  ;;  %v8146_v28 = vld [vmem:[%s10156_s1 + $0xba0] sm:$0xff]  ;;  %v8152_v46 = vld [vmem:[%s10156_s1 + $0xbd0] sm:$0xff] }
 0x147   :  { %5217 = vmatpush.bf16.msra.mxu2 %v8116_v29  ;;  %v4978_v50 = vpop.f32.mrf.mxu3  ;;  %v8135_v51 = vld [vmem:[%s10156_s1 + $0xb48] sm:$0xff] }
 0x148   :  { %5204 = vmatpush.bf16.msra.mxu1 %v8108_v30  ;;  %v9489_v52 = vadd.f32 %v4978_v50, %v4966_v47  ;;  %v4954_v55 = vpop.f32.mrf.mxu1  ;;  %v28_v47 = vld [vmem:[%s10155_s0 + $0x60] sm:$0xff] }
 0x149   :  { %5230 = vmatpush.bf16.msra.mxu3 %v8124_v31  ;;  %v8138_v31 = vld [vmem:[%s10156_s1 + $0xb60] sm:$0xff]  ;;  %1208 = vst [vmem:[#allocation1] ss:$4 sm:$0xff] %v28_v47 }
 0x14a   :  { %5192 = vmatpush.bf16.msra.mxu0 %v8099_v32  ;;  %v8154_v32 = vld [vmem:[%s10156_s1 + $0xbe0] sm:$0xff] }
 0x14b   :  { %5218 = vmatpush.bf16.msra.mxu2 %v8115_v33  ;;  %v8129_v33 = vld [vmem:[%s10156_s1 + $0xb18] sm:$0xff]  ;;  %v8142_v55 = vld [vmem:[%s10156_s1 + $0xb80] sm:$0xff] }
 0x14c   :  { %5205 = vmatpush.bf16.msra.mxu1 %v8107_v34  ;;  %v8145_v34 = vld [vmem:[%s10156_s1 + $0xb98] sm:$0xff] }
 0x14d   :  { %5231 = vmatpush.bf16.msra.mxu3 %v8123_v35  ;;  %v4967_v61 = vpop.f32.mrf.mxu2 }
 0x14e   :  { %5193 = vmatpush.bf16.msra.mxu0 %v8098_v38  ;;  %v8153_v38 = vld [vmem:[%s10156_s1 + $0xbd8] sm:$0xff]  ;;  %v8150_v61 = vld [vmem:[%s10156_s1 + $0xbc0] sm:$0xff] }
 0x14f   :  { %5219 = vmatpush.bf16.msra.mxu2 %v8114_v39  ;;  %v4980_v0 = vpop.f32.mrf.mxu3 }
 0x150   :  { %5206 = vmatpush.bf16.msra.mxu1 %v8106_v42  ;;  %v8128_v42 = vld [vmem:[%s10156_s1 + $0xb10] sm:$0xff] }
 0x151   :  { %5232 = vmatpush.bf16.msra.mxu3 %v8122_v43  ;;  %v8144_v43 = vld [vmem:[%s10156_s1 + $0xb90] sm:$0xff] }
 0x152   :  { %5194 = vmatpush.bf16.msra.mxu0 %v8097_v44  ;;  %v1212_v47 = vld.sshfl [vmem:[#allocation1 + $0x10] sm:$0xff pattern:$0x73625140] }
 0x153   :  { %5220 = vmatpush.bf16.msra.mxu2 %v8113_v45  ;;  %v8136_v45 = vld [vmem:[%s10156_s1 + $0xb50] sm:$0xff] }
 0x154   :  { %5207 = vmatpush.bf16.msra.mxu1 %v8105_v48  ;;  %v8127_v48 = vld [vmem:[%s10156_s1 + $0xb08] sm:$0xff] }
 0x155   :  { %5233 = vmatpush.bf16.msra.mxu3 %v8121_v49  ;;  %v8143_v49 = vld [vmem:[%s10156_s1 + $0xb88] sm:$0xff] }
 0x156   :  { %5195 = vmatpush.bf16.msra.mxu0 %v8096_v53 }
 0x157   :  { %5221 = vmatpush.bf16.msra.mxu2 %v8112_v54  ;;  %v8126_v54 = vld [vmem:[%s10156_s1 + $0xb00] sm:$0xff] }
 0x158   :  { %5208 = vmatpush.bf16.msra.mxu1 %v8104_v56  ;;  %v8165_v56 = vld [vmem:[%s10156_s1 + $0xc38] sm:$0xff] }
 0x159   :  { %5234 = vmatpush.bf16.msra.mxu3 %v8120_v57  ;;  %v1204_v57 = vld.sshfl [vmem:[#allocation1 + $0x20] sm:$0xff pattern:$0x73625140] }
 0x15a   :  { %5196 = vmatpush.bf16.msra.mxu0 %v8095_v59  ;;  %v8181_v59 = vld [vmem:[%s10156_s1 + $0xcb8] sm:$0xff]  ;;  %v1348_v0 = vpack.c.bf16 %v1204_v57, %v1204_v57 }
 0x15b   :  { %5222 = vmatpush.bf16.msra.mxu2 %v8111_v60  ;;  %v8134_v60 = vld [vmem:[%s10156_s1 + $0xb40] sm:$0xff] }
 0x15c   :  { %5209 = vmatpush.bf16.msra.mxu1 %v8103_v62  ;;  %v1205_v62 = vld.sshfl [vmem:[#allocation1 + $0x28] sm:$0xff pattern:$0x73625140] }
 0x15d   :  { %5235 = vmatpush.bf16.msra.mxu3 %v8119_v63  ;;  %v1207_v63 = vld.sshfl [vmem:[#allocation1 + $0x38] sm:$0xff pattern:$0x73625140]  ;;  %v1349_v4 = vpack.c.bf16 %v1205_v62, %v1205_v62  ;;  %v8220_v62 = vld [vmem:[%s10156_s1 + $0xdf0] sm:$0xff] }
 0x15e   :  { %5197 = vmatpush.bf16.msra.mxu0 %v8094_v1  ;;  %v4991_v25 = vpop.f32.mrf.mxu0  ;;  %v1350_v1 = vpack.c.bf16 %v1206_v58, %v1206_v58  ;;  %v1351_v5 = vpack.c.bf16 %v1207_v63, %v1207_v63  ;;  %v8195_v63 = vld [vmem:[%s10156_s1 + $0xd28] sm:$0xff] }
 0x15f   :  { %5223 = vmatpush.bf16.msra.mxu2 %v8110_v2  ;;  %v4992_v26 = vadd.f32 %v4991_v25, %v9489_v52  ;;  %v8151_v52 = vld [vmem:[%s10156_s1 + $0xbc8] sm:$0xff]  ;;  %v8173_v2 = vld [vmem:[%s10156_s1 + $0xc78] sm:$0xff] }
 0x160   :  { %5210 = vmatpush.bf16.msra.mxu1 %v8102_v7  ;;  %v5004_v29 = vpop.f32.mrf.mxu1  ;;  %v8180_v7 = vld [vmem:[%s10156_s1 + $0xcb0] sm:$0xff] }
 0x161   :  { %5236 = vmatpush.bf16.msra.mxu3 %v8118_v8  ;;  %5198 = vmatmul.bf16.vlgmr.msra.gmra.mxu0 %v1344_v11  ;;  %v5005_v30 = vadd.f32 %v5004_v29, %v4992_v26  ;;  %v8172_v8 = vld [vmem:[%s10156_s1 + $0xc70] sm:$0xff]  ;;  %v8179_v11 = vld [vmem:[%s10156_s1 + $0xca8] sm:$0xff]  ;;  %v8169_v26 = vld [vmem:[%s10156_s1 + $0xc58] sm:$0xff] }
 0x162   :  { %5242 = vmatpush.bf16.msrb.mxu0 %v8133_v3  ;;  %5224 = vmatmul.bf16.vlgmr.msra.gmra.mxu2 %v1346_v12  ;;  %v8189_v3 = vld [vmem:[%s10156_s1 + $0xcf8] sm:$0xff]  ;;  %v8171_v12 = vld [vmem:[%s10156_s1 + $0xc68] sm:$0xff] }
 0x163   :  { %5268 = vmatpush.bf16.msrb.mxu2 %v8149_v6  ;;  %5211 = vmatmul.bf16.vlgmr.msra.gmra.mxu1 %v1345_v15  ;;  %v8164_v6 = vld [vmem:[%s10156_s1 + $0xc30] sm:$0xff] }
 0x164   :  { %5255 = vmatpush.bf16.msrb.mxu1 %v8141_v13  ;;  %5237 = vmatmul.bf16.vlgmr.msra.gmra.mxu3 %v1347_v16  ;;  %v8187_v13 = vld [vmem:[%s10156_s1 + $0xce8] sm:$0xff]  ;;  %v8162_v16 = vld [vmem:[%s10156_s1 + $0xc20] sm:$0xff] }
 0x165   :  { %5281 = vmatpush.bf16.msrb.mxu3 %v8157_v14  ;;  %v5017_v35 = vpop.f32.mrf.mxu2 }
 0x166   :  { %5243 = vmatpush.bf16.msrb.mxu0 %v8132_v17  ;;  %v5018_v36 = vadd.f32 %v5017_v35, %v5005_v30  ;;  %v4993_v40 = vpop.f32.mrf.mxu0  ;;  %v8178_v17 = vld [vmem:[%s10156_s1 + $0xca0] sm:$0xff]  ;;  %v8184_v35 = vld [vmem:[%s10156_s1 + $0xcd0] sm:$0xff] }
 0x167   :  { %5269 = vmatpush.bf16.msrb.mxu2 %v8148_v18  ;;  %v5030_v39 = vpop.f32.mrf.mxu3  ;;  %v8167_v40 = vld [vmem:[%s10156_s1 + $0xc48] sm:$0xff] }
 0x168   :  { %5256 = vmatpush.bf16.msrb.mxu1 %v8140_v19  ;;  %v9591_v41 = vadd.f32 %v5030_v39, %v5018_v36  ;;  %v5006_v44 = vpop.f32.mrf.mxu1  ;;  %v29_v36 = vld [vmem:[%s10155_s0 + $0x68] sm:$0xff] }
 0x169   :  { %5282 = vmatpush.bf16.msrb.mxu3 %v8156_v20  ;;  %v8170_v20 = vld [vmem:[%s10156_s1 + $0xc60] sm:$0xff]  ;;  %1209 = vst [vmem:[#allocation1 + $0x20] ss:$4 sm:$0xff] %v29_v36 }
 0x16a   :  { %5244 = vmatpush.bf16.msrb.mxu0 %v8131_v21  ;;  %v8186_v21 = vld [vmem:[%s10156_s1 + $0xce0] sm:$0xff] }
 0x16b   :  { %5270 = vmatpush.bf16.msrb.mxu2 %v8147_v22  ;;  %v8161_v22 = vld [vmem:[%s10156_s1 + $0xc18] sm:$0xff]  ;;  %v8174_v44 = vld [vmem:[%s10156_s1 + $0xc80] sm:$0xff] }
 0x16c   :  { %5257 = vmatpush.bf16.msrb.mxu1 %v8139_v23  ;;  %v8177_v23 = vld [vmem:[%s10156_s1 + $0xc98] sm:$0xff] }
 0x16d   :  { %5283 = vmatpush.bf16.msrb.mxu3 %v8155_v24  ;;  %v5019_v50 = vpop.f32.mrf.mxu2 }
 0x16e   :  { %5245 = vmatpush.bf16.msrb.mxu0 %v8130_v27  ;;  %v8185_v27 = vld [vmem:[%s10156_s1 + $0xcd8] sm:$0xff]  ;;  %v8182_v50 = vld [vmem:[%s10156_s1 + $0xcc0] sm:$0xff] }
 0x16f   :  { %5271 = vmatpush.bf16.msrb.mxu2 %v8146_v28  ;;  %v5032_v53 = vpop.f32.mrf.mxu3 }
 0x170   :  { %5258 = vmatpush.bf16.msrb.mxu1 %v8138_v31  ;;  %v8160_v31 = vld [vmem:[%s10156_s1 + $0xc10] sm:$0xff] }
 0x171   :  { %5284 = vmatpush.bf16.msrb.mxu3 %v8154_v32  ;;  %v8176_v32 = vld [vmem:[%s10156_s1 + $0xc90] sm:$0xff] }
 0x172   :  { %5246 = vmatpush.bf16.msrb.mxu0 %v8129_v33  ;;  %v1216_v36 = vld.sshfl [vmem:[#allocation1 + $0x30] sm:$0xff pattern:$0x73625140] }
 0x173   :  { %5272 = vmatpush.bf16.msrb.mxu2 %v8145_v34  ;;  %v8168_v34 = vld [vmem:[%s10156_s1 + $0xc50] sm:$0xff] }
 0x174   :  { %5259 = vmatpush.bf16.msrb.mxu1 %v8137_v37  ;;  %v8159_v37 = vld [vmem:[%s10156_s1 + $0xc08] sm:$0xff] }
 0x175   :  { %5285 = vmatpush.bf16.msrb.mxu3 %v8153_v38  ;;  %v8175_v38 = vld [vmem:[%s10156_s1 + $0xc88] sm:$0xff] }
 0x176   :  { %5247 = vmatpush.bf16.msrb.mxu0 %v8128_v42 }
 0x177   :  { %5273 = vmatpush.bf16.msrb.mxu2 %v8144_v43  ;;  %v8158_v43 = vld [vmem:[%s10156_s1 + $0xc00] sm:$0xff] }
 0x178   :  { %5260 = vmatpush.bf16.msrb.mxu1 %v8136_v45  ;;  %v8197_v45 = vld [vmem:[%s10156_s1 + $0xd38] sm:$0xff] }
 0x179   :  { %5286 = vmatpush.bf16.msrb.mxu3 %v8152_v46  ;;  %v1210_v46 = vld.sshfl [vmem:[#allocation1] sm:$0xff pattern:$0x73625140] }
 0x17a   :  { %5248 = vmatpush.bf16.msrb.mxu0 %v8127_v48  ;;  %v8213_v48 = vld [vmem:[%s10156_s1 + $0xdb8] sm:$0xff]  ;;  %v1352_v53 = vpack.c.bf16 %v1210_v46, %v1210_v46 }
 0x17b   :  { %5274 = vmatpush.bf16.msrb.mxu2 %v8143_v49  ;;  %v8166_v49 = vld [vmem:[%s10156_s1 + $0xc40] sm:$0xff] }
 0x17c   :  { %5261 = vmatpush.bf16.msrb.mxu1 %v8135_v51  ;;  %v1211_v51 = vld.sshfl [vmem:[#allocation1 + $0x8] sm:$0xff pattern:$0x73625140] }
 0x17d   :  { %5287 = vmatpush.bf16.msrb.mxu3 %v8151_v52  ;;  %v1213_v52 = vld.sshfl [vmem:[#allocation1 + $0x18] sm:$0xff pattern:$0x73625140]  ;;  %v1353_v57 = vpack.c.bf16 %v1211_v51, %v1211_v51  ;;  %v8252_v51 = vld [vmem:[%s10156_s1 + $0xef0] sm:$0xff] }
 0x17e   :  { %5249 = vmatpush.bf16.msrb.mxu0 %v8126_v54  ;;  %v5043_v14 = vpop.f32.mrf.mxu0  ;;  %v1354_v54 = vpack.c.bf16 %v1212_v47, %v1212_v47  ;;  %v1355_v58 = vpack.c.bf16 %v1213_v52, %v1213_v52  ;;  %v8227_v52 = vld [vmem:[%s10156_s1 + $0xe28] sm:$0xff] }
 0x17f   :  { %5275 = vmatpush.bf16.msrb.mxu2 %v8142_v55  ;;  %v5044_v15 = vadd.f32 %v5043_v14, %v9591_v41  ;;  %v8183_v41 = vld [vmem:[%s10156_s1 + $0xcc8] sm:$0xff]  ;;  %v8205_v55 = vld [vmem:[%s10156_s1 + $0xd78] sm:$0xff] }
 0x180   :  { %5262 = vmatpush.bf16.msrb.mxu1 %v8134_v60  ;;  %v5056_v18 = vpop.f32.mrf.mxu1  ;;  %v8212_v60 = vld [vmem:[%s10156_s1 + $0xdb0] sm:$0xff] }
 0x181   :  { %5288 = vmatpush.bf16.msrb.mxu3 %v8150_v61  ;;  %5250 = vmatmul.bf16.vlgmr.msrb.gmra.mxu0 %v1348_v0  ;;  %v5057_v19 = vadd.f32 %v5056_v18, %v5044_v15  ;;  %v8204_v61 = vld [vmem:[%s10156_s1 + $0xd70] sm:$0xff]  ;;  %v8211_v0 = vld [vmem:[%s10156_s1 + $0xda8] sm:$0xff]  ;;  %v8201_v15 = vld [vmem:[%s10156_s1 + $0xd58] sm:$0xff] }
 0x182   :  { %5294 = vmatpush.bf16.msra.mxu0 %v8165_v56  ;;  %5276 = vmatmul.bf16.vlgmr.msrb.gmra.mxu2 %v1350_v1  ;;  %v8221_v56 = vld [vmem:[%s10156_s1 + $0xdf8] sm:$0xff]  ;;  %v8203_v1 = vld [vmem:[%s10156_s1 + $0xd68] sm:$0xff] }
 0x183   :  { %5320 = vmatpush.bf16.msra.mxu2 %v8181_v59  ;;  %5263 = vmatmul.bf16.vlgmr.msrb.gmra.mxu1 %v1349_v4  ;;  %v8196_v59 = vld [vmem:[%s10156_s1 + $0xd30] sm:$0xff] }
 0x184   :  { %5307 = vmatpush.bf16.msra.mxu1 %v8173_v2  ;;  %5289 = vmatmul.bf16.vlgmr.msrb.gmra.mxu3 %v1351_v5  ;;  %v8219_v2 = vld [vmem:[%s10156_s1 + $0xde8] sm:$0xff]  ;;  %v8194_v5 = vld [vmem:[%s10156_s1 + $0xd20] sm:$0xff] }
 0x185   :  { %5333 = vmatpush.bf16.msra.mxu3 %v8189_v3  ;;  %v5069_v24 = vpop.f32.mrf.mxu2 }
 0x186   :  { %5295 = vmatpush.bf16.msra.mxu0 %v8164_v6  ;;  %v5070_v25 = vadd.f32 %v5069_v24, %v5057_v19  ;;  %v5045_v29 = vpop.f32.mrf.mxu0  ;;  %v8210_v6 = vld [vmem:[%s10156_s1 + $0xda0] sm:$0xff]  ;;  %v8216_v24 = vld [vmem:[%s10156_s1 + $0xdd0] sm:$0xff] }
 0x187   :  { %5321 = vmatpush.bf16.msra.mxu2 %v8180_v7  ;;  %v5082_v28 = vpop.f32.mrf.mxu3  ;;  %v8199_v29 = vld [vmem:[%s10156_s1 + $0xd48] sm:$0xff] }
 0x188   :  { %5308 = vmatpush.bf16.msra.mxu1 %v8172_v8  ;;  %v9693_v30 = vadd.f32 %v5082_v28, %v5070_v25  ;;  %v5058_v33 = vpop.f32.mrf.mxu1  ;;  %v30_v25 = vld [vmem:[%s10155_s0 + $0x70] sm:$0xff] }
 0x189   :  { %5334 = vmatpush.bf16.msra.mxu3 %v8188_v9  ;;  %v8202_v9 = vld [vmem:[%s10156_s1 + $0xd60] sm:$0xff]  ;;  %1218 = vst [vmem:[#allocation1] ss:$4 sm:$0xff] %v30_v25 }
 0x18a   :  { %5296 = vmatpush.bf16.msra.mxu0 %v8163_v10  ;;  %v8218_v10 = vld [vmem:[%s10156_s1 + $0xde0] sm:$0xff] }
 0x18b   :  { %5322 = vmatpush.bf16.msra.mxu2 %v8179_v11  ;;  %v8193_v11 = vld [vmem:[%s10156_s1 + $0xd18] sm:$0xff]  ;;  %v8206_v33 = vld [vmem:[%s10156_s1 + $0xd80] sm:$0xff] }
 0x18c   :  { %5309 = vmatpush.bf16.msra.mxu1 %v8171_v12  ;;  %v8209_v12 = vld [vmem:[%s10156_s1 + $0xd98] sm:$0xff] }
 0x18d   :  { %5335 = vmatpush.bf16.msra.mxu3 %v8187_v13  ;;  %v5071_v39 = vpop.f32.mrf.mxu2 }
 0x18e   :  { %5297 = vmatpush.bf16.msra.mxu0 %v8162_v16  ;;  %v8217_v16 = vld [vmem:[%s10156_s1 + $0xdd8] sm:$0xff]  ;;  %v8214_v39 = vld [vmem:[%s10156_s1 + $0xdc0] sm:$0xff] }
 0x18f   :  { %5323 = vmatpush.bf16.msra.mxu2 %v8178_v17  ;;  %v5084_v42 = vpop.f32.mrf.mxu3 }
 0x190   :  { %5310 = vmatpush.bf16.msra.mxu1 %v8170_v20  ;;  %v8192_v20 = vld [vmem:[%s10156_s1 + $0xd10] sm:$0xff] }
 0x191   :  { %5336 = vmatpush.bf16.msra.mxu3 %v8186_v21  ;;  %v8208_v21 = vld [vmem:[%s10156_s1 + $0xd90] sm:$0xff] }
 0x192   :  { %5298 = vmatpush.bf16.msra.mxu0 %v8161_v22  ;;  %v1222_v25 = vld.sshfl [vmem:[#allocation1 + $0x10] sm:$0xff pattern:$0x73625140] }
 0x193   :  { %5324 = vmatpush.bf16.msra.mxu2 %v8177_v23  ;;  %v8200_v23 = vld [vmem:[%s10156_s1 + $0xd50] sm:$0xff] }
 0x194   :  { %5311 = vmatpush.bf16.msra.mxu1 %v8169_v26  ;;  %v8191_v26 = vld [vmem:[%s10156_s1 + $0xd08] sm:$0xff] }
 0x195   :  { %5337 = vmatpush.bf16.msra.mxu3 %v8185_v27  ;;  %v8207_v27 = vld [vmem:[%s10156_s1 + $0xd88] sm:$0xff] }
 0x196   :  { %5299 = vmatpush.bf16.msra.mxu0 %v8160_v31 }
 0x197   :  { %5325 = vmatpush.bf16.msra.mxu2 %v8176_v32  ;;  %v8190_v32 = vld [vmem:[%s10156_s1 + $0xd00] sm:$0xff] }
 0x198   :  { %5312 = vmatpush.bf16.msra.mxu1 %v8168_v34  ;;  %v8229_v34 = vld [vmem:[%s10156_s1 + $0xe38] sm:$0xff] }
 0x199   :  { %5338 = vmatpush.bf16.msra.mxu3 %v8184_v35  ;;  %v1214_v35 = vld.sshfl [vmem:[#allocation1 + $0x20] sm:$0xff pattern:$0x73625140] }
 0x19a   :  { %5300 = vmatpush.bf16.msra.mxu0 %v8159_v37  ;;  %v8245_v37 = vld [vmem:[%s10156_s1 + $0xeb8] sm:$0xff]  ;;  %v1356_v42 = vpack.c.bf16 %v1214_v35, %v1214_v35 }
 0x19b   :  { %5326 = vmatpush.bf16.msra.mxu2 %v8175_v38  ;;  %v8198_v38 = vld [vmem:[%s10156_s1 + $0xd40] sm:$0xff] }
 0x19c   :  { %5313 = vmatpush.bf16.msra.mxu1 %v8167_v40  ;;  %v1215_v40 = vld.sshfl [vmem:[#allocation1 + $0x28] sm:$0xff pattern:$0x73625140] }
 0x19d   :  { %5339 = vmatpush.bf16.msra.mxu3 %v8183_v41  ;;  %v1217_v41 = vld.sshfl [vmem:[#allocation1 + $0x38] sm:$0xff pattern:$0x73625140]  ;;  %v1357_v46 = vpack.c.bf16 %v1215_v40, %v1215_v40  ;;  %v8284_v40 = vld [vmem:[%s10156_s1 + $0xff0] sm:$0xff] }
 0x19e   :  { %5301 = vmatpush.bf16.msra.mxu0 %v8158_v43  ;;  %v5095_v3 = vpop.f32.mrf.mxu0  ;;  %v1358_v43 = vpack.c.bf16 %v1216_v36, %v1216_v36  ;;  %v1359_v47 = vpack.c.bf16 %v1217_v41, %v1217_v41  ;;  %v8259_v41 = vld [vmem:[%s10156_s1 + $0xf28] sm:$0xff] }
 0x19f   :  { %5327 = vmatpush.bf16.msra.mxu2 %v8174_v44  ;;  %v5096_v4 = vadd.f32 %v5095_v3, %v9693_v30  ;;  %v8215_v30 = vld [vmem:[%s10156_s1 + $0xdc8] sm:$0xff]  ;;  %v8237_v44 = vld [vmem:[%s10156_s1 + $0xe78] sm:$0xff] }
 0x1a0   :  { %5314 = vmatpush.bf16.msra.mxu1 %v8166_v49  ;;  %v5108_v7 = vpop.f32.mrf.mxu1  ;;  %v8244_v49 = vld [vmem:[%s10156_s1 + $0xeb0] sm:$0xff] }
 0x1a1   :  { %5340 = vmatpush.bf16.msra.mxu3 %v8182_v50  ;;  %5302 = vmatmul.bf16.vlgmr.msra.gmra.mxu0 %v1352_v53  ;;  %v5109_v8 = vadd.f32 %v5108_v7, %v5096_v4  ;;  %v8236_v50 = vld [vmem:[%s10156_s1 + $0xe70] sm:$0xff]  ;;  %v8243_v53 = vld [vmem:[%s10156_s1 + $0xea8] sm:$0xff]  ;;  %v8233_v4 = vld [vmem:[%s10156_s1 + $0xe58] sm:$0xff] }
 0x1a2   :  { %5346 = vmatpush.bf16.msrb.mxu0 %v8197_v45  ;;  %5328 = vmatmul.bf16.vlgmr.msra.gmra.mxu2 %v1354_v54  ;;  %v8253_v45 = vld [vmem:[%s10156_s1 + $0xef8] sm:$0xff]  ;;  %v8235_v54 = vld [vmem:[%s10156_s1 + $0xe68] sm:$0xff] }
 0x1a3   :  { %5372 = vmatpush.bf16.msrb.mxu2 %v8213_v48  ;;  %5315 = vmatmul.bf16.vlgmr.msra.gmra.mxu1 %v1353_v57  ;;  %v8228_v48 = vld [vmem:[%s10156_s1 + $0xe30] sm:$0xff] }
 0x1a4   :  { %5359 = vmatpush.bf16.msrb.mxu1 %v8205_v55  ;;  %5341 = vmatmul.bf16.vlgmr.msra.gmra.mxu3 %v1355_v58  ;;  %v8251_v55 = vld [vmem:[%s10156_s1 + $0xee8] sm:$0xff]  ;;  %v8226_v58 = vld [vmem:[%s10156_s1 + $0xe20] sm:$0xff] }
 0x1a5   :  { %5385 = vmatpush.bf16.msrb.mxu3 %v8221_v56  ;;  %v5121_v13 = vpop.f32.mrf.mxu2 }
 0x1a6   :  { %5347 = vmatpush.bf16.msrb.mxu0 %v8196_v59  ;;  %v5122_v14 = vadd.f32 %v5121_v13, %v5109_v8  ;;  %v5097_v18 = vpop.f32.mrf.mxu0  ;;  %v8242_v59 = vld [vmem:[%s10156_s1 + $0xea0] sm:$0xff]  ;;  %v8248_v13 = vld [vmem:[%s10156_s1 + $0xed0] sm:$0xff] }
 0x1a7   :  { %5373 = vmatpush.bf16.msrb.mxu2 %v8212_v60  ;;  %v5134_v17 = vpop.f32.mrf.mxu3  ;;  %v8231_v18 = vld [vmem:[%s10156_s1 + $0xe48] sm:$0xff] }
 0x1a8   :  { %5360 = vmatpush.bf16.msrb.mxu1 %v8204_v61  ;;  %v9795_v19 = vadd.f32 %v5134_v17, %v5122_v14  ;;  %v5110_v22 = vpop.f32.mrf.mxu1  ;;  %v31_v14 = vld [vmem:[%s10155_s0 + $0x78] sm:$0xff] }
 0x1a9   :  { %5386 = vmatpush.bf16.msrb.mxu3 %v8220_v62  ;;  %v8234_v62 = vld [vmem:[%s10156_s1 + $0xe60] sm:$0xff]  ;;  %1219 = vst [vmem:[#allocation1 + $0x20] ss:$4 sm:$0xff] %v31_v14 }
 0x1aa   :  { %5348 = vmatpush.bf16.msrb.mxu0 %v8195_v63  ;;  %v8250_v63 = vld [vmem:[%s10156_s1 + $0xee0] sm:$0xff] }
 0x1ab   :  { %5374 = vmatpush.bf16.msrb.mxu2 %v8211_v0  ;;  %v8225_v0 = vld [vmem:[%s10156_s1 + $0xe18] sm:$0xff]  ;;  %v8238_v22 = vld [vmem:[%s10156_s1 + $0xe80] sm:$0xff] }
 0x1ac   :  { %5361 = vmatpush.bf16.msrb.mxu1 %v8203_v1  ;;  %v8241_v1 = vld [vmem:[%s10156_s1 + $0xe98] sm:$0xff] }
 0x1ad   :  { %5387 = vmatpush.bf16.msrb.mxu3 %v8219_v2  ;;  %v5123_v28 = vpop.f32.mrf.mxu2 }
 0x1ae   :  { %5349 = vmatpush.bf16.msrb.mxu0 %v8194_v5  ;;  %v8249_v5 = vld [vmem:[%s10156_s1 + $0xed8] sm:$0xff]  ;;  %v8246_v28 = vld [vmem:[%s10156_s1 + $0xec0] sm:$0xff] }
 0x1af   :  { %5375 = vmatpush.bf16.msrb.mxu2 %v8210_v6  ;;  %v5136_v31 = vpop.f32.mrf.mxu3 }
 0x1b0   :  { %5362 = vmatpush.bf16.msrb.mxu1 %v8202_v9  ;;  %v8224_v9 = vld [vmem:[%s10156_s1 + $0xe10] sm:$0xff] }
 0x1b1   :  { %5388 = vmatpush.bf16.msrb.mxu3 %v8218_v10  ;;  %v8240_v10 = vld [vmem:[%s10156_s1 + $0xe90] sm:$0xff] }
 0x1b2   :  { %5350 = vmatpush.bf16.msrb.mxu0 %v8193_v11  ;;  %v1226_v14 = vld.sshfl [vmem:[#allocation1 + $0x30] sm:$0xff pattern:$0x73625140] }
 0x1b3   :  { %5376 = vmatpush.bf16.msrb.mxu2 %v8209_v12  ;;  %v8232_v12 = vld [vmem:[%s10156_s1 + $0xe50] sm:$0xff] }
 0x1b4   :  { %5363 = vmatpush.bf16.msrb.mxu1 %v8201_v15  ;;  %v8223_v15 = vld [vmem:[%s10156_s1 + $0xe08] sm:$0xff] }
 0x1b5   :  { %5389 = vmatpush.bf16.msrb.mxu3 %v8217_v16  ;;  %v8239_v16 = vld [vmem:[%s10156_s1 + $0xe88] sm:$0xff] }
 0x1b6   :  { %5351 = vmatpush.bf16.msrb.mxu0 %v8192_v20 }
 0x1b7   :  { %5377 = vmatpush.bf16.msrb.mxu2 %v8208_v21  ;;  %v8222_v21 = vld [vmem:[%s10156_s1 + $0xe00] sm:$0xff] }
 0x1b8   :  { %5364 = vmatpush.bf16.msrb.mxu1 %v8200_v23  ;;  %v8261_v23 = vld [vmem:[%s10156_s1 + $0xf38] sm:$0xff] }
 0x1b9   :  { %5390 = vmatpush.bf16.msrb.mxu3 %v8216_v24  ;;  %v1220_v24 = vld.sshfl [vmem:[#allocation1] sm:$0xff pattern:$0x73625140] }
 0x1ba   :  { %5352 = vmatpush.bf16.msrb.mxu0 %v8191_v26  ;;  %v8277_v26 = vld [vmem:[%s10156_s1 + $0xfb8] sm:$0xff]  ;;  %v1360_v31 = vpack.c.bf16 %v1220_v24, %v1220_v24 }
 0x1bb   :  { %5378 = vmatpush.bf16.msrb.mxu2 %v8207_v27  ;;  %v8230_v27 = vld [vmem:[%s10156_s1 + $0xe40] sm:$0xff] }
 0x1bc   :  { %5365 = vmatpush.bf16.msrb.mxu1 %v8199_v29  ;;  %v1221_v29 = vld.sshfl [vmem:[#allocation1 + $0x8] sm:$0xff pattern:$0x73625140] }
 0x1bd   :  { %5391 = vmatpush.bf16.msrb.mxu3 %v8215_v30  ;;  %v1223_v30 = vld.sshfl [vmem:[#allocation1 + $0x18] sm:$0xff pattern:$0x73625140]  ;;  %v1361_v35 = vpack.c.bf16 %v1221_v29, %v1221_v29  ;;  %v8316_v29 = vld [vmem:[%s10156_s1 + $0x10f0] sm:$0xff] }
 0x1be   :  { %5353 = vmatpush.bf16.msrb.mxu0 %v8190_v32  ;;  %v5147_v56 = vpop.f32.mrf.mxu0  ;;  %v1362_v32 = vpack.c.bf16 %v1222_v25, %v1222_v25  ;;  %v1363_v36 = vpack.c.bf16 %v1223_v30, %v1223_v30  ;;  %v8291_v30 = vld [vmem:[%s10156_s1 + $0x1028] sm:$0xff] }
 0x1bf   :  { %5379 = vmatpush.bf16.msrb.mxu2 %v8206_v33  ;;  %v5148_v57 = vadd.f32 %v5147_v56, %v9795_v19  ;;  %v8247_v19 = vld [vmem:[%s10156_s1 + $0xec8] sm:$0xff]  ;;  %v8269_v33 = vld [vmem:[%s10156_s1 + $0xf78] sm:$0xff] }
 0x1c0   :  { %5366 = vmatpush.bf16.msrb.mxu1 %v8198_v38  ;;  %v5160_v60 = vpop.f32.mrf.mxu1  ;;  %v8276_v38 = vld [vmem:[%s10156_s1 + $0xfb0] sm:$0xff] }
 0x1c1   :  { %5392 = vmatpush.bf16.msrb.mxu3 %v8214_v39  ;;  %5354 = vmatmul.bf16.vlgmr.msrb.gmra.mxu0 %v1356_v42  ;;  %v5161_v61 = vadd.f32 %v5160_v60, %v5148_v57  ;;  %v8268_v39 = vld [vmem:[%s10156_s1 + $0xf70] sm:$0xff]  ;;  %v8275_v42 = vld [vmem:[%s10156_s1 + $0xfa8] sm:$0xff]  ;;  %v8265_v57 = vld [vmem:[%s10156_s1 + $0xf58] sm:$0xff] }
 0x1c2   :  { %5398 = vmatpush.bf16.msra.mxu0 %v8229_v34  ;;  %5380 = vmatmul.bf16.vlgmr.msrb.gmra.mxu2 %v1358_v43  ;;  %v8285_v34 = vld [vmem:[%s10156_s1 + $0xff8] sm:$0xff]  ;;  %v8267_v43 = vld [vmem:[%s10156_s1 + $0xf68] sm:$0xff] }
 0x1c3   :  { %5424 = vmatpush.bf16.msra.mxu2 %v8245_v37  ;;  %5367 = vmatmul.bf16.vlgmr.msrb.gmra.mxu1 %v1357_v46  ;;  %v8260_v37 = vld [vmem:[%s10156_s1 + $0xf30] sm:$0xff] }
 0x1c4   :  { %5411 = vmatpush.bf16.msra.mxu1 %v8237_v44  ;;  %5393 = vmatmul.bf16.vlgmr.msrb.gmra.mxu3 %v1359_v47  ;;  %v8283_v44 = vld [vmem:[%s10156_s1 + $0xfe8] sm:$0xff]  ;;  %v8258_v47 = vld [vmem:[%s10156_s1 + $0xf20] sm:$0xff] }
 0x1c5   :  { %5437 = vmatpush.bf16.msra.mxu3 %v8253_v45  ;;  %v5173_v2 = vpop.f32.mrf.mxu2 }
 0x1c6   :  { %5399 = vmatpush.bf16.msra.mxu0 %v8228_v48  ;;  %v5174_v3 = vadd.f32 %v5173_v2, %v5161_v61  ;;  %v5149_v7 = vpop.f32.mrf.mxu0  ;;  %v8274_v48 = vld [vmem:[%s10156_s1 + $0xfa0] sm:$0xff]  ;;  %v8280_v2 = vld [vmem:[%s10156_s1 + $0xfd0] sm:$0xff] }
 0x1c7   :  { %5425 = vmatpush.bf16.msra.mxu2 %v8244_v49  ;;  %v5186_v6 = vpop.f32.mrf.mxu3  ;;  %v8263_v7 = vld [vmem:[%s10156_s1 + $0xf48] sm:$0xff] }
 0x1c8   :  { %5412 = vmatpush.bf16.msra.mxu1 %v8236_v50  ;;  %v9897_v8 = vadd.f32 %v5186_v6, %v5174_v3  ;;  %v5162_v11 = vpop.f32.mrf.mxu1  ;;  %v32_v3 = vld [vmem:[%s10155_s0 + $0x80] sm:$0xff] }
 0x1c9   :  { %5438 = vmatpush.bf16.msra.mxu3 %v8252_v51  ;;  %v8266_v51 = vld [vmem:[%s10156_s1 + $0xf60] sm:$0xff]  ;;  %1228 = vst [vmem:[#allocation1] ss:$4 sm:$0xff] %v32_v3 }
 0x1ca   :  { %5400 = vmatpush.bf16.msra.mxu0 %v8227_v52  ;;  %v8282_v52 = vld [vmem:[%s10156_s1 + $0xfe0] sm:$0xff] }
 0x1cb   :  { %5426 = vmatpush.bf16.msra.mxu2 %v8243_v53  ;;  %v8257_v53 = vld [vmem:[%s10156_s1 + $0xf18] sm:$0xff]  ;;  %v8270_v11 = vld [vmem:[%s10156_s1 + $0xf80] sm:$0xff] }
 0x1cc   :  { %5413 = vmatpush.bf16.msra.mxu1 %v8235_v54  ;;  %v8273_v54 = vld [vmem:[%s10156_s1 + $0xf98] sm:$0xff]  ;;  %v8302_v3 = vld [vmem:[%s10156_s1 + $0x1080] sm:$0xff] }
 0x1cd   :  { %5439 = vmatpush.bf16.msra.mxu3 %v8251_v55  ;;  %v5175_v17 = vpop.f32.mrf.mxu2 }
 0x1ce   :  { %5401 = vmatpush.bf16.msra.mxu0 %v8226_v58  ;;  %v8281_v58 = vld [vmem:[%s10156_s1 + $0xfd8] sm:$0xff]  ;;  %v8278_v17 = vld [vmem:[%s10156_s1 + $0xfc0] sm:$0xff] }
 0x1cf   :  { %5427 = vmatpush.bf16.msra.mxu2 %v8242_v59  ;;  %v5188_v20 = vpop.f32.mrf.mxu3 }
 0x1d0   :  { %5414 = vmatpush.bf16.msra.mxu1 %v8234_v62  ;;  %v8256_v62 = vld [vmem:[%s10156_s1 + $0xf10] sm:$0xff] }
 0x1d1   :  { %5440 = vmatpush.bf16.msra.mxu3 %v8250_v63  ;;  %v8272_v63 = vld [vmem:[%s10156_s1 + $0xf90] sm:$0xff] }
 0x1d2   :  { %5402 = vmatpush.bf16.msra.mxu0 %v8225_v0 }
 0x1d3   :  { %5428 = vmatpush.bf16.msra.mxu2 %v8241_v1  ;;  %v8264_v1 = vld [vmem:[%s10156_s1 + $0xf50] sm:$0xff] }
 0x1d4   :  { %5415 = vmatpush.bf16.msra.mxu1 %v8233_v4  ;;  %v8255_v4 = vld [vmem:[%s10156_s1 + $0xf08] sm:$0xff] }
 0x1d5   :  { %5441 = vmatpush.bf16.msra.mxu3 %v8249_v5  ;;  %v8271_v5 = vld [vmem:[%s10156_s1 + $0xf88] sm:$0xff] }
 0x1d6   :  { %5403 = vmatpush.bf16.msra.mxu0 %v8224_v9 }
 0x1d7   :  { %5429 = vmatpush.bf16.msra.mxu2 %v8240_v10  ;;  %v8254_v10 = vld [vmem:[%s10156_s1 + $0xf00] sm:$0xff] }
 0x1d8   :  { %5416 = vmatpush.bf16.msra.mxu1 %v8232_v12  ;;  %v8293_v12 = vld [vmem:[%s10156_s1 + $0x1038] sm:$0xff] }
 0x1d9   :  { %5442 = vmatpush.bf16.msra.mxu3 %v8248_v13  ;;  %v1224_v13 = vld.sshfl [vmem:[#allocation1 + $0x20] sm:$0xff pattern:$0x73625140] }
 0x1da   :  { %5404 = vmatpush.bf16.msra.mxu0 %v8223_v15  ;;  %v8309_v15 = vld [vmem:[%s10156_s1 + $0x10b8] sm:$0xff]  ;;  %v1364_v20 = vpack.c.bf16 %v1224_v13, %v1224_v13 }
 0x1db   :  { %5430 = vmatpush.bf16.msra.mxu2 %v8239_v16  ;;  %v8262_v16 = vld [vmem:[%s10156_s1 + $0xf40] sm:$0xff] }
 0x1dc   :  { %5417 = vmatpush.bf16.msra.mxu1 %v8231_v18  ;;  %v1225_v18 = vld.sshfl [vmem:[#allocation1 + $0x28] sm:$0xff pattern:$0x73625140] }
 0x1dd   :  { %5443 = vmatpush.bf16.msra.mxu3 %v8247_v19  ;;  %v1227_v19 = vld.sshfl [vmem:[#allocation1 + $0x38] sm:$0xff pattern:$0x73625140]  ;;  %v1365_v24 = vpack.c.bf16 %v1225_v18, %v1225_v18 }
 0x1de   :  { %5405 = vmatpush.bf16.msra.mxu0 %v8222_v21  ;;  %v5199_v45 = vpop.f32.mrf.mxu0  ;;  %v1366_v21 = vpack.c.bf16 %v1226_v14, %v1226_v14  ;;  %v1367_v25 = vpack.c.bf16 %v1227_v19, %v1227_v19 }
 0x1df   :  { %5431 = vmatpush.bf16.msra.mxu2 %v8238_v22  ;;  %v5200_v46 = vadd.f32 %v5199_v45, %v9897_v8  ;;  %v8279_v8 = vld [vmem:[%s10156_s1 + $0xfc8] sm:$0xff]  ;;  %v8301_v22 = vld [vmem:[%s10156_s1 + $0x1078] sm:$0xff] }
 0x1e0   :  { %5418 = vmatpush.bf16.msra.mxu1 %v8230_v27  ;;  %v5212_v49 = vpop.f32.mrf.mxu1  ;;  %v8308_v27 = vld [vmem:[%s10156_s1 + $0x10b0] sm:$0xff] }
 0x1e1   :  { %5444 = vmatpush.bf16.msra.mxu3 %v8246_v28  ;;  %5406 = vmatmul.bf16.vlgmr.msra.gmra.mxu0 %v1360_v31  ;;  %v5213_v50 = vadd.f32 %v5212_v49, %v5200_v46  ;;  %v8300_v28 = vld [vmem:[%s10156_s1 + $0x1070] sm:$0xff]  ;;  %v8307_v31 = vld [vmem:[%s10156_s1 + $0x10a8] sm:$0xff] }
 0x1e2   :  { %5450 = vmatpush.bf16.msrb.mxu0 %v8261_v23  ;;  %5432 = vmatmul.bf16.vlgmr.msra.gmra.mxu2 %v1362_v32  ;;  %v8317_v23 = vld [vmem:[%s10156_s1 + $0x10f8] sm:$0xff]  ;;  %v33_v32 = vld [vmem:[%s10155_s0 + $0x88] sm:$0x3] }
 0x1e3   :  { %5476 = vmatpush.bf16.msrb.mxu2 %v8277_v26  ;;  %5419 = vmatmul.bf16.vlgmr.msra.gmra.mxu1 %v1361_v35  ;;  %v8292_v26 = vld [vmem:[%s10156_s1 + $0x1030] sm:$0xff]  ;;  %1229 = vst [vmem:[#allocation1 + $0x20] ss:$4 sm:$0xff] %v33_v32 }
 0x1e4   :  { %5463 = vmatpush.bf16.msrb.mxu1 %v8269_v33  ;;  %5445 = vmatmul.bf16.vlgmr.msra.gmra.mxu3 %v1363_v36  ;;  %v8299_v33 = vld [vmem:[%s10156_s1 + $0x1068] sm:$0xff] }
 0x1e5   :  { %5489 = vmatpush.bf16.msrb.mxu3 %v8285_v34  ;;  %v5225_v55 = vpop.f32.mrf.mxu2  ;;  %v8315_v34 = vld [vmem:[%s10156_s1 + $0x10e8] sm:$0xff] }
 0x1e6   :  { %5451 = vmatpush.bf16.msrb.mxu0 %v8260_v37  ;;  %v5226_v56 = vadd.f32 %v5225_v55, %v5213_v50  ;;  %v5201_v60 = vpop.f32.mrf.mxu0  ;;  %v8290_v37 = vld [vmem:[%s10156_s1 + $0x1020] sm:$0xff] }
 0x1e7   :  { %5477 = vmatpush.bf16.msrb.mxu2 %v8276_v38  ;;  %v5238_v59 = vpop.f32.mrf.mxu3  ;;  %v8306_v38 = vld [vmem:[%s10156_s1 + $0x10a0] sm:$0xff]  ;;  %v8303_v60 = vld [vmem:[%s10156_s1 + $0x1088] sm:$0xff] }
 0x1e8   :  { %5464 = vmatpush.bf16.msrb.mxu1 %v8268_v39  ;;  %v9999_v61 = vadd.f32 %v5238_v59, %v5226_v56  ;;  %v5214_v0 = vpop.f32.mrf.mxu1  ;;  %v8296_v56 = vld [vmem:[%s10156_s1 + $0x1050] sm:$0xff]  ;;  %v8287_v59 = vld [vmem:[%s10156_s1 + $0x1008] sm:$0xff] }
 0x1e9   :  { %5490 = vmatpush.bf16.msrb.mxu3 %v8284_v40 }
 0x1ea   :  { %5452 = vmatpush.bf16.msrb.mxu0 %v8259_v41  ;;  %v8298_v41 = vld [vmem:[%s10156_s1 + $0x1060] sm:$0xff] }
 0x1eb   :  { %5478 = vmatpush.bf16.msrb.mxu2 %v8275_v42  ;;  %v8314_v42 = vld [vmem:[%s10156_s1 + $0x10e0] sm:$0xff] }
 0x1ec   :  { %5465 = vmatpush.bf16.msrb.mxu1 %v8267_v43  ;;  %v8289_v43 = vld [vmem:[%s10156_s1 + $0x1018] sm:$0xff] }
 0x1ed   :  { %5491 = vmatpush.bf16.msrb.mxu3 %v8283_v44  ;;  %v5227_v6 = vpop.f32.mrf.mxu2  ;;  %v8305_v44 = vld [vmem:[%s10156_s1 + $0x1098] sm:$0xff] }
 0x1ee   :  { %5453 = vmatpush.bf16.msrb.mxu0 %v8258_v47  ;;  %v8297_v47 = vld [vmem:[%s10156_s1 + $0x1058] sm:$0xff]  ;;  %v1231_v6 = vld.sshfl [vmem:[#allocation1 + $0x8] sm:$0xff pattern:$0x73625140] }
 0x1ef   :  { %5479 = vmatpush.bf16.msrb.mxu2 %v8274_v48  ;;  %v5240_v9 = vpop.f32.mrf.mxu3  ;;  %v8313_v48 = vld [vmem:[%s10156_s1 + $0x10d8] sm:$0xff]  ;;  %v1369_v13 = vpack.c.bf16 %v1231_v6, %v1231_v6 }
 0x1f0   :  { %5466 = vmatpush.bf16.msrb.mxu1 %v8266_v51 }
 0x1f1   :  { %5492 = vmatpush.bf16.msrb.mxu3 %v8282_v52  ;;  %v1128_v52 = vld [vmem:[%s10156_s1 + $0x1118] sm:$0x3] }
 0x1f2   :  { %5454 = vmatpush.bf16.msrb.mxu0 %v8257_v53  ;;  %v8288_v53 = vld [vmem:[%s10156_s1 + $0x1010] sm:$0xff] }
 0x1f3   :  { %5480 = vmatpush.bf16.msrb.mxu2 %v8273_v54  ;;  %v8304_v54 = vld [vmem:[%s10156_s1 + $0x1090] sm:$0xff] }
 0x1f4   :  { %5467 = vmatpush.bf16.msrb.mxu1 %v8265_v57  ;;  %v8312_v57 = vld [vmem:[%s10156_s1 + $0x10d0] sm:$0xff] }
 0x1f5   :  { %5493 = vmatpush.bf16.msrb.mxu3 %v8281_v58  ;;  %v3566_v58 = vunpack.c.l.b16 %v1128_v52 }
 0x1f6   :  { %5455 = vmatpush.bf16.msrb.mxu0 %v8256_v62  ;;  %v8295_v62 = vld [vmem:[%s10156_s1 + $0x1048] sm:$0xff] }
 0x1f7   :  { %5481 = vmatpush.bf16.msrb.mxu2 %v8272_v63  ;;  %v8311_v63 = vld [vmem:[%s10156_s1 + $0x10c8] sm:$0xff]  ;;  %v4114_v0 = vpack.c.b16 %v3566_v58, %v3566_v58 }
 0x1f8   :  { %5468 = vmatpush.bf16.msrb.mxu1 %v8264_v1 }
 0x1f9   :  { %5494 = vmatpush.bf16.msrb.mxu3 %v8280_v2  ;;  %v8286_v2 = vld [vmem:[%s10156_s1 + $0x1000] sm:$0xff]  ;;  %v4668_v9 = vsel %vm4666_vm0, %v4114_v0, 0 }
 0x1fa   :  { %5456 = vmatpush.bf16.msrb.mxu0 %v8255_v4  ;;  %v1230_v4 = vld.sshfl [vmem:[#allocation1] sm:$0xff pattern:$0x73625140] }
 0x1fb   :  { %5482 = vmatpush.bf16.msrb.mxu2 %v8271_v5  ;;  %v1232_v5 = vld.sshfl [vmem:[#allocation1 + $0x10] sm:$0xff pattern:$0x73625140] }
 0x1fc   :  { %5469 = vmatpush.bf16.msrb.mxu1 %v8263_v7  ;;  %v8294_v7 = vld [vmem:[%s10156_s1 + $0x1040] sm:$0xff] }
 0x1fd   :  { %5495 = vmatpush.bf16.msrb.mxu3 %v8279_v8  ;;  %v8310_v8 = vld [vmem:[%s10156_s1 + $0x10c0] sm:$0xff] }
 0x1fe   :  { %5457 = vmatpush.bf16.msrb.mxu0 %v8254_v10  ;;  %v5251_v35 = vpop.f32.mrf.mxu0  ;;  %v1233_v10 = vld.sshfl [vmem:[#allocation1 + $0x18] sm:$0xff pattern:$0x73625140] }
 0x1ff   :  { %5483 = vmatpush.bf16.msrb.mxu2 %v8270_v11  ;;  %v5252_v36 = vadd.f32 %v5251_v35, %v9999_v61  ;;  %v1368_v11 = vpack.c.bf16 %v1230_v4, %v1230_v4  ;;  %v1371_v14 = vpack.c.bf16 %v1233_v10, %v1233_v10 }
 0x200   :  { %5470 = vmatpush.bf16.msrb.mxu1 %v8262_v16  ;;  %v5264_v39 = vpop.f32.mrf.mxu1  ;;  %v8319_v16 = vld [vmem:[%s10156_s1 + $0x1108] sm:$0xff] }
 0x201   :  { %5496 = vmatpush.bf16.msrb.mxu3 %v8278_v17  ;;  %5458 = vmatmul.bf16.vlgmr.msrb.gmra.mxu0 %v1364_v20  ;;  %v5265_v40 = vadd.f32 %v5264_v39, %v5252_v36  ;;  %v8318_v20 = vld [vmem:[%s10156_s1 + $0x1100] sm:$0xff] }
 0x202   :  { %5502 = vmatpush.bf16.msra.mxu0 %v8293_v12  ;;  %5484 = vmatmul.bf16.vlgmr.msrb.gmra.mxu2 %v1366_v21  ;;  %v1370_v12 = vpack.c.bf16 %v1232_v5, %v1232_v5 }
 0x203   :  { %5528 = vmatpush.bf16.msra.mxu2 %v8309_v15  ;;  %5471 = vmatmul.bf16.vlgmr.msrb.gmra.mxu1 %v1365_v24  ;;  %v8320_v15 = vld [vmem:[%s10156_s1 + $0x1110] sm:$0xff]  ;;  %s8349_s1 = smov [#allocation2]  }
 0x204   :  { %5515 = vmatpush.bf16.msra.mxu1 %v8301_v22  ;;  %5497 = vmatmul.bf16.vlgmr.msrb.gmra.mxu3 %v1367_v25  ;;  %v1234_v22 = vld.sshfl [vmem:[#allocation1 + $0x20] sm:$0xff pattern:$0x73625140]  ;;  %s5574_s9 = sshll.u32 %s8349_s1, 4  ;;  %s5575_s9 = int_to_ptr.vmem [resolvable:$true] %s5574_s9 }
 0x205   :  { %5541 = vmatpush.bf16.msra.mxu3 %v8317_v23  ;;  %v5277_v45 = vpop.f32.mrf.mxu2  ;;  %v1372_v25 = vpack.c.bf16 %v1234_v22, %v1234_v22 }
 0x206   :  { %5503 = vmatpush.bf16.msra.mxu0 %v8292_v26  ;;  %v5278_v46 = vadd.f32 %v5277_v45, %v5265_v40  ;;  %v5253_v50 = vpop.f32.mrf.mxu0 }
 0x207   :  { %5529 = vmatpush.bf16.msra.mxu2 %v8308_v27  ;;  %v5290_v49 = vpop.f32.mrf.mxu3 }
 0x208   :  { %5516 = vmatpush.bf16.msra.mxu1 %v8300_v28  ;;  %v5291_v51 = vadd.f32 %v5290_v49, %v5278_v46  ;;  %v5266_v55 = vpop.f32.mrf.mxu1 }
 0x209   :  { %5542 = vmatpush.bf16.msra.mxu3 %v8316_v29 }
 0x20a   :  { %5504 = vmatpush.bf16.msra.mxu0 %v8291_v30 }
 0x20b   :  { %5530 = vmatpush.bf16.msra.mxu2 %v8307_v31 }
 0x20c   :  { %5517 = vmatpush.bf16.msra.mxu1 %v8299_v33 }
 0x20d   :  { %5543 = vmatpush.bf16.msra.mxu3 %v8315_v34  ;;  %v5279_v61 = vpop.f32.mrf.mxu2 }
 0x20e   :  { %5505 = vmatpush.bf16.msra.mxu0 %v8290_v37 }
 0x20f   :  { %5531 = vmatpush.bf16.msra.mxu2 %v8306_v38  ;;  %v5292_v1 = vpop.f32.mrf.mxu3 }
 0x210   :  { %5518 = vmatpush.bf16.msra.mxu1 %v8298_v41 }
 0x211   :  { %5544 = vmatpush.bf16.msra.mxu3 %v8314_v42 }
 0x212   :  { %5506 = vmatpush.bf16.msra.mxu0 %v8289_v43 }
 0x213   :  { %5532 = vmatpush.bf16.msra.mxu2 %v8305_v44 }
 0x214   :  { %5519 = vmatpush.bf16.msra.mxu1 %v8297_v47 }
 0x215   :  { %5545 = vmatpush.bf16.msra.mxu3 %v8313_v48 }
 0x216   :  { %5507 = vmatpush.bf16.msra.mxu0 %v8288_v53 }
 0x217   :  { %5533 = vmatpush.bf16.msra.mxu2 %v8304_v54 }
 0x218   :  { %5520 = vmatpush.bf16.msra.mxu1 %v8296_v56 }
 0x219   :  { %5546 = vmatpush.bf16.msra.mxu3 %v8312_v57 }
 0x21a   :  { %5508 = vmatpush.bf16.msra.mxu0 %v8287_v59 }
 0x21b   :  { %5534 = vmatpush.bf16.msra.mxu2 %v8303_v60 }
 0x21c   :  { %5521 = vmatpush.bf16.msra.mxu1 %v8295_v62 }
 0x21d   :  { %5547 = vmatpush.bf16.msra.mxu3 %v8311_v63 }
 0x21e   :  { %5509 = vmatpush.bf16.msra.mxu0 %v8286_v2  ;;  %v5303_v17 = vpop.f32.mrf.mxu0 }
 0x21f   :  { %5535 = vmatpush.bf16.msra.mxu2 %v8302_v3  ;;  %v5304_v18 = vadd.f32 %v5303_v17, %v5291_v51 }
 0x220   :  { %5522 = vmatpush.bf16.msra.mxu1 %v8294_v7  ;;  %v5316_v19 = vpop.f32.mrf.mxu1 }
 0x221   :  { %5548 = vmatpush.bf16.msra.mxu3 %v8310_v8  ;;  %5510 = vmatmul.bf16.vlgmr.msra.gmra.mxu0 %v1368_v11  ;;  %v5317_v21 = vadd.f32 %v5316_v19, %v5304_v18 }
 0x222   :  { %5558 = vmatpush.bf16.msrb.mxu0 %v4668_v9  ;;  %5536 = vmatmul.bf16.vlgmr.msra.gmra.mxu2 %v1370_v12 }
 0x223   :  { %5523 = vmatmul.bf16.vlgmr.msra.gmra.mxu1 %v1369_v13 }
 0x224   :  { %5549 = vmatmul.bf16.vlgmr.msra.gmra.mxu3 %v1371_v14 }
 0x225   :  { %v5329_v23 = vpop.f32.mrf.mxu2 }
 0x226   :  { %5559 = vmatpush.bf16.msrb.mxu0 %v8320_v15  ;;  %v5330_v24 = vadd.f32 %v5329_v23, %v5317_v21  ;;  %v5305_v27 = vpop.f32.mrf.mxu0 }
 0x227   :  { %v5342_v26 = vpop.f32.mrf.mxu3 }
 0x228   :  { %v5343_v28 = vadd.f32 %v5342_v26, %v5330_v24  ;;  %v5318_v29 = vpop.f32.mrf.mxu1 }
 0x22a   :  { %5560 = vmatpush.bf16.msrb.mxu0 %v8319_v16 }
 0x22d   :  { %v5331_v30 = vpop.f32.mrf.mxu2 }
 0x22e   :  { %5561 = vmatpush.bf16.msrb.mxu0 %v8318_v20 }
 0x22f   :  { %v5344_v31 = vpop.f32.mrf.mxu3 }
 0x231   :  { %7773 = vmatmul.msk.bf16.vlgmr.msrb.gmra.mxu0 %vm4662_vm1, %v1372_v25 }
 0x23e   :  { %v5355_v32 = vpop.f32.mrf.mxu0 }
 0x23f   :  { %v5356_v33 = vadd.f32 %v5355_v32, %v5343_v28 }
 0x240   :  { %v5368_v34 = vpop.f32.mrf.mxu1 }
 0x241   :  { %v5369_v35 = vadd.f32 %v5368_v34, %v5356_v33 }
 0x245   :  { %v5381_v36 = vpop.f32.mrf.mxu2 }
 0x246   :  { %v5382_v37 = vadd.f32 %v5381_v36, %v5369_v35  ;;  %v5357_v39 = vpop.f32.mrf.mxu0 }
 0x247   :  { %v5394_v38 = vpop.f32.mrf.mxu3 }
 0x248   :  { %v5395_v40 = vadd.f32 %v5394_v38, %v5382_v37  ;;  %v5370_v41 = vpop.f32.mrf.mxu1 }
 0x24d   :  { %v5383_v42 = vpop.f32.mrf.mxu2 }
 0x24f   :  { %v5396_v43 = vpop.f32.mrf.mxu3 }
 0x25e   :  { %v5407_v44 = vpop.f32.mrf.mxu0 }
 0x25f   :  { %v5408_v58 = vadd.f32 %v5407_v44, %v5395_v40 }
 0x260   :  { %v5420_v45 = vpop.f32.mrf.mxu1 }
 0x261   :  { %v5421_v60 = vadd.f32 %v5420_v45, %v5408_v58 }
 0x265   :  { %v5433_v46 = vpop.f32.mrf.mxu2 }
 0x266   :  { %v5409_v48 = vpop.f32.mrf.mxu0  ;;  %v5434_v62 = vadd.f32 %v5433_v46, %v5421_v60 }
 0x267   :  { %v5446_v47 = vpop.f32.mrf.mxu3 }
 0x268   :  { %v5422_v49 = vpop.f32.mrf.mxu1  ;;  %v5447_v63 = vadd.f32 %v5446_v47, %v5434_v62 }
 0x26d   :  { %v5435_v50 = vpop.f32.mrf.mxu2 }
 0x26f   :  { %v5448_v51 = vpop.f32.mrf.mxu3 }
 0x27e   :  { %v5459_v52 = vpop.f32.mrf.mxu0 }
 0x27f   :  { %v5460_v0 = vadd.f32 %v5459_v52, %v5447_v63 }
 0x280   :  { %v5472_v53 = vpop.f32.mrf.mxu1 }
 0x281   :  { %v5473_v1 = vadd.f32 %v5472_v53, %v5460_v0 }
 0x285   :  { %v5485_v54 = vpop.f32.mrf.mxu2 }
 0x286   :  { %v5461_v56 = vpop.f32.mrf.mxu0  ;;  %v5486_v2 = vadd.f32 %v5485_v54, %v5473_v1 }
 0x287   :  { %v5498_v55 = vpop.f32.mrf.mxu3 }
 0x288   :  { %v5474_v57 = vpop.f32.mrf.mxu1  ;;  %v5499_v5 = vadd.f32 %v5498_v55, %v5486_v2 }
 0x28d   :  { %v5487_v59 = vpop.f32.mrf.mxu2 }
 0x28f   :  { %v5500_v61 = vpop.f32.mrf.mxu3 }
 0x29e   :  { %v5511_v3 = vpop.f32.mrf.mxu0 }
 0x29f   :  { %v5512_v6 = vadd.f32 %v5511_v3, %v5499_v5 }
 0x2a0   :  { %v5524_v4 = vpop.f32.mrf.mxu1 }
 0x2a1   :  { %v5525_v10 = vadd.f32 %v5524_v4, %v5512_v6 }
 0x2a5   :  { %v5537_v7 = vpop.f32.mrf.mxu2 }
 0x2a6   :  { %v5513_v8 = vpop.f32.mrf.mxu0  ;;  %v5538_v12 = vadd.f32 %v5537_v7, %v5525_v10 }
 0x2a7   :  { %v5550_v9 = vpop.f32.mrf.mxu3 }
 0x2a8   :  { %v5526_v11 = vpop.f32.mrf.mxu1  ;;  %v5551_v14 = vadd.f32 %v5550_v9, %v5538_v12 }
 0x2ad   :  { %v5539_v13 = vpop.f32.mrf.mxu2 }
 0x2ae   :  { %v5563_v16 = vpop.f32.mrf.mxu0 }
 0x2af   :  { %v5552_v15 = vpop.f32.mrf.mxu3  ;;  %v5564_v17 = vadd.f32 %v5563_v16, %v5551_v14 }
 0x2b1   :  { %5568 = vst.msk [vmem:[#allocation2] sm:$0x3] %vm5567_vm2, %v5564_v17 }
 0x2b2   :  { %5579 = dma.vmem_to_hbm [thread:$0]  %s5575_s9, 32, %s5577_s12, [#allocation3]  }
 0x2b6   :  { %v5565_v18 = vpop.f32.mrf.mxu0 }
 0x2b7   :  { %8347 = dma.done.wait [#allocation3], 32  }
 0x2b8   :  { %8348 = vsyncadd [#allocation3], 4294967264 }
 0x2b9   :  { %5584 = vsyncpa [#allocation3], 1 }

</bundles_post_ra>
